<compile_context>
chip_gen: v7x
topology: tpu7x:2x2x1
jax: 0.10.0
libtpu: 0.0.40
codegen_flags: <defaults>
</compile_context>

<pallas_src>
import math
import functools

import jax
import jax.numpy as jnp
from jax.experimental import pallas as pl
from jax.experimental.pallas import tpu as pltpu

# ----------------------------- model config ---------------------------------
EMBED_DIM = 128                      # C (real Point-MAE: 384 = 3*128) - lane aligned
DEPTH = 2                            # number of decoder Blocks
NUM_HEADS = 4
HEAD_DIM = EMBED_DIM // NUM_HEADS    # 32
MLP_RATIO = 4.0
HIDDEN_DIM = int(EMBED_DIM * MLP_RATIO)   # 512
LN_EPS = 1e-5
SCALE = HEAD_DIM ** (-0.5)           # qk_scale = head_dim ** -0.5


# ------------------------------ shared math ---------------------------------
def _layernorm(x, gamma, beta):
    mu = jnp.mean(x, axis=-1, keepdims=True)
    var = jnp.mean(jnp.square(x - mu), axis=-1, keepdims=True)
    return (x - mu) * jax.lax.rsqrt(var + LN_EPS) * gamma + beta


def _gelu(x):
    # tanh-form GELU so the transcendental lands on the EUP (jnp.tanh).
    # TODO(synk): switch to exact erf-GELU for bit-parity with nn.GELU(); the
    # tanh approximation deviates by < 1e-3.
    c = math.sqrt(2.0 / math.pi)
    return 0.5 * x * (1.0 + jnp.tanh(c * (x + 0.044715 * (x * x * x))))


def _softmax_last(x):
    m = jnp.max(x, axis=-1, keepdims=True)
    e = jnp.exp(x - m)
    return e * pl.reciprocal(jnp.sum(e, axis=-1, keepdims=True), approx=True)


# ------------------------------ fused kernel --------------------------------
def decoder_kernel(x_ref, pos_ref,
                   g1_ref, b1_ref,
                   wqkv_ref, wproj_ref, bproj_ref,
                   g2_ref, b2_ref,
                   w1_ref, bb1_ref, w2_ref, bb2_ref,
                   gf_ref, bf_ref,
                   o_ref):
    N, C = x_ref.shape
    R = o_ref.shape[0]
    H = NUM_HEADS
    D = C // H
    L = g1_ref.shape[0]
    bf16, f32 = jnp.bfloat16, jnp.float32

    x = x_ref[...]                                           # (N, C) f32
    pos = pos_ref[...]                                       # (N, C) f32

    # Weights are VMEM-resident for all layers; activation stays in vregs.
    for l in range(L):
        # PyTorch: x = Block(x + pos)   (pos is re-added before every block)
        x = x + pos

        # ------------- attention branch: x = x + Attn(LN1(x)) ---------------
        xn = _layernorm(x, g1_ref[l], b1_ref[l])
        # Fused QKV: one lane-dense (N, C) x (C, 3C) matmul, f32 accumulate.
        qkv = jnp.dot(xn.astype(bf16), wqkv_ref[l],
                      preferred_element_type=f32)            # (N, 3C)
        qkv_bf = qkv.astype(bf16)                            # single cast (v5e)

        # Head split (columns: [q | k | v], head h owns cols h*D:(h+1)*D).
        q = jnp.stack([qkv_bf[:, h * D:(h + 1) * D] for h in range(H)], axis=0)
        k = jnp.stack([qkv_bf[:, C + h * D:C + (h + 1) * D] for h in range(H)], axis=0)
        v = jnp.stack([qkv_bf[:, 2 * C + h * D:2 * C + (h + 1) * D] for h in range(H)], axis=0)
        # q,k,v: (H, N, D) bf16

        s = jnp.einsum("hnd,hmd->hnm", q, k,
                       preferred_element_type=f32) * SCALE   # (H, N, N) f32
        p = _softmax_last(s)                                 # f32
        o = jnp.einsum("hnm,hmd->hnd", p.astype(bf16), v,
                       preferred_element_type=f32)           # (H, N, D) f32

        # Concat heads along lanes -> single (N, C) x (C, C) output projection.
        o_cat = jnp.concatenate([o[h] for h in range(H)], axis=-1)   # (N, C)
        y = jnp.dot(o_cat.astype(bf16), wproj_ref[l],
                    preferred_element_type=f32) + bproj_ref[l]
        x = x + y

        # ------------- MLP branch: x = x + MLP(LN2(x)) -----------------------
        xn2 = _layernorm(x, g2_ref[l], b2_ref[l])
        h1 = jnp.dot(xn2.astype(bf16), w1_ref[l],
                     preferred_element_type=f32) + bb1_ref[l]         # (N, HID)
        h1 = _gelu(h1)
        h2 = jnp.dot(h1.astype(bf16), w2_ref[l],
                     preferred_element_type=f32) + bb2_ref[l]         # (N, C)
        x = x + h2

    # Final LayerNorm on the last R tokens (sublane-aligned slice, lane-dense store).
    xt = x[N - R:, :]
    o_ref[...] = _layernorm(xt, gf_ref[...], bf_ref[...]).astype(o_ref.dtype)


# -------------------------------- wrapper ------------------------------------
def run_decoder(x, pos, params, return_token_num):
    B, N, C = x.shape
    R = return_token_num
    L = params["wqkv"].shape[0]
    HID = params["w1"].shape[-1]

    sq = pl.Squeezed()
    tok = lambda b: (b, 0, 0)        # per-batch activation / output blocks
    whole3 = lambda b: (0, 0, 0)     # whole (L, ...) weight arrays, resident
    whole2 = lambda b: (0, 0)        # final-norm params

    in_specs = [
        pl.BlockSpec((sq, N, C), tok),           # x
        pl.BlockSpec((sq, N, C), tok),           # pos
        pl.BlockSpec((L, 1, C), whole3),         # norm1 gamma
        pl.BlockSpec((L, 1, C), whole3),         # norm1 beta
        pl.BlockSpec((L, C, 3 * C), whole3),     # fused W_qkv
        pl.BlockSpec((L, C, C), whole3),         # W_proj
        pl.BlockSpec((L, 1, C), whole3),         # proj bias
        pl.BlockSpec((L, 1, C), whole3),         # norm2 gamma
        pl.BlockSpec((L, 1, C), whole3),         # norm2 beta
        pl.BlockSpec((L, C, HID), whole3),       # mlp fc1 weight
        pl.BlockSpec((L, 1, HID), whole3),       # mlp fc1 bias
        pl.BlockSpec((L, HID, C), whole3),       # mlp fc2 weight
        pl.BlockSpec((L, 1, C), whole3),         # mlp fc2 bias
        pl.BlockSpec((1, C), whole2),            # final norm gamma
        pl.BlockSpec((1, C), whole2),            # final norm beta
    ]
    out_spec = pl.BlockSpec((sq, R, C), tok)

    return pl.pallas_call(
        decoder_kernel,
        out_shape=jax.ShapeDtypeStruct((B, R, C), x.dtype),
        grid=(B,),
        in_specs=in_specs,
        out_specs=out_spec,
        compiler_params=pltpu.CompilerParams(
            dimension_semantics=("parallel",),
            vmem_limit_bytes=32 * 1024 * 1024,
        ),
    )(x, pos,
      params["g1"], params["b1"],
      params["wqkv"], params["wproj"], params["bproj"],
      params["g2"], params["b2"],
      params["w1"], params["bb1"], params["w2"], params["bb2"],
      params["norm_g"], params["norm_b"])


@functools.partial(jax.jit, static_argnames=("return_token_num",))
def transformer_decoder(x, pos, params, return_token_num):
    return run_decoder(x, pos, params, return_token_num)


# ------------------------------ param init -----------------------------------
def _xavier_uniform(key, fan_in, fan_out):
    # torch nn.Linear weight is (out, in) with xavier bound sqrt(6/(in+out));
    # stored transposed as (in, out) so y = x @ W (+ b).
    bound = math.sqrt(6.0 / (fan_in + fan_out))
    w_torch = jax.random.uniform(key, (fan_out, fan_in), jnp.float32, -bound, bound)
    return w_torch.T


def init_params(key, depth=DEPTH):
    C, HID = EMBED_DIM, HIDDEN_DIM
    wqkv_l, wp_l, w1_l, w2_l = [], [], [], []
    for _ in range(depth):
        key, kq, kp, k1, k2 = jax.random.split(key, 5)
        # torch qkv output columns are [q | k | v]; within each, head h owns
        # columns h*D:(h+1)*D  (reshape (..., 3, H, D) in the torch forward).
        wqkv_l.append(_xavier_uniform(kq, C, 3 * C))     # (C, 3C), no bias
        wp_l.append(_xavier_uniform(kp, C, C))           # (C, C)
        w1_l.append(_xavier_uniform(k1, C, HID))         # (C, HID)
        w2_l.append(_xavier_uniform(k2, HID, C))         # (HID, C)

    stack_bf16 = lambda lst: jnp.stack(lst).astype(jnp.bfloat16)
    return dict(
        g1=jnp.ones((depth, 1, C), jnp.float32),
        b1=jnp.zeros((depth, 1, C), jnp.float32),
        wqkv=stack_bf16(wqkv_l),
        wproj=stack_bf16(wp_l),
        bproj=jnp.zeros((depth, 1, C), jnp.float32),
        g2=jnp.ones((depth, 1, C), jnp.float32),
        b2=jnp.zeros((depth, 1, C), jnp.float32),
        w1=stack_bf16(w1_l),
        bb1=jnp.zeros((depth, 1, HID), jnp.float32),
        w2=stack_bf16(w2_l),
        bb2=jnp.zeros((depth, 1, C), jnp.float32),
        norm_g=jnp.ones((1, C), jnp.float32),
        norm_b=jnp.zeros((1, C), jnp.float32),
    )


# --------------------------- pure-JAX reference -------------------------------
def decoder_reference(x, pos, params, return_token_num):
    """Mirrors the PyTorch forward (same bf16-at-MXU / f32-accumulate policy)."""
    bf16, f32 = jnp.bfloat16, jnp.float32
    B, N, C = x.shape
    H, D = NUM_HEADS, C // NUM_HEADS
    depth = params["wqkv"].shape[0]
    h = x
    for l in range(depth):
        h = h + pos
        xn = _layernorm(h, params["g1"][l], params["b1"][l]).astype(bf16)
        qkv = jnp.einsum("bnc,cf->bnf", xn, params["wqkv"][l],
                         preferred_element_type=f32)
        q, k, v = jnp.split(qkv, 3, axis=-1)
        q = q.reshape(B, N, H, D).transpose(0, 2, 1, 3)
        k = k.reshape(B, N, H, D).transpose(0, 2, 1, 3)
        v = v.reshape(B, N, H, D).transpose(0, 2, 1, 3)
        s = jnp.einsum("bhnd,bhmd->bhnm", q.astype(bf16), k.astype(bf16),
                       preferred_element_type=f32) * SCALE
        p = jax.nn.softmax(s, axis=-1)
        o = jnp.einsum("bhnm,bhmd->bhnd", p.astype(bf16), v.astype(bf16),
                       preferred_element_type=f32)
        o = o.transpose(0, 2, 1, 3).reshape(B, N, C)
        y = jnp.einsum("bnc,cd->bnd", o.astype(bf16), params["wproj"][l],
                       preferred_element_type=f32) + params["bproj"][l]
        h = h + y
        xn2 = _layernorm(h, params["g2"][l], params["b2"][l]).astype(bf16)
        m1 = jnp.einsum("bnc,ch->bnh", xn2, params["w1"][l],
                        preferred_element_type=f32) + params["bb1"][l]
        m1 = _gelu(m1)
        m2 = jnp.einsum("bnh,hc->bnc", m1.astype(bf16), params["w2"][l],
                        preferred_element_type=f32) + params["bb2"][l]
        h = h + m2
    h = h[:, -return_token_num:, :]
    return _layernorm(h, params["norm_g"], params["norm_b"])


# ---------------------------------- main --------------------------------------
if __name__ == "__main__":
    B, N = 2, 16
    RETURN_TOKEN_NUM = 8

    root = jax.random.PRNGKey(0)
    k_x, k_pos, k_param = jax.random.split(root, 3)
    x = jax.random.normal(k_x, (B, N, EMBED_DIM), jnp.float32)
    pos = jax.random.normal(k_pos, (B, N, EMBED_DIM), jnp.float32)
    params = init_params(k_param)

    out = transformer_decoder(x, pos, params, RETURN_TOKEN_NUM)
    out = jax.block_until_ready(out)

    assert out.shape == (B, RETURN_TOKEN_NUM, EMBED_DIM), out.shape
    assert bool(jnp.all(jnp.isfinite(out)))

    ref = decoder_reference(x, pos, params, RETURN_TOKEN_NUM)
    err = float(jnp.max(jnp.abs(out - ref)))
    assert err < 5e-2, f"kernel vs reference max|diff| = {err}"

    print("KERNEL_OK")
</pallas_src>

<mosaic_0001>
module attributes {stable_mosaic.version = 11 : i64} {
  func.func @decoder_kernel(%arg0: i32, %arg1: memref<1x16x128xf32, #tpu.memory_space<vmem>>, %arg2: memref<1x16x128xf32, #tpu.memory_space<vmem>>, %arg3: memref<2x1x128xf32, #tpu.memory_space<vmem>>, %arg4: memref<2x1x128xf32, #tpu.memory_space<vmem>>, %arg5: memref<2x128x384xbf16, #tpu.memory_space<vmem>>, %arg6: memref<2x128x128xbf16, #tpu.memory_space<vmem>>, %arg7: memref<2x1x128xf32, #tpu.memory_space<vmem>>, %arg8: memref<2x1x128xf32, #tpu.memory_space<vmem>>, %arg9: memref<2x1x128xf32, #tpu.memory_space<vmem>>, %arg10: memref<2x128x512xbf16, #tpu.memory_space<vmem>>, %arg11: memref<2x1x512xf32, #tpu.memory_space<vmem>>, %arg12: memref<2x512x128xbf16, #tpu.memory_space<vmem>>, %arg13: memref<2x1x128xf32, #tpu.memory_space<vmem>>, %arg14: memref<1x128xf32, #tpu.memory_space<vmem>>, %arg15: memref<1x128xf32, #tpu.memory_space<vmem>>, %arg16: memref<1x8x128xf32, #tpu.memory_space<vmem>>) attributes {dimension_semantics = [#tpu.dimension_semantics<parallel>], iteration_bounds = array<i64: 2>, scalar_prefetch = 0 : i64, scratch_operands = 0 : i64, tpu.core_type = #tpu.core_type<tc>, window_params = [{transform_indices = @transform_0, window_bounds = array<i64: 1, 16, 128>}, {transform_indices = @transform_1, window_bounds = array<i64: 1, 16, 128>}, {pipeline_mode = #tpu.pipeline_mode<synchronous>, transform_indices = @transform_2, window_bounds = array<i64: 2, 1, 128>}, {pipeline_mode = #tpu.pipeline_mode<synchronous>, transform_indices = @transform_3, window_bounds = array<i64: 2, 1, 128>}, {pipeline_mode = #tpu.pipeline_mode<synchronous>, transform_indices = @transform_4, window_bounds = array<i64: 2, 128, 384>}, {pipeline_mode = #tpu.pipeline_mode<synchronous>, transform_indices = @transform_5, window_bounds = array<i64: 2, 128, 128>}, {pipeline_mode = #tpu.pipeline_mode<synchronous>, transform_indices = @transform_6, window_bounds = array<i64: 2, 1, 128>}, {pipeline_mode = #tpu.pipeline_mode<synchronous>, transform_indices = @transform_7, window_bounds = array<i64: 2, 1, 128>}, {pipeline_mode = #tpu.pipeline_mode<synchronous>, transform_indices = @transform_8, window_bounds = array<i64: 2, 1, 128>}, {pipeline_mode = #tpu.pipeline_mode<synchronous>, transform_indices = @transform_9, window_bounds = array<i64: 2, 128, 512>}, {pipeline_mode = #tpu.pipeline_mode<synchronous>, transform_indices = @transform_10, window_bounds = array<i64: 2, 1, 512>}, {pipeline_mode = #tpu.pipeline_mode<synchronous>, transform_indices = @transform_11, window_bounds = array<i64: 2, 512, 128>}, {pipeline_mode = #tpu.pipeline_mode<synchronous>, transform_indices = @transform_12, window_bounds = array<i64: 2, 1, 128>}, {pipeline_mode = #tpu.pipeline_mode<synchronous>, transform_indices = @transform_13, window_bounds = array<i64: 1, 128>}, {pipeline_mode = #tpu.pipeline_mode<synchronous>, transform_indices = @transform_14, window_bounds = array<i64: 1, 128>}, {transform_indices = @transform_15, window_bounds = array<i64: 1, 8, 128>}]} {
    %c0 = arith.constant 0 : index
    %c0_0 = arith.constant 0 : index
    %c0_1 = arith.constant 0 : index
    %0 = vector.load %arg1[%c0, %c0_0, %c0_1] : memref<1x16x128xf32, #tpu.memory_space<vmem>>, vector<1x16x128xf32>
    %1 = vector.shape_cast %0 : vector<1x16x128xf32> to vector<16x128xf32>
    %c0_2 = arith.constant 0 : index
    %c0_3 = arith.constant 0 : index
    %c0_4 = arith.constant 0 : index
    %2 = vector.load %arg2[%c0_2, %c0_3, %c0_4] : memref<1x16x128xf32, #tpu.memory_space<vmem>>, vector<1x16x128xf32>
    %3 = vector.shape_cast %2 : vector<1x16x128xf32> to vector<16x128xf32>
    %4 = arith.addf %1, %3 : vector<16x128xf32>
    %c0_5 = arith.constant 0 : index
    %c0_6 = arith.constant 0 : index
    %c0_7 = arith.constant 0 : index
    %5 = vector.load %arg3[%c0_5, %c0_6, %c0_7] : memref<2x1x128xf32, #tpu.memory_space<vmem>>, vector<1x1x128xf32>
    %6 = vector.shape_cast %5 : vector<1x1x128xf32> to vector<1x128xf32>
    %c0_8 = arith.constant 0 : index
    %c0_9 = arith.constant 0 : index
    %c0_10 = arith.constant 0 : index
    %7 = vector.load %arg4[%c0_8, %c0_9, %c0_10] : memref<2x1x128xf32, #tpu.memory_space<vmem>>, vector<1x1x128xf32>
    %8 = vector.shape_cast %7 : vector<1x1x128xf32> to vector<1x128xf32>
    %cst = arith.constant dense<0.000000e+00> : vector<16xf32>
    %9 = vector.multi_reduction <add>, %4, %cst [1] : vector<16x128xf32> to vector<16xf32>
    %10 = vector.shape_cast %9 : vector<16xf32> to vector<16x1xf32>
    %cst_11 = arith.constant 1.280000e+02 : f32
    %11 = vector.broadcast %cst_11 : f32 to vector<16x1xf32>
    %12 = arith.divf %10, %11 : vector<16x1xf32>
    %13 = vector.broadcast %12 : vector<16x1xf32> to vector<16x128xf32>
    %14 = arith.subf %4, %13 : vector<16x128xf32>
    %15 = arith.mulf %14, %14 : vector<16x128xf32>
    %cst_12 = arith.constant dense<0.000000e+00> : vector<16xf32>
    %16 = vector.multi_reduction <add>, %15, %cst_12 [1] : vector<16x128xf32> to vector<16xf32>
    %17 = vector.shape_cast %16 : vector<16xf32> to vector<16x1xf32>
    %cst_13 = arith.constant 1.280000e+02 : f32
    %18 = vector.broadcast %cst_13 : f32 to vector<16x1xf32>
    %19 = arith.divf %17, %18 : vector<16x1xf32>
    %20 = vector.broadcast %12 : vector<16x1xf32> to vector<16x128xf32>
    %21 = arith.subf %4, %20 : vector<16x128xf32>
    %cst_14 = arith.constant 9.99999974E-6 : f32
    %22 = vector.broadcast %cst_14 : f32 to vector<16x1xf32>
    %23 = arith.addf %19, %22 : vector<16x1xf32>
    %24 = math.rsqrt %23 : vector<16x1xf32>
    %25 = vector.broadcast %24 : vector<16x1xf32> to vector<16x128xf32>
    %26 = arith.mulf %21, %25 : vector<16x128xf32>
    %27 = vector.broadcast %6 : vector<1x128xf32> to vector<16x128xf32>
    %28 = arith.mulf %26, %27 : vector<16x128xf32>
    %29 = vector.broadcast %8 : vector<1x128xf32> to vector<16x128xf32>
    %30 = arith.addf %28, %29 : vector<16x128xf32>
    %31 = arith.truncf %30 : vector<16x128xf32> to vector<16x128xbf16>
    %c0_15 = arith.constant 0 : index
    %c0_16 = arith.constant 0 : index
    %c0_17 = arith.constant 0 : index
    %32 = vector.load %arg5[%c0_15, %c0_16, %c0_17] : memref<2x128x384xbf16, #tpu.memory_space<vmem>>, vector<1x128x384xbf16>
    %33 = vector.shape_cast %32 : vector<1x128x384xbf16> to vector<128x384xbf16>
    %cst_18 = arith.constant dense<0.000000e+00> : vector<16x384xf32>
    %34 = tpu.matmul %31, %33, %cst_18 {dimension_numbers = #tpu.dot_dimension_numbers<[1], [0], [0], [1], [0, 0, 1, 1], [], []>} : vector<16x128xbf16>, vector<128x384xbf16>, vector<16x384xf32> -> vector<16x384xf32>
    %35 = arith.truncf %34 : vector<16x384xf32> to vector<16x384xbf16>
    %36 = vector.extract_strided_slice %35 {offsets = [0, 0], sizes = [16, 32], strides = [1, 1]} : vector<16x384xbf16> to vector<16x32xbf16>
    %37 = vector.extract_strided_slice %35 {offsets = [0, 32], sizes = [16, 32], strides = [1, 1]} : vector<16x384xbf16> to vector<16x32xbf16>
    %38 = vector.extract_strided_slice %35 {offsets = [0, 64], sizes = [16, 32], strides = [1, 1]} : vector<16x384xbf16> to vector<16x32xbf16>
    %39 = vector.extract_strided_slice %35 {offsets = [0, 96], sizes = [16, 32], strides = [1, 1]} : vector<16x384xbf16> to vector<16x32xbf16>
    %40 = vector.shape_cast %36 : vector<16x32xbf16> to vector<1x16x32xbf16>
    %41 = vector.shape_cast %37 : vector<16x32xbf16> to vector<1x16x32xbf16>
    %42 = vector.shape_cast %38 : vector<16x32xbf16> to vector<1x16x32xbf16>
    %43 = vector.shape_cast %39 : vector<16x32xbf16> to vector<1x16x32xbf16>
    %44 = tpu.concatenate %40, %41, %42, %43 in 0 : vector<1x16x32xbf16>, vector<1x16x32xbf16>, vector<1x16x32xbf16>, vector<1x16x32xbf16> -> vector<4x16x32xbf16>
    %45 = vector.extract_strided_slice %35 {offsets = [0, 128], sizes = [16, 32], strides = [1, 1]} : vector<16x384xbf16> to vector<16x32xbf16>
    %46 = vector.extract_strided_slice %35 {offsets = [0, 160], sizes = [16, 32], strides = [1, 1]} : vector<16x384xbf16> to vector<16x32xbf16>
    %47 = vector.extract_strided_slice %35 {offsets = [0, 192], sizes = [16, 32], strides = [1, 1]} : vector<16x384xbf16> to vector<16x32xbf16>
    %48 = vector.extract_strided_slice %35 {offsets = [0, 224], sizes = [16, 32], strides = [1, 1]} : vector<16x384xbf16> to vector<16x32xbf16>
    %49 = vector.shape_cast %45 : vector<16x32xbf16> to vector<1x16x32xbf16>
    %50 = vector.shape_cast %46 : vector<16x32xbf16> to vector<1x16x32xbf16>
    %51 = vector.shape_cast %47 : vector<16x32xbf16> to vector<1x16x32xbf16>
    %52 = vector.shape_cast %48 : vector<16x32xbf16> to vector<1x16x32xbf16>
    %53 = tpu.concatenate %49, %50, %51, %52 in 0 : vector<1x16x32xbf16>, vector<1x16x32xbf16>, vector<1x16x32xbf16>, vector<1x16x32xbf16> -> vector<4x16x32xbf16>
    %54 = vector.extract_strided_slice %35 {offsets = [0, 256], sizes = [16, 32], strides = [1, 1]} : vector<16x384xbf16> to vector<16x32xbf16>
    %55 = vector.extract_strided_slice %35 {offsets = [0, 288], sizes = [16, 32], strides = [1, 1]} : vector<16x384xbf16> to vector<16x32xbf16>
    %56 = vector.extract_strided_slice %35 {offsets = [0, 320], sizes = [16, 32], strides = [1, 1]} : vector<16x384xbf16> to vector<16x32xbf16>
    %57 = vector.extract_strided_slice %35 {offsets = [0, 352], sizes = [16, 32], strides = [1, 1]} : vector<16x384xbf16> to vector<16x32xbf16>
    %58 = vector.shape_cast %54 : vector<16x32xbf16> to vector<1x16x32xbf16>
    %59 = vector.shape_cast %55 : vector<16x32xbf16> to vector<1x16x32xbf16>
    %60 = vector.shape_cast %56 : vector<16x32xbf16> to vector<1x16x32xbf16>
    %61 = vector.shape_cast %57 : vector<16x32xbf16> to vector<1x16x32xbf16>
    %62 = tpu.concatenate %58, %59, %60, %61 in 0 : vector<1x16x32xbf16>, vector<1x16x32xbf16>, vector<1x16x32xbf16>, vector<1x16x32xbf16> -> vector<4x16x32xbf16>
    "tpu.trace_start"() <{level = 10 : i32, message = "hnd,hmd->hnm"}> : () -> ()
    %cst_19 = arith.constant dense<0.000000e+00> : vector<4x16x16xf32>
    %63 = tpu.matmul %44, %53, %cst_19 {dimension_numbers = #tpu.dot_dimension_numbers<[2], [2], [1], [1], [0, 0, 0, 1, 1, 1], [0], [0]>} : vector<4x16x32xbf16>, vector<4x16x32xbf16>, vector<4x16x16xf32> -> vector<4x16x16xf32>
    "tpu.trace_stop"() : () -> ()
    %cst_20 = arith.constant 0.176776692 : f32
    %64 = vector.broadcast %cst_20 : f32 to vector<4x16x16xf32>
    %65 = arith.mulf %63, %64 : vector<4x16x16xf32>
    %cst_21 = arith.constant dense<0xFF800000> : vector<4x16xf32>
    %66 = vector.multi_reduction <maximumf>, %65, %cst_21 [2] : vector<4x16x16xf32> to vector<4x16xf32>
    %67 = vector.shape_cast %66 : vector<4x16xf32> to vector<4x16x1xf32>
    %68 = vector.broadcast %67 : vector<4x16x1xf32> to vector<4x16x16xf32>
    %69 = arith.subf %65, %68 : vector<4x16x16xf32>
    %70 = math.exp %69 : vector<4x16x16xf32>
    %cst_22 = arith.constant dense<0.000000e+00> : vector<4x16xf32>
    %71 = vector.multi_reduction <add>, %70, %cst_22 [2] : vector<4x16x16xf32> to vector<4x16xf32>
    %72 = vector.shape_cast %71 : vector<4x16xf32> to vector<4x16x1xf32>
    %73 = tpu.reciprocal %72 {approx = true} : vector<4x16x1xf32> -> vector<4x16x1xf32>
    %74 = vector.broadcast %73 : vector<4x16x1xf32> to vector<4x16x16xf32>
    %75 = arith.mulf %70, %74 : vector<4x16x16xf32>
    %76 = arith.truncf %75 : vector<4x16x16xf32> to vector<4x16x16xbf16>
    "tpu.trace_start"() <{level = 10 : i32, message = "hnm,hmd->hnd"}> : () -> ()
    %cst_23 = arith.constant dense<0.000000e+00> : vector<4x16x32xf32>
    %77 = tpu.matmul %76, %62, %cst_23 {dimension_numbers = #tpu.dot_dimension_numbers<[2], [1], [1], [2], [0, 0, 0, 1, 1, 2], [0], [0]>} : vector<4x16x16xbf16>, vector<4x16x32xbf16>, vector<4x16x32xf32> -> vector<4x16x32xf32>
    "tpu.trace_stop"() : () -> ()
    %78 = vector.extract_strided_slice %77 {offsets = [0, 0, 0], sizes = [1, 16, 32], strides = [1, 1, 1]} : vector<4x16x32xf32> to vector<1x16x32xf32>
    %79 = vector.shape_cast %78 : vector<1x16x32xf32> to vector<16x32xf32>
    %80 = vector.extract_strided_slice %77 {offsets = [1, 0, 0], sizes = [1, 16, 32], strides = [1, 1, 1]} : vector<4x16x32xf32> to vector<1x16x32xf32>
    %81 = vector.shape_cast %80 : vector<1x16x32xf32> to vector<16x32xf32>
    %82 = vector.extract_strided_slice %77 {offsets = [2, 0, 0], sizes = [1, 16, 32], strides = [1, 1, 1]} : vector<4x16x32xf32> to vector<1x16x32xf32>
    %83 = vector.shape_cast %82 : vector<1x16x32xf32> to vector<16x32xf32>
    %84 = vector.extract_strided_slice %77 {offsets = [3, 0, 0], sizes = [1, 16, 32], strides = [1, 1, 1]} : vector<4x16x32xf32> to vector<1x16x32xf32>
    %85 = vector.shape_cast %84 : vector<1x16x32xf32> to vector<16x32xf32>
    %86 = tpu.concatenate %79, %81, %83, %85 in 1 : vector<16x32xf32>, vector<16x32xf32>, vector<16x32xf32>, vector<16x32xf32> -> vector<16x128xf32>
    %87 = arith.truncf %86 : vector<16x128xf32> to vector<16x128xbf16>
    %c0_24 = arith.constant 0 : index
    %c0_25 = arith.constant 0 : index
    %c0_26 = arith.constant 0 : index
    %88 = vector.load %arg6[%c0_24, %c0_25, %c0_26] : memref<2x128x128xbf16, #tpu.memory_space<vmem>>, vector<1x128x128xbf16>
    %89 = vector.shape_cast %88 : vector<1x128x128xbf16> to vector<128x128xbf16>
    %cst_27 = arith.constant dense<0.000000e+00> : vector<16x128xf32>
    %90 = tpu.matmul %87, %89, %cst_27 {dimension_numbers = #tpu.dot_dimension_numbers<[1], [0], [0], [1], [0, 0, 1, 1], [], []>} : vector<16x128xbf16>, vector<128x128xbf16>, vector<16x128xf32> -> vector<16x128xf32>
    %c0_28 = arith.constant 0 : index
    %c0_29 = arith.constant 0 : index
    %c0_30 = arith.constant 0 : index
    %91 = vector.load %arg7[%c0_28, %c0_29, %c0_30] : memref<2x1x128xf32, #tpu.memory_space<vmem>>, vector<1x1x128xf32>
    %92 = vector.shape_cast %91 : vector<1x1x128xf32> to vector<1x128xf32>
    %93 = vector.broadcast %92 : vector<1x128xf32> to vector<16x128xf32>
    %94 = arith.addf %90, %93 : vector<16x128xf32>
    %95 = arith.addf %4, %94 : vector<16x128xf32>
    %c0_31 = arith.constant 0 : index
    %c0_32 = arith.constant 0 : index
    %c0_33 = arith.constant 0 : index
    %96 = vector.load %arg8[%c0_31, %c0_32, %c0_33] : memref<2x1x128xf32, #tpu.memory_space<vmem>>, vector<1x1x128xf32>
    %97 = vector.shape_cast %96 : vector<1x1x128xf32> to vector<1x128xf32>
    %c0_34 = arith.constant 0 : index
    %c0_35 = arith.constant 0 : index
    %c0_36 = arith.constant 0 : index
    %98 = vector.load %arg9[%c0_34, %c0_35, %c0_36] : memref<2x1x128xf32, #tpu.memory_space<vmem>>, vector<1x1x128xf32>
    %99 = vector.shape_cast %98 : vector<1x1x128xf32> to vector<1x128xf32>
    %cst_37 = arith.constant dense<0.000000e+00> : vector<16xf32>
    %100 = vector.multi_reduction <add>, %95, %cst_37 [1] : vector<16x128xf32> to vector<16xf32>
    %101 = vector.shape_cast %100 : vector<16xf32> to vector<16x1xf32>
    %cst_38 = arith.constant 1.280000e+02 : f32
    %102 = vector.broadcast %cst_38 : f32 to vector<16x1xf32>
    %103 = arith.divf %101, %102 : vector<16x1xf32>
    %104 = vector.broadcast %103 : vector<16x1xf32> to vector<16x128xf32>
    %105 = arith.subf %95, %104 : vector<16x128xf32>
    %106 = arith.mulf %105, %105 : vector<16x128xf32>
    %cst_39 = arith.constant dense<0.000000e+00> : vector<16xf32>
    %107 = vector.multi_reduction <add>, %106, %cst_39 [1] : vector<16x128xf32> to vector<16xf32>
    %108 = vector.shape_cast %107 : vector<16xf32> to vector<16x1xf32>
    %cst_40 = arith.constant 1.280000e+02 : f32
    %109 = vector.broadcast %cst_40 : f32 to vector<16x1xf32>
    %110 = arith.divf %108, %109 : vector<16x1xf32>
    %111 = vector.broadcast %103 : vector<16x1xf32> to vector<16x128xf32>
    %112 = arith.subf %95, %111 : vector<16x128xf32>
    %cst_41 = arith.constant 9.99999974E-6 : f32
    %113 = vector.broadcast %cst_41 : f32 to vector<16x1xf32>
    %114 = arith.addf %110, %113 : vector<16x1xf32>
    %115 = math.rsqrt %114 : vector<16x1xf32>
    %116 = vector.broadcast %115 : vector<16x1xf32> to vector<16x128xf32>
    %117 = arith.mulf %112, %116 : vector<16x128xf32>
    %118 = vector.broadcast %97 : vector<1x128xf32> to vector<16x128xf32>
    %119 = arith.mulf %117, %118 : vector<16x128xf32>
    %120 = vector.broadcast %99 : vector<1x128xf32> to vector<16x128xf32>
    %121 = arith.addf %119, %120 : vector<16x128xf32>
    %122 = arith.truncf %121 : vector<16x128xf32> to vector<16x128xbf16>
    %c0_42 = arith.constant 0 : index
    %c0_43 = arith.constant 0 : index
    %c0_44 = arith.constant 0 : index
    %123 = vector.load %arg10[%c0_42, %c0_43, %c0_44] : memref<2x128x512xbf16, #tpu.memory_space<vmem>>, vector<1x128x512xbf16>
    %124 = vector.shape_cast %123 : vector<1x128x512xbf16> to vector<128x512xbf16>
    %cst_45 = arith.constant dense<0.000000e+00> : vector<16x512xf32>
    %125 = tpu.matmul %122, %124, %cst_45 {dimension_numbers = #tpu.dot_dimension_numbers<[1], [0], [0], [1], [0, 0, 1, 1], [], []>} : vector<16x128xbf16>, vector<128x512xbf16>, vector<16x512xf32> -> vector<16x512xf32>
    %c0_46 = arith.constant 0 : index
    %c0_47 = arith.constant 0 : index
    %c0_48 = arith.constant 0 : index
    %126 = vector.load %arg11[%c0_46, %c0_47, %c0_48] : memref<2x1x512xf32, #tpu.memory_space<vmem>>, vector<1x1x512xf32>
    %127 = vector.shape_cast %126 : vector<1x1x512xf32> to vector<1x512xf32>
    %128 = vector.broadcast %127 : vector<1x512xf32> to vector<16x512xf32>
    %129 = arith.addf %125, %128 : vector<16x512xf32>
    %cst_49 = arith.constant 5.000000e-01 : f32
    %130 = vector.broadcast %cst_49 : f32 to vector<16x512xf32>
    %131 = arith.mulf %130, %129 : vector<16x512xf32>
    %132 = arith.mulf %129, %129 : vector<16x512xf32>
    %133 = arith.mulf %132, %129 : vector<16x512xf32>
    %cst_50 = arith.constant 4.471500e-02 : f32
    %134 = vector.broadcast %cst_50 : f32 to vector<16x512xf32>
    %135 = arith.mulf %134, %133 : vector<16x512xf32>
    %136 = arith.addf %129, %135 : vector<16x512xf32>
    %cst_51 = arith.constant 0.797884583 : f32
    %137 = vector.broadcast %cst_51 : f32 to vector<16x512xf32>
    %138 = arith.mulf %137, %136 : vector<16x512xf32>
    %139 = math.tanh %138 : vector<16x512xf32>
    %cst_52 = arith.constant 1.000000e+00 : f32
    %140 = vector.broadcast %cst_52 : f32 to vector<16x512xf32>
    %141 = arith.addf %140, %139 : vector<16x512xf32>
    %142 = arith.mulf %131, %141 : vector<16x512xf32>
    %143 = arith.truncf %142 : vector<16x512xf32> to vector<16x512xbf16>
    %c0_53 = arith.constant 0 : index
    %c0_54 = arith.constant 0 : index
    %c0_55 = arith.constant 0 : index
    %144 = vector.load %arg12[%c0_53, %c0_54, %c0_55] : memref<2x512x128xbf16, #tpu.memory_space<vmem>>, vector<1x512x128xbf16>
    %145 = vector.shape_cast %144 : vector<1x512x128xbf16> to vector<512x128xbf16>
    %cst_56 = arith.constant dense<0.000000e+00> : vector<16x128xf32>
    %146 = tpu.matmul %143, %145, %cst_56 {dimension_numbers = #tpu.dot_dimension_numbers<[1], [0], [0], [1], [0, 0, 1, 1], [], []>} : vector<16x512xbf16>, vector<512x128xbf16>, vector<16x128xf32> -> vector<16x128xf32>
    %c0_57 = arith.constant 0 : index
    %c0_58 = arith.constant 0 : index
    %c0_59 = arith.constant 0 : index
    %147 = vector.load %arg13[%c0_57, %c0_58, %c0_59] : memref<2x1x128xf32, #tpu.memory_space<vmem>>, vector<1x1x128xf32>
    %148 = vector.shape_cast %147 : vector<1x1x128xf32> to vector<1x128xf32>
    %149 = vector.broadcast %148 : vector<1x128xf32> to vector<16x128xf32>
    %150 = arith.addf %146, %149 : vector<16x128xf32>
    %151 = arith.addf %95, %150 : vector<16x128xf32>
    %152 = arith.addf %151, %3 : vector<16x128xf32>
    %c1 = arith.constant 1 : index
    %c0_60 = arith.constant 0 : index
    %c0_61 = arith.constant 0 : index
    %153 = vector.load %arg3[%c1, %c0_60, %c0_61] : memref<2x1x128xf32, #tpu.memory_space<vmem>>, vector<1x1x128xf32>
    %154 = vector.shape_cast %153 : vector<1x1x128xf32> to vector<1x128xf32>
    %c1_62 = arith.constant 1 : index
    %c0_63 = arith.constant 0 : index
    %c0_64 = arith.constant 0 : index
    %155 = vector.load %arg4[%c1_62, %c0_63, %c0_64] : memref<2x1x128xf32, #tpu.memory_space<vmem>>, vector<1x1x128xf32>
    %156 = vector.shape_cast %155 : vector<1x1x128xf32> to vector<1x128xf32>
    %cst_65 = arith.constant dense<0.000000e+00> : vector<16xf32>
    %157 = vector.multi_reduction <add>, %152, %cst_65 [1] : vector<16x128xf32> to vector<16xf32>
    %158 = vector.shape_cast %157 : vector<16xf32> to vector<16x1xf32>
    %cst_66 = arith.constant 1.280000e+02 : f32
    %159 = vector.broadcast %cst_66 : f32 to vector<16x1xf32>
    %160 = arith.divf %158, %159 : vector<16x1xf32>
    %161 = vector.broadcast %160 : vector<16x1xf32> to vector<16x128xf32>
    %162 = arith.subf %152, %161 : vector<16x128xf32>
    %163 = arith.mulf %162, %162 : vector<16x128xf32>
    %cst_67 = arith.constant dense<0.000000e+00> : vector<16xf32>
    %164 = vector.multi_reduction <add>, %163, %cst_67 [1] : vector<16x128xf32> to vector<16xf32>
    %165 = vector.shape_cast %164 : vector<16xf32> to vector<16x1xf32>
    %cst_68 = arith.constant 1.280000e+02 : f32
    %166 = vector.broadcast %cst_68 : f32 to vector<16x1xf32>
    %167 = arith.divf %165, %166 : vector<16x1xf32>
    %168 = vector.broadcast %160 : vector<16x1xf32> to vector<16x128xf32>
    %169 = arith.subf %152, %168 : vector<16x128xf32>
    %cst_69 = arith.constant 9.99999974E-6 : f32
    %170 = vector.broadcast %cst_69 : f32 to vector<16x1xf32>
    %171 = arith.addf %167, %170 : vector<16x1xf32>
    %172 = math.rsqrt %171 : vector<16x1xf32>
    %173 = vector.broadcast %172 : vector<16x1xf32> to vector<16x128xf32>
    %174 = arith.mulf %169, %173 : vector<16x128xf32>
    %175 = vector.broadcast %154 : vector<1x128xf32> to vector<16x128xf32>
    %176 = arith.mulf %174, %175 : vector<16x128xf32>
    %177 = vector.broadcast %156 : vector<1x128xf32> to vector<16x128xf32>
    %178 = arith.addf %176, %177 : vector<16x128xf32>
    %179 = arith.truncf %178 : vector<16x128xf32> to vector<16x128xbf16>
    %c1_70 = arith.constant 1 : index
    %c0_71 = arith.constant 0 : index
    %c0_72 = arith.constant 0 : index
    %180 = vector.load %arg5[%c1_70, %c0_71, %c0_72] : memref<2x128x384xbf16, #tpu.memory_space<vmem>>, vector<1x128x384xbf16>
    %181 = vector.shape_cast %180 : vector<1x128x384xbf16> to vector<128x384xbf16>
    %cst_73 = arith.constant dense<0.000000e+00> : vector<16x384xf32>
    %182 = tpu.matmul %179, %181, %cst_73 {dimension_numbers = #tpu.dot_dimension_numbers<[1], [0], [0], [1], [0, 0, 1, 1], [], []>} : vector<16x128xbf16>, vector<128x384xbf16>, vector<16x384xf32> -> vector<16x384xf32>
    %183 = arith.truncf %182 : vector<16x384xf32> to vector<16x384xbf16>
    %184 = vector.extract_strided_slice %183 {offsets = [0, 0], sizes = [16, 32], strides = [1, 1]} : vector<16x384xbf16> to vector<16x32xbf16>
    %185 = vector.extract_strided_slice %183 {offsets = [0, 32], sizes = [16, 32], strides = [1, 1]} : vector<16x384xbf16> to vector<16x32xbf16>
    %186 = vector.extract_strided_slice %183 {offsets = [0, 64], sizes = [16, 32], strides = [1, 1]} : vector<16x384xbf16> to vector<16x32xbf16>
    %187 = vector.extract_strided_slice %183 {offsets = [0, 96], sizes = [16, 32], strides = [1, 1]} : vector<16x384xbf16> to vector<16x32xbf16>
    %188 = vector.shape_cast %184 : vector<16x32xbf16> to vector<1x16x32xbf16>
    %189 = vector.shape_cast %185 : vector<16x32xbf16> to vector<1x16x32xbf16>
    %190 = vector.shape_cast %186 : vector<16x32xbf16> to vector<1x16x32xbf16>
    %191 = vector.shape_cast %187 : vector<16x32xbf16> to vector<1x16x32xbf16>
    %192 = tpu.concatenate %188, %189, %190, %191 in 0 : vector<1x16x32xbf16>, vector<1x16x32xbf16>, vector<1x16x32xbf16>, vector<1x16x32xbf16> -> vector<4x16x32xbf16>
    %193 = vector.extract_strided_slice %183 {offsets = [0, 128], sizes = [16, 32], strides = [1, 1]} : vector<16x384xbf16> to vector<16x32xbf16>
    %194 = vector.extract_strided_slice %183 {offsets = [0, 160], sizes = [16, 32], strides = [1, 1]} : vector<16x384xbf16> to vector<16x32xbf16>
    %195 = vector.extract_strided_slice %183 {offsets = [0, 192], sizes = [16, 32], strides = [1, 1]} : vector<16x384xbf16> to vector<16x32xbf16>
    %196 = vector.extract_strided_slice %183 {offsets = [0, 224], sizes = [16, 32], strides = [1, 1]} : vector<16x384xbf16> to vector<16x32xbf16>
    %197 = vector.shape_cast %193 : vector<16x32xbf16> to vector<1x16x32xbf16>
    %198 = vector.shape_cast %194 : vector<16x32xbf16> to vector<1x16x32xbf16>
    %199 = vector.shape_cast %195 : vector<16x32xbf16> to vector<1x16x32xbf16>
    %200 = vector.shape_cast %196 : vector<16x32xbf16> to vector<1x16x32xbf16>
    %201 = tpu.concatenate %197, %198, %199, %200 in 0 : vector<1x16x32xbf16>, vector<1x16x32xbf16>, vector<1x16x32xbf16>, vector<1x16x32xbf16> -> vector<4x16x32xbf16>
    %202 = vector.extract_strided_slice %183 {offsets = [0, 256], sizes = [16, 32], strides = [1, 1]} : vector<16x384xbf16> to vector<16x32xbf16>
    %203 = vector.extract_strided_slice %183 {offsets = [0, 288], sizes = [16, 32], strides = [1, 1]} : vector<16x384xbf16> to vector<16x32xbf16>
    %204 = vector.extract_strided_slice %183 {offsets = [0, 320], sizes = [16, 32], strides = [1, 1]} : vector<16x384xbf16> to vector<16x32xbf16>
    %205 = vector.extract_strided_slice %183 {offsets = [0, 352], sizes = [16, 32], strides = [1, 1]} : vector<16x384xbf16> to vector<16x32xbf16>
    %206 = vector.shape_cast %202 : vector<16x32xbf16> to vector<1x16x32xbf16>
    %207 = vector.shape_cast %203 : vector<16x32xbf16> to vector<1x16x32xbf16>
    %208 = vector.shape_cast %204 : vector<16x32xbf16> to vector<1x16x32xbf16>
    %209 = vector.shape_cast %205 : vector<16x32xbf16> to vector<1x16x32xbf16>
    %210 = tpu.concatenate %206, %207, %208, %209 in 0 : vector<1x16x32xbf16>, vector<1x16x32xbf16>, vector<1x16x32xbf16>, vector<1x16x32xbf16> -> vector<4x16x32xbf16>
    "tpu.trace_start"() <{level = 10 : i32, message = "hnd,hmd->hnm"}> : () -> ()
    %cst_74 = arith.constant dense<0.000000e+00> : vector<4x16x16xf32>
    %211 = tpu.matmul %192, %201, %cst_74 {dimension_numbers = #tpu.dot_dimension_numbers<[2], [2], [1], [1], [0, 0, 0, 1, 1, 1], [0], [0]>} : vector<4x16x32xbf16>, vector<4x16x32xbf16>, vector<4x16x16xf32> -> vector<4x16x16xf32>
    "tpu.trace_stop"() : () -> ()
    %cst_75 = arith.constant 0.176776692 : f32
    %212 = vector.broadcast %cst_75 : f32 to vector<4x16x16xf32>
    %213 = arith.mulf %211, %212 : vector<4x16x16xf32>
    %cst_76 = arith.constant dense<0xFF800000> : vector<4x16xf32>
    %214 = vector.multi_reduction <maximumf>, %213, %cst_76 [2] : vector<4x16x16xf32> to vector<4x16xf32>
    %215 = vector.shape_cast %214 : vector<4x16xf32> to vector<4x16x1xf32>
    %216 = vector.broadcast %215 : vector<4x16x1xf32> to vector<4x16x16xf32>
    %217 = arith.subf %213, %216 : vector<4x16x16xf32>
    %218 = math.exp %217 : vector<4x16x16xf32>
    %cst_77 = arith.constant dense<0.000000e+00> : vector<4x16xf32>
    %219 = vector.multi_reduction <add>, %218, %cst_77 [2] : vector<4x16x16xf32> to vector<4x16xf32>
    %220 = vector.shape_cast %219 : vector<4x16xf32> to vector<4x16x1xf32>
    %221 = tpu.reciprocal %220 {approx = true} : vector<4x16x1xf32> -> vector<4x16x1xf32>
    %222 = vector.broadcast %221 : vector<4x16x1xf32> to vector<4x16x16xf32>
    %223 = arith.mulf %218, %222 : vector<4x16x16xf32>
    %224 = arith.truncf %223 : vector<4x16x16xf32> to vector<4x16x16xbf16>
    "tpu.trace_start"() <{level = 10 : i32, message = "hnm,hmd->hnd"}> : () -> ()
    %cst_78 = arith.constant dense<0.000000e+00> : vector<4x16x32xf32>
    %225 = tpu.matmul %224, %210, %cst_78 {dimension_numbers = #tpu.dot_dimension_numbers<[2], [1], [1], [2], [0, 0, 0, 1, 1, 2], [0], [0]>} : vector<4x16x16xbf16>, vector<4x16x32xbf16>, vector<4x16x32xf32> -> vector<4x16x32xf32>
    "tpu.trace_stop"() : () -> ()
    %226 = vector.extract_strided_slice %225 {offsets = [0, 0, 0], sizes = [1, 16, 32], strides = [1, 1, 1]} : vector<4x16x32xf32> to vector<1x16x32xf32>
    %227 = vector.shape_cast %226 : vector<1x16x32xf32> to vector<16x32xf32>
    %228 = vector.extract_strided_slice %225 {offsets = [1, 0, 0], sizes = [1, 16, 32], strides = [1, 1, 1]} : vector<4x16x32xf32> to vector<1x16x32xf32>
    %229 = vector.shape_cast %228 : vector<1x16x32xf32> to vector<16x32xf32>
    %230 = vector.extract_strided_slice %225 {offsets = [2, 0, 0], sizes = [1, 16, 32], strides = [1, 1, 1]} : vector<4x16x32xf32> to vector<1x16x32xf32>
    %231 = vector.shape_cast %230 : vector<1x16x32xf32> to vector<16x32xf32>
    %232 = vector.extract_strided_slice %225 {offsets = [3, 0, 0], sizes = [1, 16, 32], strides = [1, 1, 1]} : vector<4x16x32xf32> to vector<1x16x32xf32>
    %233 = vector.shape_cast %232 : vector<1x16x32xf32> to vector<16x32xf32>
    %234 = tpu.concatenate %227, %229, %231, %233 in 1 : vector<16x32xf32>, vector<16x32xf32>, vector<16x32xf32>, vector<16x32xf32> -> vector<16x128xf32>
    %235 = arith.truncf %234 : vector<16x128xf32> to vector<16x128xbf16>
    %c1_79 = arith.constant 1 : index
    %c0_80 = arith.constant 0 : index
    %c0_81 = arith.constant 0 : index
    %236 = vector.load %arg6[%c1_79, %c0_80, %c0_81] : memref<2x128x128xbf16, #tpu.memory_space<vmem>>, vector<1x128x128xbf16>
    %237 = vector.shape_cast %236 : vector<1x128x128xbf16> to vector<128x128xbf16>
    %cst_82 = arith.constant dense<0.000000e+00> : vector<16x128xf32>
    %238 = tpu.matmul %235, %237, %cst_82 {dimension_numbers = #tpu.dot_dimension_numbers<[1], [0], [0], [1], [0, 0, 1, 1], [], []>} : vector<16x128xbf16>, vector<128x128xbf16>, vector<16x128xf32> -> vector<16x128xf32>
    %c1_83 = arith.constant 1 : index
    %c0_84 = arith.constant 0 : index
    %c0_85 = arith.constant 0 : index
    %239 = vector.load %arg7[%c1_83, %c0_84, %c0_85] : memref<2x1x128xf32, #tpu.memory_space<vmem>>, vector<1x1x128xf32>
    %240 = vector.shape_cast %239 : vector<1x1x128xf32> to vector<1x128xf32>
    %241 = vector.broadcast %240 : vector<1x128xf32> to vector<16x128xf32>
    %242 = arith.addf %238, %241 : vector<16x128xf32>
    %243 = arith.addf %152, %242 : vector<16x128xf32>
    %c1_86 = arith.constant 1 : index
    %c0_87 = arith.constant 0 : index
    %c0_88 = arith.constant 0 : index
    %244 = vector.load %arg8[%c1_86, %c0_87, %c0_88] : memref<2x1x128xf32, #tpu.memory_space<vmem>>, vector<1x1x128xf32>
    %245 = vector.shape_cast %244 : vector<1x1x128xf32> to vector<1x128xf32>
    %c1_89 = arith.constant 1 : index
    %c0_90 = arith.constant 0 : index
    %c0_91 = arith.constant 0 : index
    %246 = vector.load %arg9[%c1_89, %c0_90, %c0_91] : memref<2x1x128xf32, #tpu.memory_space<vmem>>, vector<1x1x128xf32>
    %247 = vector.shape_cast %246 : vector<1x1x128xf32> to vector<1x128xf32>
    %cst_92 = arith.constant dense<0.000000e+00> : vector<16xf32>
    %248 = vector.multi_reduction <add>, %243, %cst_92 [1] : vector<16x128xf32> to vector<16xf32>
    %249 = vector.shape_cast %248 : vector<16xf32> to vector<16x1xf32>
    %cst_93 = arith.constant 1.280000e+02 : f32
    %250 = vector.broadcast %cst_93 : f32 to vector<16x1xf32>
    %251 = arith.divf %249, %250 : vector<16x1xf32>
    %252 = vector.broadcast %251 : vector<16x1xf32> to vector<16x128xf32>
    %253 = arith.subf %243, %252 : vector<16x128xf32>
    %254 = arith.mulf %253, %253 : vector<16x128xf32>
    %cst_94 = arith.constant dense<0.000000e+00> : vector<16xf32>
    %255 = vector.multi_reduction <add>, %254, %cst_94 [1] : vector<16x128xf32> to vector<16xf32>
    %256 = vector.shape_cast %255 : vector<16xf32> to vector<16x1xf32>
    %cst_95 = arith.constant 1.280000e+02 : f32
    %257 = vector.broadcast %cst_95 : f32 to vector<16x1xf32>
    %258 = arith.divf %256, %257 : vector<16x1xf32>
    %259 = vector.broadcast %251 : vector<16x1xf32> to vector<16x128xf32>
    %260 = arith.subf %243, %259 : vector<16x128xf32>
    %cst_96 = arith.constant 9.99999974E-6 : f32
    %261 = vector.broadcast %cst_96 : f32 to vector<16x1xf32>
    %262 = arith.addf %258, %261 : vector<16x1xf32>
    %263 = math.rsqrt %262 : vector<16x1xf32>
    %264 = vector.broadcast %263 : vector<16x1xf32> to vector<16x128xf32>
    %265 = arith.mulf %260, %264 : vector<16x128xf32>
    %266 = vector.broadcast %245 : vector<1x128xf32> to vector<16x128xf32>
    %267 = arith.mulf %265, %266 : vector<16x128xf32>
    %268 = vector.broadcast %247 : vector<1x128xf32> to vector<16x128xf32>
    %269 = arith.addf %267, %268 : vector<16x128xf32>
    %270 = arith.truncf %269 : vector<16x128xf32> to vector<16x128xbf16>
    %c1_97 = arith.constant 1 : index
    %c0_98 = arith.constant 0 : index
    %c0_99 = arith.constant 0 : index
    %271 = vector.load %arg10[%c1_97, %c0_98, %c0_99] : memref<2x128x512xbf16, #tpu.memory_space<vmem>>, vector<1x128x512xbf16>
    %272 = vector.shape_cast %271 : vector<1x128x512xbf16> to vector<128x512xbf16>
    %cst_100 = arith.constant dense<0.000000e+00> : vector<16x512xf32>
    %273 = tpu.matmul %270, %272, %cst_100 {dimension_numbers = #tpu.dot_dimension_numbers<[1], [0], [0], [1], [0, 0, 1, 1], [], []>} : vector<16x128xbf16>, vector<128x512xbf16>, vector<16x512xf32> -> vector<16x512xf32>
    %c1_101 = arith.constant 1 : index
    %c0_102 = arith.constant 0 : index
    %c0_103 = arith.constant 0 : index
    %274 = vector.load %arg11[%c1_101, %c0_102, %c0_103] : memref<2x1x512xf32, #tpu.memory_space<vmem>>, vector<1x1x512xf32>
    %275 = vector.shape_cast %274 : vector<1x1x512xf32> to vector<1x512xf32>
    %276 = vector.broadcast %275 : vector<1x512xf32> to vector<16x512xf32>
    %277 = arith.addf %273, %276 : vector<16x512xf32>
    %cst_104 = arith.constant 5.000000e-01 : f32
    %278 = vector.broadcast %cst_104 : f32 to vector<16x512xf32>
    %279 = arith.mulf %278, %277 : vector<16x512xf32>
    %280 = arith.mulf %277, %277 : vector<16x512xf32>
    %281 = arith.mulf %280, %277 : vector<16x512xf32>
    %cst_105 = arith.constant 4.471500e-02 : f32
    %282 = vector.broadcast %cst_105 : f32 to vector<16x512xf32>
    %283 = arith.mulf %282, %281 : vector<16x512xf32>
    %284 = arith.addf %277, %283 : vector<16x512xf32>
    %cst_106 = arith.constant 0.797884583 : f32
    %285 = vector.broadcast %cst_106 : f32 to vector<16x512xf32>
    %286 = arith.mulf %285, %284 : vector<16x512xf32>
    %287 = math.tanh %286 : vector<16x512xf32>
    %cst_107 = arith.constant 1.000000e+00 : f32
    %288 = vector.broadcast %cst_107 : f32 to vector<16x512xf32>
    %289 = arith.addf %288, %287 : vector<16x512xf32>
    %290 = arith.mulf %279, %289 : vector<16x512xf32>
    %291 = arith.truncf %290 : vector<16x512xf32> to vector<16x512xbf16>
    %c1_108 = arith.constant 1 : index
    %c0_109 = arith.constant 0 : index
    %c0_110 = arith.constant 0 : index
    %292 = vector.load %arg12[%c1_108, %c0_109, %c0_110] : memref<2x512x128xbf16, #tpu.memory_space<vmem>>, vector<1x512x128xbf16>
    %293 = vector.shape_cast %292 : vector<1x512x128xbf16> to vector<512x128xbf16>
    %cst_111 = arith.constant dense<0.000000e+00> : vector<16x128xf32>
    %294 = tpu.matmul %291, %293, %cst_111 {dimension_numbers = #tpu.dot_dimension_numbers<[1], [0], [0], [1], [0, 0, 1, 1], [], []>} : vector<16x512xbf16>, vector<512x128xbf16>, vector<16x128xf32> -> vector<16x128xf32>
    %c1_112 = arith.constant 1 : index
    %c0_113 = arith.constant 0 : index
    %c0_114 = arith.constant 0 : index
    %295 = vector.load %arg13[%c1_112, %c0_113, %c0_114] : memref<2x1x128xf32, #tpu.memory_space<vmem>>, vector<1x1x128xf32>
    %296 = vector.shape_cast %295 : vector<1x1x128xf32> to vector<1x128xf32>
    %297 = vector.broadcast %296 : vector<1x128xf32> to vector<16x128xf32>
    %298 = arith.addf %294, %297 : vector<16x128xf32>
    %299 = arith.addf %243, %298 : vector<16x128xf32>
    %300 = vector.extract_strided_slice %299 {offsets = [8, 0], sizes = [8, 128], strides = [1, 1]} : vector<16x128xf32> to vector<8x128xf32>
    %c0_115 = arith.constant 0 : index
    %c0_116 = arith.constant 0 : index
    %301 = vector.load %arg14[%c0_115, %c0_116] : memref<1x128xf32, #tpu.memory_space<vmem>>, vector<1x128xf32>
    %c0_117 = arith.constant 0 : index
    %c0_118 = arith.constant 0 : index
    %302 = vector.load %arg15[%c0_117, %c0_118] : memref<1x128xf32, #tpu.memory_space<vmem>>, vector<1x128xf32>
    %cst_119 = arith.constant dense<0.000000e+00> : vector<8xf32>
    %303 = vector.multi_reduction <add>, %300, %cst_119 [1] : vector<8x128xf32> to vector<8xf32>
    %304 = vector.shape_cast %303 : vector<8xf32> to vector<8x1xf32>
    %cst_120 = arith.constant 1.280000e+02 : f32
    %305 = vector.broadcast %cst_120 : f32 to vector<8x1xf32>
    %306 = arith.divf %304, %305 : vector<8x1xf32>
    %307 = vector.broadcast %306 : vector<8x1xf32> to vector<8x128xf32>
    %308 = arith.subf %300, %307 : vector<8x128xf32>
    %309 = arith.mulf %308, %308 : vector<8x128xf32>
    %cst_121 = arith.constant dense<0.000000e+00> : vector<8xf32>
    %310 = vector.multi_reduction <add>, %309, %cst_121 [1] : vector<8x128xf32> to vector<8xf32>
    %311 = vector.shape_cast %310 : vector<8xf32> to vector<8x1xf32>
    %cst_122 = arith.constant 1.280000e+02 : f32
    %312 = vector.broadcast %cst_122 : f32 to vector<8x1xf32>
    %313 = arith.divf %311, %312 : vector<8x1xf32>
    %314 = vector.broadcast %306 : vector<8x1xf32> to vector<8x128xf32>
    %315 = arith.subf %300, %314 : vector<8x128xf32>
    %cst_123 = arith.constant 9.99999974E-6 : f32
    %316 = vector.broadcast %cst_123 : f32 to vector<8x1xf32>
    %317 = arith.addf %313, %316 : vector<8x1xf32>
    %318 = math.rsqrt %317 : vector<8x1xf32>
    %319 = vector.broadcast %318 : vector<8x1xf32> to vector<8x128xf32>
    %320 = arith.mulf %315, %319 : vector<8x128xf32>
    %321 = vector.broadcast %301 : vector<1x128xf32> to vector<8x128xf32>
    %322 = arith.mulf %320, %321 : vector<8x128xf32>
    %323 = vector.broadcast %302 : vector<1x128xf32> to vector<8x128xf32>
    %324 = arith.addf %322, %323 : vector<8x128xf32>
    %c0_124 = arith.constant 0 : index
    %c0_125 = arith.constant 0 : index
    %c0_126 = arith.constant 0 : index
    %325 = vector.load %arg16[%c0_124, %c0_125, %c0_126] : memref<1x8x128xf32, #tpu.memory_space<vmem>>, vector<1x8x128xf32>
    %326 = vector.shape_cast %325 : vector<1x8x128xf32> to vector<8x128xf32>
    %327 = vector.shape_cast %324 : vector<8x128xf32> to vector<1x8x128xf32>
    tpu.vector_store %arg16[%c0_124, %c0_125, %c0_126], %327 {strides = array<i32>} : memref<1x8x128xf32, #tpu.memory_space<vmem>>, vector<1x8x128xf32>,
    return
  }
  func.func @transform_0(%arg0: i32) -> (i32, i32, i32) {
    %c0_i32 = arith.constant 0 : i32
    %c0_i32_0 = arith.constant 0 : i32
    %c0_i32_1 = arith.constant 0 : i32
    return %arg0, %c0_i32, %c0_i32_0 : i32, i32, i32
  }
  func.func @transform_1(%arg0: i32) -> (i32, i32, i32) {
    %c0_i32 = arith.constant 0 : i32
    %c0_i32_0 = arith.constant 0 : i32
    %c0_i32_1 = arith.constant 0 : i32
    return %arg0, %c0_i32, %c0_i32_0 : i32, i32, i32
  }
  func.func @transform_2(%arg0: i32) -> (i32, i32, i32) {
    %c0_i32 = arith.constant 0 : i32
    %c0_i32_0 = arith.constant 0 : i32
    %c0_i32_1 = arith.constant 0 : i32
    %c0_i32_2 = arith.constant 0 : i32
    return %c0_i32, %c0_i32_0, %c0_i32_1 : i32, i32, i32
  }
  func.func @transform_3(%arg0: i32) -> (i32, i32, i32) {
    %c0_i32 = arith.constant 0 : i32
    %c0_i32_0 = arith.constant 0 : i32
    %c0_i32_1 = arith.constant 0 : i32
    %c0_i32_2 = arith.constant 0 : i32
    return %c0_i32, %c0_i32_0, %c0_i32_1 : i32, i32, i32
  }
  func.func @transform_4(%arg0: i32) -> (i32, i32, i32) {
    %c0_i32 = arith.constant 0 : i32
    %c0_i32_0 = arith.constant 0 : i32
    %c0_i32_1 = arith.constant 0 : i32
    %c0_i32_2 = arith.constant 0 : i32
    return %c0_i32, %c0_i32_0, %c0_i32_1 : i32, i32, i32
  }
  func.func @transform_5(%arg0: i32) -> (i32, i32, i32) {
    %c0_i32 = arith.constant 0 : i32
    %c0_i32_0 = arith.constant 0 : i32
    %c0_i32_1 = arith.constant 0 : i32
    %c0_i32_2 = arith.constant 0 : i32
    return %c0_i32, %c0_i32_0, %c0_i32_1 : i32, i32, i32
  }
  func.func @transform_6(%arg0: i32) -> (i32, i32, i32) {
    %c0_i32 = arith.constant 0 : i32
    %c0_i32_0 = arith.constant 0 : i32
    %c0_i32_1 = arith.constant 0 : i32
    %c0_i32_2 = arith.constant 0 : i32
    return %c0_i32, %c0_i32_0, %c0_i32_1 : i32, i32, i32
  }
  func.func @transform_7(%arg0: i32) -> (i32, i32, i32) {
    %c0_i32 = arith.constant 0 : i32
    %c0_i32_0 = arith.constant 0 : i32
    %c0_i32_1 = arith.constant 0 : i32
    %c0_i32_2 = arith.constant 0 : i32
    return %c0_i32, %c0_i32_0, %c0_i32_1 : i32, i32, i32
  }
  func.func @transform_8(%arg0: i32) -> (i32, i32, i32) {
    %c0_i32 = arith.constant 0 : i32
    %c0_i32_0 = arith.constant 0 : i32
    %c0_i32_1 = arith.constant 0 : i32
    %c0_i32_2 = arith.constant 0 : i32
    return %c0_i32, %c0_i32_0, %c0_i32_1 : i32, i32, i32
  }
  func.func @transform_9(%arg0: i32) -> (i32, i32, i32) {
    %c0_i32 = arith.constant 0 : i32
    %c0_i32_0 = arith.constant 0 : i32
    %c0_i32_1 = arith.constant 0 : i32
    %c0_i32_2 = arith.constant 0 : i32
    return %c0_i32, %c0_i32_0, %c0_i32_1 : i32, i32, i32
  }
  func.func @transform_10(%arg0: i32) -> (i32, i32, i32) {
    %c0_i32 = arith.constant 0 : i32
    %c0_i32_0 = arith.constant 0 : i32
    %c0_i32_1 = arith.constant 0 : i32
    %c0_i32_2 = arith.constant 0 : i32
    return %c0_i32, %c0_i32_0, %c0_i32_1 : i32, i32, i32
  }
  func.func @transform_11(%arg0: i32) -> (i32, i32, i32) {
    %c0_i32 = arith.constant 0 : i32
    %c0_i32_0 = arith.constant 0 : i32
    %c0_i32_1 = arith.constant 0 : i32
    %c0_i32_2 = arith.constant 0 : i32
    return %c0_i32, %c0_i32_0, %c0_i32_1 : i32, i32, i32
  }
  func.func @transform_12(%arg0: i32) -> (i32, i32, i32) {
    %c0_i32 = arith.constant 0 : i32
    %c0_i32_0 = arith.constant 0 : i32
    %c0_i32_1 = arith.constant 0 : i32
    %c0_i32_2 = arith.constant 0 : i32
    return %c0_i32, %c0_i32_0, %c0_i32_1 : i32, i32, i32
  }
  func.func @transform_13(%arg0: i32) -> (i32, i32) {
    %c0_i32 = arith.constant 0 : i32
    %c0_i32_0 = arith.constant 0 : i32
    %c0_i32_1 = arith.constant 0 : i32
    return %c0_i32, %c0_i32_0 : i32, i32
  }
  func.func @transform_14(%arg0: i32) -> (i32, i32) {
    %c0_i32 = arith.constant 0 : i32
    %c0_i32_0 = arith.constant 0 : i32
    %c0_i32_1 = arith.constant 0 : i32
    return %c0_i32, %c0_i32_0 : i32, i32
  }
  func.func @transform_15(%arg0: i32) -> (i32, i32, i32) {
    %c0_i32 = arith.constant 0 : i32
    %c0_i32_0 = arith.constant 0 : i32
    %c0_i32_1 = arith.constant 0 : i32
    return %arg0, %c0_i32, %c0_i32_0 : i32, i32, i32
  }
}

</mosaic_0001>

<bundles_post_ra>
// kernel: transformer_decoder.1
= control target key start
LH: loop header
LB: loop body
LE: loop exit
PB: predicated region body
PF: predicated region fallthrough
CT: control target
= control target key end

     0   :  { %s6447_s0 = inlined_call_operand.hbm [shape: f32[2,16,128], index: 0, kind: input, shape index: {}]   ;;  %s6448_s1 = inlined_call_operand.hbm [shape: f32[2,16,128], index: 1, kind: input, shape index: {}]   ;;  %s6449_s2 = inlined_call_operand.vmem [shape: f32[2,1,128], index: 2, kind: input, shape index: {}]   ;;  %s6450_s3 = inlined_call_operand.vmem [shape: f32[2,1,128], index: 3, kind: input, shape index: {}]   ;;  %s6451_s4 = inlined_call_operand.hbm [shape: bf16[2,128,384], index: 4, kind: input, shape index: {}]   ;;  %s6452_s5 = inlined_call_operand.hbm [shape: bf16[2,128,128], index: 5, kind: input, shape index: {}]   ;;  %s6453_s6 = inlined_call_operand.vmem [shape: f32[2,1,128], index: 6, kind: input, shape index: {}]   ;;  %s6454_s7 = inlined_call_operand.vmem [shape: f32[2,1,128], index: 7, kind: input, shape index: {}]   ;;  %s6455_s8 = inlined_call_operand.hbm [shape: f32[2,1,128], index: 8, kind: input, shape index: {}]   ;;  %s6456_s9 = inlined_call_operand.hbm [shape: bf16[2,128,512], index: 9, kind: input, shape index: {}]   ;;  %s6457_s10 = inlined_call_operand.vmem [shape: f32[2,1,512], index: 10, kind: input, shape index: {}]   ;;  %s6458_s11 = inlined_call_operand.hbm [shape: bf16[2,512,128], index: 11, kind: input, shape index: {}]   ;;  %s6459_s12 = inlined_call_operand.vmem [shape: f32[2,1,128], index: 12, kind: input, shape index: {}]   ;;  %s6460_s13 = inlined_call_operand.vmem [shape: f32[1,128], index: 13, kind: input, shape index: {}]   ;;  %s6461_s14 = inlined_call_operand.vmem [shape: f32[1,128], index: 14, kind: input, shape index: {}]   ;;  %s6462_s15 = inlined_call_operand.hbm [shape: f32[2,8,128], index: 15, kind: output, shape index: {}]  }
   0x1   :  { %6473 = sst [smem:[#allocation21_spill]] %s6447_s0 }
   0x2   :  { %6474 = sst [smem:[#allocation22_spill]] %s6451_s4 }
   0x3   :  { %6475 = sst [smem:[#allocation23_spill]] %s6452_s5 }
   0x4   :  { %6476 = sst [smem:[#allocation24_spill]] %s6454_s7 }
   0x5   :  { %6477 = sst [smem:[#allocation25_spill]] %s6455_s8 }
   0x6   :  { %6478 = sst [smem:[#allocation26_spill]] %s6456_s9 }
   0x7   :  { %6479 = sst [smem:[#allocation27_spill]] %s6457_s10 }
   0x8   :  { %6480 = sst [smem:[#allocation28_spill]] %s6458_s11 }
   0x9   :  { %6481 = sst [smem:[#allocation29_spill]] %s6459_s12 }
   0xa   :  { %6482 = sst [smem:[#allocation30_spill]] %s6460_s13 }
   0xb   :  { %6483 = sst [smem:[#allocation31_spill]] %s6461_s14 }
   0xc   :  { %6484 = sst [smem:[#allocation32_spill]] %s6462_s15 }
   0xd   :  { %20 = vsyncpa [#allocation3], 0 }
   0xe   :  { %22 = vsyncpa [#allocation3 + $0x1], 0 }
   0xf   :  { %23 = vsyncpa [#allocation6], 0 }
  0x10   :  { %25 = vsyncpa [#allocation6 + $0x1], 0 }
  0x11   :  { %26 = vsyncpa [#allocation9], 0 }
  0x12   :  { %27 = vsyncpa [#allocation12], 0 }
  0x13   :  { %28 = vsyncpa [#allocation4], 0 }
  0x14   :  { %30 = vsyncpa [#allocation4 + $0x1], 0  ;;  %s5678_s18 = smov 0   ;;  %s5680_s19 = smov 0  }
  0x15   :  { %s5682_s20 = smov 0   ;;  %s5684_s21 = smov 0  }
  0x16 LB: > { %s5575_s22 = smov [#allocation7]   ;;  %s5699_s24 = sadd.s32 4294967295, %s5573_s21   ;;  %s5573_s21 = sphi %s5684_s21, %s6522_s21   ;;  %s5569_s20 = sphi %s5682_s20, %s6521_s20   ;;  %s5565_s19 = sphi %s5680_s19, %s6520_s19   ;;  %s5561_s18 = sphi %s5678_s18, %s6519_s18  }
  0x17   : > { %s410_s23 = sshll.u32 %s5575_s22, 4  ;;  %p4200_p0 = scmp.ge.s32.totalorder %s5573_s21, 1  ;;  %s5704_s23 = int_to_ptr.vmem [resolvable:$true] %s410_s23 }
  0x18   : > { %p6467_p1 = scmp.eq.s32.totalorder %s5699_s24, 0  ;;  %p392_p2 = scmp.lt.s32.totalorder %s5573_s21, 3 }
  0x19   : > { %s5576_s26 = smov [#allocation8]   ;;  %s6487_s4 = sld [smem:[#allocation22_spill]] }
  0x1a   : > { %p5706_p3 = pnand %p4200_p0, %p392_p2  ;;  %s423_s27 = sshll.u32 %s5576_s26, 4  ;;  %s5719_s27 = int_to_ptr.vmem [resolvable:$true] %s423_s27 }
  0x1c   : > { %s6485_s25 = scalar_select %p5706_p3, 1, 0 }
  0x1d   : > { %p4814_p5 = pneg %p5706_p3 }
  0x1f   : > { %p5715_p6 = pnand %p4814_p5, %p6467_p1  ;;  %s5291_s16 = scalar_lea.hbm %s6487_s4, 6144 }
  0x20   : > { %p5292_p7 = scmp.ne.s32.totalorder %s6487_s4, %s5291_s16  ;;  %p5298_p11 = scmp.lt.u32.totalorder %s5291_s16, %s6487_s4 }
  0x21   : > { %p5729_p8 = pneg %p5715_p6 }
  0x23   : > { %p5294_p9 = pnand %p5729_p8, %p5292_p7 }
  0x25   : > { %p5295_p10 = pneg %p5294_p9 }
  0x27   : > { %p5300_p12 = pnand %p5298_p11, %p5295_p10 }
  0x29   : > { %5303 = shalt.err (!%p5300_p12)
}
  0x2a   : > { %s5304_s29 = scalar_lea.vmem %s5704_s23, 6144  ;;  %p5312_p5 = scmp.lt.s32.totalorder %s5704_s23, %s5704_s23 }
  0x2b   : > { %p5305_p13 = scmp.ne.s32.totalorder %s5704_s23, %s5304_s29  ;;  %p5313_p4 = scmp.lt.s32.totalorder %s5304_s29, %s5304_s29 }
  0x2d   : > { %p5307_p0 = pnand %p5305_p13, %p5729_p8  ;;  %p5314_p7 = por %p5313_p4, %p5312_p5 }
  0x2f   : > { %p5308_p2 = pneg %p5307_p0 }
  0x31   : > { %p5315_p9 = pnand %p5314_p7, %p5308_p2 }
  0x33   : > { %5318 = shalt.err (!%p5315_p9)
}
  0x34   : > { %s5577_s30 = smov 192   ;;  %s5578_s14 = smov 12  }
  0x35   : > { %4817 = dma.hbm_to_vmem [thread:$0]  (!%p5715_p6), %s6487_s4, 6144, %s5704_s23, [#allocation6], %s5577_s30, %s5577_s30, %s5578_s14  }
  0x36   : > { %s6489_s5 = sld [smem:[#allocation23_spill]] }
  0x3c   : > { %s5319_s13 = scalar_lea.hbm %s6489_s5, 2048 }
  0x3d   : > { %p5320_p4 = scmp.ne.s32.totalorder %s6489_s5, %s5319_s13  ;;  %p5326_p12 = scmp.lt.u32.totalorder %s5319_s13, %s6489_s5 }
  0x3f   : > { %p5322_p10 = pnand %p5320_p4, %p5729_p8 }
  0x41   : > { %p5323_p11 = pneg %p5322_p10 }
  0x43   : > { %p5328_p13 = pnand %p5326_p12, %p5323_p11 }
  0x45   : > { %5331 = shalt.err (!%p5328_p13)
}
  0x46   : > { %s5332_s23 = scalar_lea.vmem %s5719_s27, 2048  ;;  %p5340_p7 = scmp.lt.s32.totalorder %s5719_s27, %s5719_s27 }
  0x47   : > { %p5333_p0 = scmp.ne.s32.totalorder %s5719_s27, %s5332_s23  ;;  %p5341_p9 = scmp.lt.s32.totalorder %s5332_s23, %s5332_s23 }
  0x49   : > { %p5335_p2 = pnand %p5333_p0, %p5729_p8  ;;  %p5342_p4 = por %p5341_p9, %p5340_p7 }
  0x4b   : > { %p5336_p5 = pneg %p5335_p2 }
  0x4d   : > { %p5343_p10 = pnand %p5342_p4, %p5336_p5 }
  0x4f   : > { %5346 = shalt.err (!%p5343_p10)
}
  0x50   : > { %s6469_s10 = smov 64   ;;  %s6470_s7 = smov 4  }
  0x51   : > { %4820 = dma.hbm_to_vmem [thread:$0]  (!%p5715_p6), %s6489_s5, 2048, %s5719_s27, [#allocation9], %s6469_s10, %s6469_s10, %s6470_s7  }
  0x52   : > { %s5581_s30 = smov [#allocation11]   ;;  %s6490_s9 = sld [smem:[#allocation26_spill]] }
  0x53   : > { %s455_s14 = sshll.u32 %s5581_s30, 4  ;;  %s456_s14 = int_to_ptr.vmem [resolvable:$true] %s455_s14 }
  0x58   : > { %s5347_s22 = scalar_lea.hbm %s6490_s9, 8192 }
  0x59   : > { %p5348_p11 = scmp.ne.s32.totalorder %s6490_s9, %s5347_s22  ;;  %p5354_p0 = scmp.lt.u32.totalorder %s5347_s22, %s6490_s9 }
  0x5b   : > { %p5350_p12 = pnand %p5348_p11, %p5729_p8 }
  0x5d   : > { %p5351_p13 = pneg %p5350_p12 }
  0x5f   : > { %p5356_p2 = pnand %p5354_p0, %p5351_p13 }
  0x61   : > { %5359 = shalt.err (!%p5356_p2)
}
  0x62   : > { %s5360_s27 = scalar_lea.vmem %s456_s14, 8192  ;;  %p5368_p4 = scmp.lt.s32.totalorder %s456_s14, %s456_s14 }
  0x63   : > { %p5361_p5 = scmp.ne.s32.totalorder %s456_s14, %s5360_s27  ;;  %p5369_p10 = scmp.lt.s32.totalorder %s5360_s27, %s5360_s27 }
  0x65   : > { %p5363_p7 = pnand %p5361_p5, %p5729_p8  ;;  %p5370_p1 = por %p5369_p10, %p5368_p4 }
  0x67   : > { %p5364_p9 = pneg %p5363_p7 }
  0x69   : > { %p5371_p3 = pnand %p5370_p1, %p5364_p9 }
  0x6b   : > { %5374 = shalt.err (!%p5371_p3)
}
  0x6c   : > { %s5582_s12 = smov 256   ;;  %s5583_s13 = smov 16  }
  0x6d   : > { %4826 = dma.hbm_to_vmem [thread:$0]  (!%p5715_p6), %s6490_s9, 8192, %s456_s14, [#allocation12], %s5582_s12, %s5582_s12, %s5583_s13  }
  0x6e   : > { %s5584_s16 = smov [#allocation10]   ;;  %s6491_s8 = sld [smem:[#allocation25_spill]] }
  0x6f   : > { %s442_s17 = sshll.u32 %s5584_s16, 4  ;;  %s443_s17 = int_to_ptr.vmem [resolvable:$true] %s442_s17 }
  0x74   : > { %s5375_s29 = scalar_lea.hbm %s6491_s8, 32 }
  0x75   : > { %p5376_p1 = scmp.ne.s32.totalorder %s6491_s8, %s5375_s29  ;;  %p5382_p12 = scmp.lt.u32.totalorder %s5375_s29, %s6491_s8 }
  0x77   : > { %p5378_p3 = pnand %p5376_p1, %p5729_p8 }
  0x79   : > { %p5379_p11 = pneg %p5378_p3 }
  0x7b   : > { %p5384_p13 = pnand %p5382_p12, %p5379_p11 }
  0x7d   : > { %5387 = shalt.err (!%p5384_p13)
}
  0x7e   : > { %s5388_s14 = scalar_lea.vmem %s443_s17, 32  ;;  %p5396_p7 = scmp.lt.s32.totalorder %s443_s17, %s443_s17 }
  0x7f   : > { %p5389_p0 = scmp.ne.s32.totalorder %s443_s17, %s5388_s14  ;;  %p5397_p9 = scmp.lt.s32.totalorder %s5388_s14, %s5388_s14 }
  0x81   : > { %p5391_p2 = pnand %p5389_p0, %p5729_p8  ;;  %p5398_p4 = por %p5397_p9, %p5396_p7 }
  0x83   : > { %p5392_p5 = pneg %p5391_p2 }
  0x85   : > { %p5399_p10 = pnand %p5398_p4, %p5392_p5 }
  0x87   : > { %5402 = shalt.err (!%p5399_p10)
}
  0x88   : > { %s5585_s12 = smov 1   ;;  %s5586_s10 = smov [#allocation13]  }
  0x89   : > { %4823 = dma.hbm_to_vmem [thread:$0]  (!%p5715_p6), %s6491_s8, 32, %s443_s17, [#allocation9], %s5583_s13, %s5583_s13, %s5585_s12  }
  0x8a   : > { %s471_s7 = sshll.u32 %s5586_s10, 4  ;;  %s6492_s11 = sld [smem:[#allocation28_spill]]  ;;  %s472_s7 = int_to_ptr.vmem [resolvable:$true] %s471_s7 }
  0x90   : > { %s5403_s26 = scalar_lea.hbm %s6492_s11, 8192 }
  0x91   : > { %p5404_p1 = scmp.ne.s32.totalorder %s6492_s11, %s5403_s26  ;;  %p5410_p12 = scmp.lt.u32.totalorder %s5403_s26, %s6492_s11 }
  0x93   : > { %p5406_p3 = pnand %p5404_p1, %p5729_p8 }
  0x95   : > { %p5407_p11 = pneg %p5406_p3 }
  0x97   : > { %p5412_p13 = pnand %p5410_p12, %p5407_p11 }
  0x99   : > { %5415 = shalt.err (!%p5412_p13)
}
  0x9a   : > { %s5416_s13 = scalar_lea.vmem %s472_s7, 8192  ;;  %p5424_p7 = scmp.lt.s32.totalorder %s472_s7, %s472_s7 }
  0x9b   : > { %p5417_p0 = scmp.ne.s32.totalorder %s472_s7, %s5416_s13  ;;  %p5425_p9 = scmp.lt.s32.totalorder %s5416_s13, %s5416_s13 }
  0x9d   : > { %p5419_p2 = pnand %p5417_p0, %p5729_p8  ;;  %p5426_p4 = por %p5425_p9, %p5424_p7 }
  0x9f   : > { %p5420_p5 = pneg %p5419_p2 }
  0xa1   : > { %p5427_p10 = pnand %p5426_p4, %p5420_p5 }
  0xa3   : > { %5430 = shalt.err (!%p5427_p10)
}
  0xa4   : > { %s6493_s17 = smov 4   ;;  %s6494_s12 = smov 64  }
  0xa5   : > { %4829 = dma.hbm_to_vmem [thread:$0]  (!%p5715_p6), %s6492_s11, 8192, %s472_s7, [#allocation12], %s6494_s12, %s6494_s12, %s6493_s17  }
  0xa6   : > { %s4199_s15 = sadd.s32 4294967294, %s5573_s21   ;;  %s5835_s28 = sadd.s32 1, %s5573_s21  }
  0xa7   : > { %s40_s10 = ssub.s32 %s5573_s21, %s5835_s28  ;;  %s43_s16 = sadd.s32 1, %s5569_s20 }
  0xa8   : > { %p41_p8 = scmp.eq.s32.totalorder %s40_s10, 0  ;;  %p50_p1 = scmp.ne.s32.totalorder %s5569_s20, %s5565_s19 }
  0xa9   : > { %p51_p3 = scmp.eq.s32.totalorder %s5573_s21, 0  ;;  %p56_p11 = scmp.ne.s32.totalorder %s5565_s19, %s5561_s18 }
  0xaa   : > { %s5846_s22 = scalar_select %p41_p8, %s5569_s20, %s43_s16  }
  0xab   : > { %p5848_p12 = por %p51_p3, %p50_p1  ;;  %p6496_p13 = scmp.eq.s32.totalorder %s5699_s24, 0 }
  0xac   : > { %p379_p0 = scmp.eq.s32.totalorder %s5699_s24, 1  ;;  %p385_p2 = scmp.eq.s32.totalorder %s4199_s15, 1 }
  0xad   : > { %p5854_p6 = por %p6496_p13, %p56_p11  ;;  %p4846_p5 = scmp.lt.s32.totalorder %s5573_s21, 2 }
  0xae   : > { %s494_s29 = sand.u32 1, %s5569_s20   ;;  %p5861_p7 = por %p379_p0, %p50_p1 }
  0xaf   : > { %p5865_p9 = por %p385_p2, %p56_p11  ;;  %s5869_s14 = sshll.u32 %s494_s29, 4 }
  0xb0   : > { %s6498_s23 = scalar_select %p5861_p7, 1, 0 }
  0xb1   : > { %s6499_s27 = scalar_select %p5865_p9, 1, 0 }
  0xb2   : > { %s6471_s13 = sshll.u32 %s5573_s21, 8  ;;  %s6500_s0 = sld [smem:[#allocation21_spill]] }
  0xb3   : > { %s498_s30 = scalar_lea.vmem [#allocation2], %s5869_s14  ;;  %p5884_p4 = pnand %p4846_p5, %p5848_p12 }
  0xb4   : > { %s505_s15 = sshll.u32 %s498_s30, 4  ;;  %s5888_s16 = scalar_lea.sflag [#allocation3], %s494_s29  ;;  %s5880_s15 = int_to_ptr.vmem [resolvable:$true] %s505_s15 }
  0xb5   : > { %p5433_p8 = pneg %p5884_p4 }
  0xb8   : > { %s5877_s4 = scalar_lea.hbm %s6500_s0, %s6471_s13  ;;  %s5436_s26 = scalar_lea.hbm %s6500_s0, 512 }
  0xb9   : > { %s5431_s17 = scalar_lea.hbm %s5877_s4, 256  ;;  %p5437_p11 = scmp.lt.u32.totalorder %s5877_s4, %s6500_s0 }
  0xba   : > { %p5432_p10 = scmp.ne.s32.totalorder %s5877_s4, %s5431_s17  ;;  %p5438_p12 = scmp.lt.u32.totalorder %s5436_s26, %s5431_s17 }
  0xbb   : > { %p5440_p0 = scmp.lt.u32.totalorder %s5431_s17, %s5877_s4 }
  0xbc   : > { %p5434_p1 = pnand %p5433_p8, %p5432_p10  ;;  %p5439_p13 = por %p5438_p12, %p5437_p11 }
  0xbe   : > { %p5435_p3 = pneg %p5434_p1  ;;  %p5441_p2 = por %p5440_p0, %p5439_p13 }
  0xc0   : > { %p5442_p5 = pnand %p5441_p2, %p5435_p3 }
  0xc2   : > { %5445 = shalt.err (!%p5442_p5)
}
  0xc3   : > { %s5446_s29 = scalar_lea.vmem %s5880_s15, 256  ;;  %s5587_s12 = smov [#allocation2]  }
  0xc4   : > { %p5447_p10 = scmp.ne.s32.totalorder %s5880_s15, %s5446_s29  ;;  %s5451_s30 = sshll.u32 %s5587_s12, 4  ;;  %s5452_s30 = int_to_ptr.vmem [resolvable:$false] %s5451_s30 }
  0xc5   : > { %s5453_s5 = scalar_lea.vmem %s5452_s30, 512  ;;  %p5454_p7 = scmp.lt.s32.totalorder %s5880_s15, %s5452_s30 }
  0xc6   : > { %p5449_p1 = pnand %p5447_p10, %p5433_p8  ;;  %p5455_p11 = scmp.lt.s32.totalorder %s5453_s5, %s5446_s29 }
  0xc8   : > { %p5450_p9 = pneg %p5449_p1  ;;  %p5456_p12 = por %p5455_p11, %p5454_p7 }
  0xca   : > { %p5457_p13 = pnand %p5456_p12, %p5450_p9 }
  0xcc   : > { %5460 = shalt.err (!%p5457_p13)
}
  0xcd   : > { %s5588_s13 = smov 128   ;;  %s5589_s17 = smov 8  }
  0xce   : > { %4833 = dma.hbm_to_vmem [thread:$0]  (!%p5884_p4), %s5877_s4, 256, %s5880_s15, %s5888_s16, %s5588_s13, %s5588_s13, %s5589_s17  }
  0xcf   : > { %s6502_s26 = sshll.u32 %s5573_s21, 8  ;;  %s519_s5 = scalar_lea.vmem [#allocation5], %s5869_s14 }
  0xd0   : > { %s5924_s30 = scalar_lea.hbm %s6448_s1, %s6502_s26  ;;  %s526_s0 = sshll.u32 %s519_s5, 4  ;;  %s5927_s0 = int_to_ptr.vmem [resolvable:$true] %s526_s0 }
  0xd1   : > { %s515_s8 = sand.u32 1, %s5573_s21   ;;  %s5461_s11 = scalar_lea.hbm %s5924_s30, 256 }
  0xd2   : > { %s5930_s9 = scalar_lea.sflag [#allocation6], %s515_s8  ;;  %p5462_p7 = scmp.ne.s32.totalorder %s5924_s30, %s5461_s11 }
  0xd3   : > { %s5466_s16 = scalar_lea.hbm %s6448_s1, 512  ;;  %p5467_p0 = scmp.lt.u32.totalorder %s5924_s30, %s6448_s1 }
  0xd4   : > { %p5464_p9 = pnand %p5462_p7, %p5433_p8  ;;  %p5468_p2 = scmp.lt.u32.totalorder %s5466_s16, %s5461_s11 }
  0xd5   : > { %p5470_p10 = scmp.lt.u32.totalorder %s5461_s11, %s5924_s30 }
  0xd6   : > { %p5465_p3 = pneg %p5464_p9  ;;  %p5469_p5 = por %p5468_p2, %p5467_p0 }
  0xd8   : > { %p5471_p1 = por %p5470_p10, %p5469_p5 }
  0xda   : > { %p5472_p11 = pnand %p5471_p1, %p5465_p3 }
  0xdc   : > { %5475 = shalt.err (!%p5472_p11)
}
  0xdd   : > { %s5476_s8 = scalar_lea.vmem %s5927_s0, 256  ;;  %s5590_s14 = smov [#allocation5]  }
  0xde   : > { %p5477_p12 = scmp.ne.s32.totalorder %s5927_s0, %s5476_s8  ;;  %s5481_s12 = sshll.u32 %s5590_s14, 4  ;;  %s5482_s12 = int_to_ptr.vmem [resolvable:$false] %s5481_s12 }
  0xdf   : > { %s5483_s5 = scalar_lea.vmem %s5482_s12, 512  ;;  %p5484_p9 = scmp.lt.s32.totalorder %s5927_s0, %s5482_s12 }
  0xe0   : > { %p5479_p13 = pnand %p5477_p12, %p5433_p8  ;;  %p5485_p0 = scmp.lt.s32.totalorder %s5483_s5, %s5476_s8 }
  0xe2   : > { %p5480_p7 = pneg %p5479_p13  ;;  %p5486_p2 = por %p5485_p0, %p5484_p9 }
  0xe4   : > { %p5487_p5 = pnand %p5486_p2, %p5480_p7 }
  0xe6   : > { %5490 = shalt.err (!%p5487_p5)
}
  0xe7   : > { %4836 = dma.hbm_to_vmem [thread:$0]  (!%p5884_p4), %s5924_s30, 256, %s5927_s0, %s5930_s9, %s5588_s13, %s5588_s13, %s5589_s17  }
  0xe8   : > { %p6503_p8 = scmp.ne.s32.totalorder %s6485_s25, 0 }
  0xe9   : > { %s5962_s11 = sand.u32 (!%p6503_p8), 1, %s5565_s19  }
  0xea   : > { %538 = sbr.rel (%p6503_p8) target bundleno = 5762 (0x1682), region = 80  ;;  %s4214_s4 = sshll.u32 (!%p6503_p8), %s5962_s11, 4 }
  0xeb   : > { %s541_s15 = scalar_lea.sflag (!%p6503_p8), [#allocation3], %s5962_s11  ;;  %s544_s16 = scalar_lea.vmem (!%p6503_p8), [#allocation2], %s4214_s4 }
  0xf1   : > { %5536 = dma.done.wait (%p5854_p6), %s541_s15, 256  }
  0xf2   : > { %5538 = vsyncadd (%p5854_p6), %s541_s15, 4294967040  ;;  %s549_s0 = sand.u32 1, %s5699_s24   ;;  %s5971_s25 = scalar_lea.vmem [#allocation5], %s4214_s4 }
  0xf3   : > { %s550_s9 = scalar_lea.sflag [#allocation6], %s549_s0 }
  0xf4   : > { %5540 = dma.done.wait (%p5854_p6), %s550_s9, 256  }
  0xf5   : > { %5542 = vsyncadd (%p5854_p6), %s550_s9, 4294967040  ;;  %p6504_p4 = scmp.eq.s32.totalorder %s5699_s24, 0 }
  0xf7   : > { %5544 = dma.done.wait (%p6504_p4), [#allocation6], 6144   ;;  %p6505_p3 = pmov %p6504_p4 }
  0xf9   : > { %5546 = vsyncadd (%p6505_p3), [#allocation6], 4294961152  ;;  %p6506_p10 = pmov %p6505_p3 }
  0xfa   : > { %p6507_p1 = pmov %p6505_p3 }
  0xfb   : > { %5548 = dma.done.wait (%p6506_p10), [#allocation9], 2080  }
  0xfc   : > { %5550 = vsyncadd (%p6507_p1), [#allocation9], 4294965216  ;;  %p6508_p11 = pmov %p6507_p1 }
  0xfd   : > { %p6509_p12 = pmov %p6507_p1 }
  0xfe   : > { %5552 = dma.done.wait (%p6508_p11), [#allocation12], 16384  }
  0xff   : > { %5554 = vsyncadd (%p6509_p12), [#allocation12], 4294950912  ;;  %v626_v0 = vld [vmem:[%s544_s16] sm:$0xff]  ;;  %v627_v2 = vld [vmem:[%s544_s16 + $0x8] sm:$0xff]  ;;  %v5591_v8 = vmov 0.0   ;;  %v5592_v34 = vmov 0  }
 0x100   : > { %v628_v1 = vld [vmem:[%s5971_s25] sm:$0xff]  ;;  %v629_v4 = vld [vmem:[%s5971_s25 + $0x8] sm:$0xff]  ;;  %4612 = vmatprep.subr.bf16.mxu1 %v5591_v8  ;;  %866 = vmatprep.mubr.bf16.mxu0 %v5592_v34  ;;  %vm5593_vm0 = vmmov 0   ;;  %vm945_vm1 = vcmask 261120   ;;  %s5594_s30 = smov 96   ;;  %s5595_s26 = smov 64  }
 0x101   : > { %v5990_v3 = vadd.f32 %v628_v1, %v626_v0  ;;  %v5994_v5 = vadd.f32 %v629_v4, %v627_v2  ;;  %v4935_v6 = vld [vmem:[#allocation7 + $0x4] ss:$12 sps:$4 sm:$0xff]   ;;  %v4937_v7 = vld [vmem:[#allocation7] ss:$12 sps:$4 sm:$0xff]   ;;  %v4938_v9 = vld [vmem:[#allocation7 + $0x8] ss:$12 sps:$4 sm:$0xff]   ;;  %4628 = vmatprep.mubr.msk.bf16.mxu1 %vm5593_vm0, %v5591_v8 }
 0x102   : > { %v4939_v10 = vld [vmem:[#allocation7 + $0x1c] ss:$12 sps:$4 sm:$0xff]   ;;  %834 = vmatprep.subr.bf16.mxu0 %v4935_v6  ;;  %4613 = vmatpush3.bf16.msra.mxu1 %v4938_v9  ;;  %v4941_v19 = vld [vmem:[#allocation7 + $0x18] ss:$12 sps:$4 sm:$0xff]   ;;  %v4942_v20 = vld [vmem:[#allocation7 + $0x20] ss:$12 sps:$4 sm:$0xff]  }
 0x103   : > { %634 = vadd.xlane.f32.xlu0 %v5990_v3  ;;  %835 = vmatpush1.bf16.msra.mxu0 %v4937_v7  ;;  %v4943_v21 = vld [vmem:[#allocation7 + $0x34] ss:$12 sps:$4 sm:$0xff]   ;;  %v4945_v22 = vld [vmem:[#allocation7 + $0x30] ss:$12 sps:$4 sm:$0xff]   ;;  %v4946_v23 = vld [vmem:[#allocation7 + $0x38] ss:$12 sps:$4 sm:$0xff]  }
 0x104   : > { %836 = vmatprep.subr.bf16.mxu0 %v4939_v10  ;;  %4614 = vmatprep.subr.bf16.mxu1 %v5591_v8  ;;  %v4947_v24 = vld [vmem:[#allocation7 + $0x4c] ss:$12 sps:$4 sm:$0xff]   ;;  %v4949_v25 = vld [vmem:[#allocation7 + $0x48] ss:$12 sps:$4 sm:$0xff]   ;;  %v4950_v26 = vld [vmem:[#allocation7 + $0x50] ss:$12 sps:$4 sm:$0xff]  }
 0x105   : > { %v4951_v27 = vld [vmem:[#allocation7 + $0x64] ss:$12 sps:$4 sm:$0xff]   ;;  %v4953_v28 = vld [vmem:[#allocation7 + $0x60] ss:$12 sps:$4 sm:$0xff]   ;;  %v4954_v29 = vld [vmem:[#allocation7 + $0x68] ss:$12 sps:$4 sm:$0xff]  }
 0x106   : > { %4615 = vmatpush3.bf16.msra.mxu1 %v4942_v20  ;;  %v4955_v30 = vld [vmem:[#allocation7 + $0x7c] ss:$12 sps:$4 sm:$0xff]   ;;  %v4957_v31 = vld [vmem:[#allocation7 + $0x78] ss:$12 sps:$4 sm:$0xff]   ;;  %v4958_v32 = vld [vmem:[#allocation7 + $0x80] ss:$12 sps:$4 sm:$0xff]  }
 0x107   : > { %636 = vadd.xlane.f32.xlu0 %v5994_v5  ;;  %837 = vmatpush1.bf16.msra.mxu0 %v4941_v19  ;;  %v4959_v33 = vld [vmem:[#allocation7 + $0x94] ss:$12 sps:$4 sm:$0xff]   ;;  %v4961_v35 = vld [vmem:[#allocation7 + $0x90] ss:$12 sps:$4 sm:$0xff]   ;;  %v4962_v36 = vld [vmem:[#allocation7 + $0x98] ss:$12 sps:$4 sm:$0xff]  }
 0x108   : > { %4616 = vmatprep.subr.bf16.mxu1 %v5591_v8  ;;  %838 = vmatprep.subr.bf16.mxu0 %v4943_v21  ;;  %v4963_v37 = vld [vmem:[#allocation7 + $0xac] ss:$12 sps:$4 sm:$0xff]   ;;  %v4965_v38 = vld [vmem:[#allocation7 + $0xa8] ss:$12 sps:$4 sm:$0xff]   ;;  %v4966_v39 = vld [vmem:[#allocation7 + $0xb0] ss:$12 sps:$4 sm:$0xff]  }
 0x109   : > { %v4222_v48 = vld [vmem:[%s6449_s2] ss:$0 sm:$0xff]  ;;  %s5596_s29 = smov 32   ;;  %vm1142_vm2 = vcmask 130048   ;;  %vm1437_vm3 = vcmask 523264   ;;  %vm1440_vm4 = vcmask 785408  }
 0x10a   : > { %4617 = vmatpush3.bf16.msra.mxu1 %v4946_v23  ;;  %v4223_v52 = vld [vmem:[%s6450_s3] ss:$0 sm:$0xff]  ;;  %s6510_s4 = sld [smem:[#allocation24_spill]]  ;;  %s6511_s0 = sld [smem:[#allocation27_spill]] }
 0x10b   : > { %839 = vmatpush1.bf16.msra.mxu0 %v4945_v22  ;;  %4618 = vmatprep.subr.bf16.mxu1 %v5591_v8  ;;  %s6512_s10 = sld [smem:[#allocation29_spill]]  ;;  %s4221_s9 = sshll.u32 %s5962_s11, 3 }
 0x10c   : > { %840 = vmatprep.subr.bf16.mxu0 %v4947_v24  ;;  %s6513_s13 = sld [smem:[#allocation30_spill]]  ;;  %s6515_s15 = sld [smem:[#allocation32_spill]] }
 0x10d   : > { %s4046_s7 = scalar_lea.sflag [#allocation4], %s5962_s11  ;;  %p6516_p13 = scmp.ne.s32.totalorder %s6498_s23, 0 }
 0x10e   : > { %4619 = vmatpush3.bf16.msra.mxu1 %v4950_v26 }
 0x10f   : > { %841 = vmatpush1.bf16.msra.mxu0 %v4949_v25  ;;  %4620 = vmatprep.subr.bf16.mxu1 %v5591_v8 }
 0x110   : > { %842 = vmatprep.subr.bf16.mxu0 %v4951_v27 }
 0x112   : > { %4621 = vmatpush3.bf16.msra.mxu1 %v4954_v29 }
 0x113   : > { %843 = vmatpush1.bf16.msra.mxu0 %v4953_v28  ;;  %4622 = vmatprep.subr.bf16.mxu1 %v5591_v8 }
 0x114   : > { %844 = vmatprep.subr.bf16.mxu0 %v4955_v30 }
 0x116   : > { %4623 = vmatpush3.bf16.msra.mxu1 %v4958_v32 }
 0x117   : > { %845 = vmatpush1.bf16.msra.mxu0 %v4957_v31  ;;  %4624 = vmatprep.subr.bf16.mxu1 %v5591_v8 }
 0x118   : > { %846 = vmatprep.subr.bf16.mxu0 %v4959_v33 }
 0x11a   : > { %4625 = vmatpush3.bf16.msra.mxu1 %v4962_v36 }
 0x11b   : > { %847 = vmatpush1.bf16.msra.mxu0 %v4961_v35  ;;  %4626 = vmatprep.subr.bf16.mxu1 %v5591_v8 }
 0x11c   : > { %848 = vmatprep.subr.bf16.mxu0 %v4963_v37 }
 0x11e   : > { %4627 = vmatpush3.bf16.msra.mxu1 %v4966_v39 }
 0x11f   : > { %849 = vmatpush1.bf16.msra.mxu0 %v4965_v38  ;;  %4632 = vmatprep.subr.bf16.mxu1 %v5591_v8 }
 0x120   : > { %4656 = vmatprep.subr.bf16.mxu0 %v5591_v8 }
 0x190   : > { %v635_v11 = vpop.xlane.xlu0 %634 }
 0x191   : > { %v639_v12 = vmul.f32 0.0078125, %v635_v11 }
 0x193   : > { %v6000_v13 = vsub.f32 %v5990_v3, %v639_v12 }
 0x194   : > { %v637_v14 = vpop.xlane.xlu0 %636 }
 0x195   : > { %v640_v15 = vmul.f32 0.0078125, %v637_v14  ;;  %v643_v16 = vmul.f32 %v6000_v13, %v6000_v13 }
 0x197   : > { %v6005_v17 = vsub.f32 %v5994_v5, %v640_v15  ;;  %645 = vadd.xlane.f32.xlu1 %v643_v16 }
 0x199   : > { %v644_v18 = vmul.f32 %v6005_v17, %v6005_v17 }
 0x19b   : > { %647 = vadd.xlane.f32.xlu1 %v644_v18 }
 0x224   : > { %v646_v40 = vpop.xlane.xlu1 %645 }
 0x225   : > { %v649_v41 = vmul.f32 0.0078125, %v646_v40 }
 0x227   : > { %v651_v42 = vadd.f32 1e-05, %v649_v41 }
 0x228   : > { %v648_v43 = vpop.xlane.xlu1 %647 }
 0x229   : > { %5175 = vrsqrt.f32 %v651_v42  ;;  %v650_v44 = vmul.f32 0.0078125, %v648_v43 }
 0x22b   : > { %v652_v45 = vadd.f32 1e-05, %v650_v44 }
 0x22d   : > { %5177 = vrsqrt.f32 %v652_v45 }
 0x233   : > { %v5176_v46 = vpop.eup %5175 }
 0x234   : > { %v655_v47 = vmul.f32 %v5176_v46, %v6000_v13 }
 0x236   : > { %v663_v51 = vmul.f32 %v4222_v48, %v655_v47 }
 0x237   : > { %v5178_v49 = vpop.eup %5177 }
 0x238   : > { %v656_v50 = vmul.f32 %v5178_v49, %v6005_v17  ;;  %v671_v54 = vadd.f32 %v4223_v52, %v663_v51 }
 0x23a   : > { %v664_v53 = vmul.f32 %v4222_v48, %v656_v50 }
 0x23c   : > { %v672_v55 = vadd.f32 %v4223_v52, %v664_v53 }
 0x23e   : > { %v673_v56 = vpack.c.bf16 %v672_v55, %v671_v54 }
 0x240   : > { %867 = vmatmul.mubr.bf16.vlgmr.msra.gmra.mrb[0].mxu0 %v673_v56  ;;  %4629 = vmatmul.mubr.bf16.vlgmr.msra.gmra.mrb[0].mxu1 %v673_v56 }
 0x241   : > { %4634 = vmatprep.mubr.msk.bf16.mxu1 %vm5593_vm0, %v5591_v8  ;;  %4658 = vmatprep.mubr.msk.bf16.mxu0 %vm5593_vm0, %v5591_v8 }
 0x313   : > { %v868_v57 = vpop.f32.mrb[0].mxu0  ;;  %v911_v58 = vpop.f32.mrb[0].mxu1 }
 0x314   : > { %v870_v59 = vpop.f32.mrb[1].mxu0  ;;  %v4630_v60 = vpop.f32.mrb[1].mxu1 }
 0x315   : > { %v872_v61 = vpop.f32.mrb[2].mxu0  ;;  %v914_v62 = vpop.f32.mrb[2].mxu1 }
 0x316   : > { %v918_v63 = vpack.c.bf16 %v872_v61, %v868_v57  ;;  %v6032_v0 = vpack.c.bf16 %v914_v62, %v911_v58  ;;  %v874_v1 = vpop.f32.mrb[3].mxu0  ;;  %v4631_v2 = vpop.f32.mrb[3].mxu1 }
 0x317   : > { %v919_v4 = vpack.c.bf16 %v874_v1, %v870_v59 }
 0x318   : > { %4657 = vmatpush3.bf16.msra.mxu0 %v6032_v0  ;;  %922 = vrot.lane.b32.xlu1 %v918_v63, %s5594_s30 }
 0x319   : > { %929 = vrot.lane.b32.xlu0 %v919_v4, %s5594_s30  ;;  %v950_v6 = vsel %vm945_vm1, %v919_v4, 0  ;;  %4668 = vmatprep.subr.bf16.mxu0 %v5591_v8 }
 0x31a   : > { %4633 = vmatpush3.bf16.xpose.msra.mxu1 %v950_v6 }
 0x31b   : > { %4638 = vmatprep.subr.bf16.mxu1 %v5591_v8 }
 0x31c   : > { %931 = vrot.lane.b32.xlu1 %v919_v4, %s5595_s26 }
 0x31d   : > { %933 = vrot.lane.b32.xlu0 %v919_v4, %s5596_s29 }
 0x320   : > { %924 = vrot.lane.b32.xlu1 %v918_v63, %s5595_s26 }
 0x321   : > { %4635 = vmatmul.mubr.msk.bf16.vlgmr.msra.gmra.mrb[4].mxu1 %vm945_vm1, %v918_v63 }
 0x322   : > { %4640 = vmatprep.mubr.msk.bf16.mxu1 %vm5593_vm0, %v5591_v8 }
 0x324   : > { %926 = vrot.lane.b32.xlu1 %v918_v63, %s5596_s29 }
 0x38a   : > { %v923_v7 = vpop.permute.xlu1 %922 }
 0x38b   : > { %v930_v9 = vpop.permute.xlu0 %929 }
 0x38c   : > { %v997_v10 = vsel %vm945_vm1, %v930_v9, 0 }
 0x38d   : > { %4639 = vmatpush3.bf16.xpose.msra.mxu1 %v997_v10 }
 0x38e   : > { %4644 = vmatprep.subr.bf16.mxu1 %v5591_v8  ;;  %v932_v11 = vpop.permute.xlu1 %931 }
 0x38f   : > { %v1044_v12 = vsel %vm945_vm1, %v932_v11, 0  ;;  %v934_v13 = vpop.permute.xlu0 %933 }
 0x390   : > { %v1091_v15 = vsel %vm945_vm1, %v934_v13, 0 }
 0x392   : > { %v925_v14 = vpop.permute.xlu1 %924 }
 0x394   : > { %4641 = vmatmul.mubr.msk.bf16.vlgmr.msra.gmra.mrb[8].mxu1 %vm945_vm1, %v923_v7 }
 0x395   : > { %4645 = vmatpush3.bf16.xpose.msra.mxu1 %v1044_v12  ;;  %4646 = vmatprep.mubr.msk.bf16.mxu1 %vm5593_vm0, %v5591_v8 }
 0x396   : > { %4650 = vmatprep.subr.bf16.mxu1 %v5591_v8  ;;  %v927_v16 = vpop.permute.xlu1 %926 }
 0x39c   : > { %4647 = vmatmul.mubr.msk.bf16.vlgmr.msra.gmra.mrb[12].mxu1 %vm945_vm1, %v925_v14 }
 0x39d   : > { %4651 = vmatpush3.bf16.xpose.msra.mxu1 %v1091_v15  ;;  %4652 = vmatprep.mubr.msk.bf16.mxu1 %vm5593_vm0, %v5591_v8 }
 0x39e   : > { %4662 = vmatprep.subr.bf16.mxu1 %v5591_v8 }
 0x3a4   : > { %4653 = vmatmul.mubr.msk.bf16.vlgmr.msra.gmra.mrb[16].mxu1 %vm945_vm1, %v927_v16 }
 0x3a5   : > { %4664 = vmatprep.mubr.msk.bf16.mxu1 %vm5593_vm0, %v5591_v8 }
 0x3f4   : > { %v986_v17 = vpop.f32.mrb[4].mxu1 }
 0x3f5   : > { %v1134_v18 = vmul.f32 0.17677669, %v986_v17  ;;  %v4636_v19 = vpop.f32.mrb[5].mxu1 }
 0x3f6   : > { %v989_v20 = vpop.f32.mrb[6].mxu1 }
 0x3f7   : > { %v1135_v21 = vmul.f32 0.17677669, %v989_v20  ;;  %v4637_v22 = vpop.f32.mrb[7].mxu1  ;;  %v1143_v23 = vsel %vm1142_vm2, %v1134_v18, -inf }
 0x3f8   : > { %1144 = vmax.xlane.f32.xlu0 %v1143_v23 }
 0x3f9   : > { %v1146_v24 = vsel %vm1142_vm2, %v1135_v21, -inf }
 0x3fa   : > { %1147 = vmax.xlane.f32.xlu1 %v1146_v24 }
 0x467   : > { %v1033_v25 = vpop.f32.mrb[8].mxu1 }
 0x468   : > { %v1136_v26 = vmul.f32 0.17677669, %v1033_v25  ;;  %v4642_v27 = vpop.f32.mrb[9].mxu1 }
 0x469   : > { %v1036_v28 = vpop.f32.mrb[10].mxu1 }
 0x46a   : > { %v1137_v29 = vmul.f32 0.17677669, %v1036_v28  ;;  %v4643_v30 = vpop.f32.mrb[11].mxu1  ;;  %v1149_v31 = vsel %vm1142_vm2, %v1136_v26, -inf }
 0x46b   : > { %1150 = vmax.xlane.f32.xlu0 %v1149_v31 }
 0x46c   : > { %v1152_v32 = vsel %vm1142_vm2, %v1137_v29, -inf }
 0x46f   : > { %1153 = vmax.xlane.f32.xlu0 %v1152_v32  ;;  %v1080_v33 = vpop.f32.mrb[12].mxu1 }
 0x470   : > { %v1138_v35 = vmul.f32 0.17677669, %v1080_v33  ;;  %v4648_v36 = vpop.f32.mrb[13].mxu1 }
 0x471   : > { %v1083_v37 = vpop.f32.mrb[14].mxu1 }
 0x472   : > { %v1139_v38 = vmul.f32 0.17677669, %v1083_v37  ;;  %v4649_v39 = vpop.f32.mrb[15].mxu1  ;;  %v1155_v40 = vsel %vm1142_vm2, %v1138_v35, -inf }
 0x473   : > { %1156 = vmax.xlane.f32.xlu0 %v1155_v40 }
 0x474   : > { %v1158_v41 = vsel %vm1142_vm2, %v1139_v38, -inf }
 0x475   : > { %1159 = vmax.xlane.f32.xlu1 %v1158_v41 }
 0x477   : > { %v1127_v42 = vpop.f32.mrb[16].mxu1 }
 0x478   : > { %v1140_v43 = vmul.f32 0.17677669, %v1127_v42  ;;  %v4654_v44 = vpop.f32.mrb[17].mxu1 }
 0x479   : > { %v1130_v45 = vpop.f32.mrb[18].mxu1 }
 0x47a   : > { %v6068_v46 = vmul.f32 0.17677669, %v1130_v45  ;;  %v4655_v47 = vpop.f32.mrb[19].mxu1  ;;  %v1161_v48 = vsel %vm1142_vm2, %v1140_v43, -inf }
 0x47b   : > { %1162 = vmax.xlane.f32.xlu0 %v1161_v48 }
 0x47c   : > { %v1164_v49 = vsel %vm1142_vm2, %v6068_v46, -inf }
 0x47d   : > { %1165 = vmax.xlane.f32.xlu1 %v1164_v49 }
 0x485   : > { %v1145_v50 = vpop.xlane.xlu0 %1144 }
 0x486   : > { %v1167_v51 = vsub.f32 %v1134_v18, %v1145_v50 }
 0x487   : > { %v1148_v52 = vpop.xlane.xlu1 %1147 }
 0x488   : > { %v1175_v53 = vmul.f32 1.442695, %v1167_v51  ;;  %v1168_v54 = vsub.f32 %v1135_v21, %v1148_v52 }
 0x48a   : > { %5179 = vpow2.f32 %v1175_v53  ;;  %v1177_v55 = vmul.f32 1.442695, %v1168_v54 }
 0x48c   : > { %5181 = vpow2.f32 %v1177_v55 }
 0x494   : > { %v5180_v56 = vpop.eup %5179 }
 0x495   : > { %v1191_v57 = vsel %vm1142_vm2, %v5180_v56, 0.0 }
 0x496   : > { %v5182_v58 = vpop.eup %5181  ;;  %1192 = vadd.xlane.f32.xlu0 %v1191_v57 }
 0x497   : > { %v1194_v59 = vsel %vm1142_vm2, %v5182_v58, 0.0 }
 0x498   : > { %1195 = vadd.xlane.f32.xlu1 %v1194_v59 }
 0x4f8   : > { %v1151_v60 = vpop.xlane.xlu0 %1150 }
 0x4f9   : > { %v1169_v61 = vsub.f32 %v1136_v26, %v1151_v60 }
 0x4fb   : > { %v1179_v62 = vmul.f32 1.442695, %v1169_v61 }
 0x4fc   : > { %v1154_v63 = vpop.xlane.xlu0 %1153 }
 0x4fd   : > { %5183 = vpow2.f32 %v1179_v62  ;;  %v1170_v1 = vsub.f32 %v1137_v29, %v1154_v63 }
 0x4ff   : > { %v1181_v2 = vmul.f32 1.442695, %v1170_v1 }
 0x500   : > { %v1157_v4 = vpop.xlane.xlu0 %1156 }
 0x501   : > { %5185 = vpow2.f32 %v1181_v2  ;;  %v1171_v6 = vsub.f32 %v1138_v35, %v1157_v4  ;;  %v4967_v2 = vld [vmem:[#allocation8] sm:$0xff]   ;;  %v4968_v4 = vld [vmem:[#allocation8 + $0x8] sm:$0xff]  }
 0x502   : > { %v1160_v7 = vpop.xlane.xlu1 %1159 }
 0x503   : > { %v1183_v9 = vmul.f32 1.442695, %v1171_v6  ;;  %v1172_v10 = vsub.f32 %v1139_v38, %v1160_v7 }
 0x505   : > { %5187 = vpow2.f32 %v1183_v9  ;;  %v1185_v11 = vmul.f32 1.442695, %v1172_v10 }
 0x507   : > { %v5184_v12 = vpop.eup %5183  ;;  %5189 = vpow2.f32 %v1185_v11  ;;  %v4969_v11 = vld [vmem:[#allocation8 + $0x10] sm:$0xff]  }
 0x508   : > { %v1163_v13 = vpop.xlane.xlu0 %1162  ;;  %v1197_v14 = vsel %vm1142_vm2, %v5184_v12, 0.0 }
 0x509   : > { %v1173_v15 = vsub.f32 %v1140_v43, %v1163_v13  ;;  %1198 = vadd.xlane.f32.xlu0 %v1197_v14 }
 0x50a   : > { %v1166_v25 = vpop.xlane.xlu1 %1165 }
 0x50b   : > { %v5186_v16 = vpop.eup %5185  ;;  %v1187_v17 = vmul.f32 1.442695, %v1173_v15  ;;  %v1174_v32 = vsub.f32 %v6068_v46, %v1166_v25 }
 0x50c   : > { %v1200_v18 = vsel %vm1142_vm2, %v5186_v16, 0.0 }
 0x50d   : > { %5191 = vpow2.f32 %v1187_v17  ;;  %1201 = vadd.xlane.f32.xlu1 %v1200_v18  ;;  %v1189_v35 = vmul.f32 1.442695, %v1174_v32  ;;  %v4970_v18 = vld [vmem:[#allocation8 + $0x18] sm:$0xff]  }
 0x50f   : > { %v5188_v19 = vpop.eup %5187 }
 0x510   : > { %v1203_v20 = vsel %vm1142_vm2, %v5188_v19, 0.0 }
 0x511   : > { %v5190_v21 = vpop.eup %5189  ;;  %1204 = vadd.xlane.f32.xlu0 %v1203_v20  ;;  %v4972_v20 = vld [vmem:[#allocation8 + $0x28] sm:$0xff]  }
 0x512   : > { %v1206_v22 = vsel %vm1142_vm2, %v5190_v21, 0.0 }
 0x513   : > { %1207 = vadd.xlane.f32.xlu1 %v1206_v22  ;;  %v4974_v22 = vld [vmem:[#allocation8 + $0x38] sm:$0xff]  }
 0x517   : > { %v5192_v23 = vpop.eup %5191 }
 0x518   : > { %v1209_v24 = vsel %vm1142_vm2, %v5192_v23, 0.0 }
 0x519   : > { %1210 = vadd.xlane.f32.xlu0 %v1209_v24 }
 0x523   : > { %v1193_v26 = vpop.xlane.xlu0 %1192 }
 0x524   : > { %5193 = vrcp.f32 %v1193_v26  ;;  %939 = vrot.lane.b32.xlu1 %v6032_v0, %s5595_s26 }
 0x525   : > { %v1196_v27 = vpop.xlane.xlu1 %1195 }
 0x526   : > { %5195 = vrcp.f32 %v1196_v27 }
 0x527   : > { %5197 = vpow2.f32 %v1189_v35 }
 0x52e   : > { %v5194_v28 = vpop.eup %5193 }
 0x52f   : > { %936 = vrot.lane.b32.xlu0 %v6032_v0, %s5594_s30  ;;  %v1223_v30 = vmul.f32 %v5194_v28, %v5180_v56 }
 0x530   : > { %v5196_v29 = vpop.eup %5195 }
 0x531   : > { %v1224_v31 = vmul.f32 %v5196_v29, %v5182_v58  ;;  %v5198_v36 = vpop.eup %5197 }
 0x532   : > { %v1212_v37 = vsel %vm1142_vm2, %v5198_v36, 0.0 }
 0x533   : > { %v1231_v33 = vpack.c.bf16 %v1224_v31, %v1223_v30 }
 0x535   : > { %4659 = vmatmul.mubr.msk.bf16.vlgmr.msra.gmra.mrb[4].mxu0 %vm1142_vm2, %v1231_v33 }
 0x536   : > { %4670 = vmatprep.mubr.msk.bf16.mxu0 %vm5593_vm0, %v5591_v8 }
 0x548   : > { %1213 = vadd.xlane.f32.xlu1 %v1212_v37 }
 0x559   : > { %942 = vrot.lane.b32.xlu1 %v6032_v0, %s5596_s29 }
 0x596   : > { %v1199_v38 = vpop.xlane.xlu0 %1198 }
 0x59a   : > { %v1202_v39 = vpop.xlane.xlu1 %1201 }
 0x59b   : > { %5199 = vrcp.f32 %v1202_v39 }
 0x59c   : > { %5201 = vrcp.f32 %v1199_v38 }
 0x59e   : > { %v1205_v40 = vpop.xlane.xlu0 %1204 }
 0x59f   : > { %5203 = vrcp.f32 %v1205_v40 }
 0x5a0   : > { %v1208_v41 = vpop.xlane.xlu1 %1207 }
 0x5a1   : > { %5205 = vrcp.f32 %v1208_v41 }
 0x5a4   : > { %v940_v42 = vpop.permute.xlu1 %939 }
 0x5a5   : > { %v5200_v43 = vpop.eup %5199  ;;  %4669 = vmatpush3.bf16.msra.mxu0 %v940_v42 }
 0x5a6   : > { %v1211_v44 = vpop.xlane.xlu0 %1210  ;;  %4680 = vmatprep.subr.bf16.mxu0 %v5591_v8  ;;  %v5202_v45 = vpop.eup %5201  ;;  %v1226_v46 = vmul.f32 %v5200_v43, %v5186_v16 }
 0x5a7   : > { %v1225_v48 = vmul.f32 %v5202_v45, %v5184_v12  ;;  %5207 = vrcp.f32 %v1211_v44  ;;  %v4256_v45 = vld [vmem:[%s6453_s6] ss:$0 sm:$0xff] }
 0x5a9   : > { %v5204_v47 = vpop.eup %5203  ;;  %v1232_v52 = vpack.c.bf16 %v1226_v46, %v1225_v48 }
 0x5aa   : > { %v937_v49 = vpop.permute.xlu0 %936  ;;  %v1227_v50 = vmul.f32 %v5204_v47, %v5188_v19  ;;  %v4971_v19 = vld [vmem:[#allocation8 + $0x20] sm:$0xff]  }
 0x5ab   : > { %v5206_v0 = vpop.eup %5205  ;;  %4663 = vmatpush3.bf16.msra.mxu1 %v937_v49 }
 0x5ac   : > { %v1228_v51 = vmul.f32 %v5206_v0, %v5190_v21  ;;  %4674 = vmatprep.subr.bf16.mxu1 %v5591_v8  ;;  %v4973_v21 = vld [vmem:[#allocation8 + $0x30] sm:$0xff]  }
 0x5ae   : > { %4665 = vmatmul.mubr.msk.bf16.vlgmr.msra.gmra.mrb[20].mxu1 %vm1142_vm2, %v1232_v52  ;;  %v1233_v53 = vpack.c.bf16 %v1228_v51, %v1227_v50 }
 0x5af   : > { %4676 = vmatprep.mubr.msk.bf16.mxu1 %vm5593_vm0, %v5591_v8 }
 0x5b0   : > { %4671 = vmatmul.mubr.msk.bf16.vlgmr.msra.gmra.mrb[8].mxu0 %vm1142_vm2, %v1233_v53  ;;  %v4975_v53 = vld [vmem:[#allocation11] ss:$16 sps:$4 sm:$0xff]  }
 0x5b1   : > { %4696 = vmatprep.mubr.msk.bf16.mxu0 %vm5593_vm0, %v5591_v8  ;;  %v5208_v56 = vpop.eup %5207  ;;  %4681 = vmatpush3.bf16.msra.mxu0 %v4967_v2 }
 0x5b2   : > { %v1229_v58 = vmul.f32 %v5208_v56, %v5192_v23  ;;  %4682 = vmatprep.subr.bf16.mxu0 %v5591_v8  ;;  %v4980_v56 = vld [vmem:[#allocation11 + $0xc] ss:$16 sps:$4 sm:$0xff]  }
 0x5b5   : > { %4683 = vmatpush3.bf16.msra.mxu0 %v4968_v4 }
 0x5b6   : > { %4684 = vmatprep.subr.bf16.mxu0 %v5591_v8 }
 0x5b9   : > { %4685 = vmatpush3.bf16.msra.mxu0 %v4969_v11  ;;  %v4995_v11 = vld [vmem:[#allocation11 + $0x64] ss:$16 sps:$4 sm:$0xff]  }
 0x5ba   : > { %4686 = vmatprep.subr.bf16.mxu0 %v5591_v8 }
 0x5bd   : > { %4687 = vmatpush3.bf16.msra.mxu0 %v4970_v18  ;;  %v5002_v18 = vld [vmem:[#allocation11 + $0x88] ss:$16 sps:$4 sm:$0xff]  }
 0x5be   : > { %4688 = vmatprep.subr.bf16.mxu0 %v5591_v8 }
 0x5c1   : > { %4689 = vmatpush3.bf16.msra.mxu0 %v4971_v19  ;;  %v5007_v19 = vld [vmem:[#allocation11 + $0xa4] ss:$16 sps:$4 sm:$0xff]  }
 0x5c2   : > { %4690 = vmatprep.subr.bf16.mxu0 %v5591_v8 }
 0x5c5   : > { %4691 = vmatpush3.bf16.msra.mxu0 %v4972_v20  ;;  %v5010_v20 = vld [vmem:[#allocation11 + $0xac] ss:$16 sps:$4 sm:$0xff]  }
 0x5c6   : > { %4692 = vmatprep.subr.bf16.mxu0 %v5591_v8 }
 0x5c9   : > { %4693 = vmatpush3.bf16.msra.mxu0 %v4973_v21  ;;  %v5005_v21 = vld [vmem:[#allocation11 + $0xa0] ss:$16 sps:$4 sm:$0xff]  }
 0x5ca   : > { %4694 = vmatprep.subr.bf16.mxu0 %v5591_v8 }
 0x5cd   : > { %4695 = vmatpush3.bf16.msra.mxu0 %v4974_v22  ;;  %v5008_v22 = vld [vmem:[#allocation11 + $0xa8] ss:$16 sps:$4 sm:$0xff]  }
 0x5ce   : > { %1856 = vmatprep.subr.bf16.mxu0 %v4980_v56  ;;  %v5029_v56 = vld [vmem:[#allocation13 + $0x8] sm:$0xff]  }
 0x5d5   : > { %v1214_v54 = vpop.xlane.xlu1 %1213 }
 0x5d6   : > { %5209 = vrcp.f32 %v1214_v54  ;;  %v4977_v54 = vld [vmem:[#allocation11 + $0x4] ss:$16 sps:$4 sm:$0xff]  }
 0x5d9   : > { %v943_v55 = vpop.permute.xlu1 %942 }
 0x5da   : > { %4675 = vmatpush3.bf16.msra.mxu1 %v943_v55  ;;  %v4978_v55 = vld [vmem:[#allocation11 + $0x8] ss:$16 sps:$4 sm:$0xff]  }
 0x5db   : > { %1813 = vmatprep.subr.bf16.mxu1 %v4977_v54  ;;  %v5027_v54 = vld [vmem:[#allocation13 + $0x48] sm:$0xff]  }
 0x5e0   : > { %v5210_v57 = vpop.eup %5209 }
 0x5e1   : > { %v1230_v59 = vmul.f32 %v5210_v57, %v5198_v36  ;;  %v4983_v57 = vld [vmem:[#allocation11 + $0x24] ss:$16 sps:$4 sm:$0xff]  }
 0x5e3   : > { %v1234_v60 = vpack.c.bf16 %v1230_v59, %v1229_v58  ;;  %v4986_v58 = vld [vmem:[#allocation11 + $0x2c] ss:$16 sps:$4 sm:$0xff]   ;;  %v4984_v59 = vld [vmem:[#allocation11 + $0x28] ss:$16 sps:$4 sm:$0xff]  }
 0x5e5   : > { %4677 = vmatmul.mubr.msk.bf16.vlgmr.msra.gmra.mrb[24].mxu1 %vm1142_vm2, %v1234_v60 }
 0x5e6   : > { %1845 = vmatprep.mubr.bf16.mxu1 %v5592_v34  ;;  %1814 = vmatpush1.bf16.msra.mxu1 %v4975_v53  ;;  %v5026_v53 = vld [vmem:[#allocation13 + $0x80] sm:$0xff]  }
 0x5e7   : > { %1815 = vmatprep.subr.bf16.mxu1 %v4983_v57  ;;  %v5030_v57 = vld [vmem:[#allocation13 + $0x88] sm:$0xff]  }
 0x608   : > { %v1272_v61 = vpop.f32.mrb[4].mxu0 }
 0x609   : > { %v4660_v62 = vpop.f32.mrb[5].mxu0 }
 0x60a   : > { %v1275_v63 = vpop.f32.mrb[6].mxu0 }
 0x60b   : > { %v4661_v1 = vpop.f32.mrb[7].mxu0 }
 0x681   : > { %v1316_v6 = vpop.f32.mrb[20].mxu1 }
 0x682   : > { %v4666_v7 = vpop.f32.mrb[21].mxu1 }
 0x683   : > { %v1319_v9 = vpop.f32.mrb[22].mxu1  ;;  %v1360_v10 = vpop.f32.mrb[8].mxu0  ;;  %v4992_v7 = vld [vmem:[#allocation11 + $0x4c] ss:$16 sps:$4 sm:$0xff]  }
 0x684   : > { %v4905_v12 = vpack.i.bf16 %v1319_v9, %v1316_v6  ;;  %v4667_v13 = vpop.f32.mrb[23].mxu1  ;;  %v4672_v14 = vpop.f32.mrb[9].mxu0  ;;  %v4989_v6 = vld [vmem:[#allocation11 + $0x44] ss:$16 sps:$4 sm:$0xff]   ;;  %v4987_v9 = vld [vmem:[#allocation11 + $0x40] ss:$16 sps:$4 sm:$0xff]  }
 0x685   : > { %v1363_v15 = vpop.f32.mrb[10].mxu0  ;;  %v4993_v13 = vld [vmem:[#allocation11 + $0x60] ss:$16 sps:$4 sm:$0xff]   ;;  %v4996_v14 = vld [vmem:[#allocation11 + $0x68] ss:$16 sps:$4 sm:$0xff]  }
 0x686   : > { %v4910_v16 = vpack.i.bf16 %v1363_v15, %v1360_v10  ;;  %v4673_v17 = vpop.f32.mrb[11].mxu0  ;;  %4906 = vrot.lane.b32.xlu1 %v4905_v12, %s5596_s29  ;;  %v4990_v10 = vld [vmem:[#allocation11 + $0x48] ss:$16 sps:$4 sm:$0xff]   ;;  %v4998_v12 = vld [vmem:[#allocation11 + $0x6c] ss:$16 sps:$4 sm:$0xff]  }
 0x687   : > { %v5001_v15 = vld [vmem:[#allocation11 + $0x84] ss:$16 sps:$4 sm:$0xff]   ;;  %v4999_v17 = vld [vmem:[#allocation11 + $0x80] ss:$16 sps:$4 sm:$0xff]  }
 0x688   : > { %4911 = vrot.lane.b32.xlu0 %v4910_v16, %s5595_s26  ;;  %v5004_v16 = vld [vmem:[#allocation11 + $0x8c] ss:$16 sps:$4 sm:$0xff]  }
 0x6b8   : > { %v1404_v23 = vpop.f32.mrb[24].mxu1 }
 0x6b9   : > { %v4678_v24 = vpop.f32.mrb[25].mxu1 }
 0x6ba   : > { %v1407_v25 = vpop.f32.mrb[26].mxu1  ;;  %v5016_v24 = vld [vmem:[#allocation11 + $0xcc] ss:$16 sps:$4 sm:$0xff]  }
 0x6bb   : > { %v4915_v26 = vpack.i.bf16 %v1407_v25, %v1404_v23  ;;  %v4679_v27 = vpop.f32.mrb[27].mxu1  ;;  %v5013_v23 = vld [vmem:[#allocation11 + $0xc4] ss:$16 sps:$4 sm:$0xff]   ;;  %v5011_v25 = vld [vmem:[#allocation11 + $0xc0] ss:$16 sps:$4 sm:$0xff]  }
 0x6bc   : > { %v5019_v27 = vld [vmem:[#allocation11 + $0xe4] ss:$16 sps:$4 sm:$0xff]  }
 0x6bd   : > { %4916 = vrot.lane.b32.xlu1 %v4915_v26, %s5594_s30  ;;  %v5014_v26 = vld [vmem:[#allocation11 + $0xc8] ss:$16 sps:$4 sm:$0xff]  }
 0x6f8   : > { %v4907_v28 = vpop.permute.xlu1 %4906 }
 0x6f9   : > { %v4909_v29 = vunpack.i.h.bf16 %v4907_v28  ;;  %v4908_v30 = vunpack.i.l.bf16 %v4907_v28  ;;  %v5017_v28 = vld [vmem:[#allocation11 + $0xe0] ss:$16 sps:$4 sm:$0xff]  }
 0x6fa   : > { %v4912_v31 = vpop.permute.xlu0 %4911 }
 0x6fb   : > { %v4914_v32 = vunpack.i.h.bf16 %v4912_v31  ;;  %v4913_v33 = vunpack.i.l.bf16 %v4912_v31  ;;  %v1436_v35 = vsel %vm945_vm1, %v1275_v63, %v4909_v29  ;;  %v1435_v36 = vsel %vm945_vm1, %v1272_v61, %v4908_v30  ;;  %v5020_v29 = vld [vmem:[#allocation11 + $0xe8] ss:$16 sps:$4 sm:$0xff]   ;;  %v5022_v30 = vld [vmem:[#allocation11 + $0xec] ss:$16 sps:$4 sm:$0xff]  }
 0x6fd   : > { %v1438_v40 = vsel %vm1437_vm3, %v1435_v36, %v4913_v33  ;;  %v1439_v41 = vsel %vm1437_vm3, %v1436_v35, %v4914_v32 }
 0x72f   : > { %v4917_v37 = vpop.permute.xlu1 %4916 }
 0x730   : > { %v4919_v38 = vunpack.i.h.bf16 %v4917_v37  ;;  %v4918_v39 = vunpack.i.l.bf16 %v4917_v37 }
 0x732   : > { %v1442_v42 = vsel %vm1440_vm4, %v1439_v41, %v4919_v38  ;;  %v1441_v43 = vsel %vm1440_vm4, %v1438_v40, %v4918_v39  ;;  %v4265_v40 = vld [vmem:[%s6510_s4] ss:$0 sm:$0xff] }
 0x733   : > { %v1443_v44 = vpack.c.bf16 %v1442_v42, %v1441_v43 }
 0x735   : > { %4697 = vmatmul.mubr.bf16.vlgmr.msra.gmra.mrb[12].mxu0 %v1443_v44  ;;  %v4266_v44 = vld [vmem:[#allocation10] ss:$0 sm:$0xff] }
 0x736   : > { %1888 = vmatprep.mubr.bf16.mxu0 %v5592_v34  ;;  %1857 = vmatpush1.bf16.msra.mxu0 %v4978_v55  ;;  %v5028_v55 = vld [vmem:[#allocation13 + $0xc8] sm:$0xff]  }
 0x737   : > { %1858 = vmatprep.subr.bf16.mxu0 %v4986_v58  ;;  %v5031_v58 = vld [vmem:[#allocation13 + $0x50] sm:$0xff]  }
 0x73a   : > { %1859 = vmatpush1.bf16.msra.mxu0 %v4984_v59  ;;  %v5033_v59 = vld [vmem:[#allocation13 + $0x10] sm:$0xff]  }
 0x73b   : > { %1860 = vmatprep.subr.bf16.mxu0 %v4992_v7  ;;  %v5043_v7 = vld [vmem:[#allocation13 + $0x68] sm:$0xff]  }
 0x73e   : > { %1861 = vmatpush1.bf16.msra.mxu0 %v4990_v10  ;;  %v5045_v10 = vld [vmem:[#allocation13 + $0x28] sm:$0xff]  }
 0x73f   : > { %1862 = vmatprep.subr.bf16.mxu0 %v4998_v12  ;;  %v5047_v12 = vld [vmem:[#allocation13 + $0x70] sm:$0xff]  }
 0x742   : > { %1863 = vmatpush1.bf16.msra.mxu0 %v4996_v14  ;;  %v5049_v14 = vld [vmem:[#allocation13 + $0x30] sm:$0xff]  }
 0x743   : > { %1864 = vmatprep.subr.bf16.mxu0 %v5004_v16  ;;  %v5051_v16 = vld [vmem:[#allocation13 + $0x78] sm:$0xff]  }
 0x746   : > { %1865 = vmatpush1.bf16.msra.mxu0 %v5002_v18  ;;  %v5053_v18 = vld [vmem:[#allocation13 + $0x38] sm:$0xff]  }
 0x747   : > { %1866 = vmatprep.subr.bf16.mxu0 %v5010_v20  ;;  %v1633_v20 = vlaneseq }
 0x74a   : > { %1867 = vmatpush1.bf16.msra.mxu0 %v5008_v22 }
 0x74b   : > { %1868 = vmatprep.subr.bf16.mxu0 %v5016_v24  ;;  %v1631_v24 = vld [vmem:[%s6511_s0] sm:$0xf] }
 0x74e   : > { %1869 = vmatpush1.bf16.msra.mxu0 %v5014_v26 }
 0x74f   : > { %1870 = vmatprep.subr.bf16.mxu0 %v5022_v30 }
 0x752   : > { %1871 = vmatpush1.bf16.msra.mxu0 %v5020_v29 }
 0x808   : > { %v1549_v46 = vpop.f32.mrb[12].mxu0 }
 0x809   : > { %v1550_v47 = vadd.f32 %v4256_v45, %v1549_v46  ;;  %v4698_v48 = vpop.f32.mrb[13].mxu0 }
 0x80a   : > { %v1552_v49 = vpop.f32.mrb[14].mxu0 }
 0x80b   : > { %v6122_v0 = vadd.f32 %v1550_v47, %v5990_v3  ;;  %v1553_v50 = vadd.f32 %v4256_v45, %v1552_v49  ;;  %v4699_v51 = vpop.f32.mrb[15].mxu0  ;;  %v4981_v3 = vld [vmem:[#allocation11 + $0x20] ss:$16 sps:$4 sm:$0xff]  }
 0x80c   : > { %1816 = vmatpush1.bf16.msra.mxu1 %v4981_v3  ;;  %v5023_v49 = vld [vmem:[#allocation13 + $0x40] sm:$0xff]   ;;  %v5032_v3 = vld [vmem:[#allocation13 + $0xd0] sm:$0xff]  }
 0x80d   : > { %v6125_v52 = vadd.f32 %v1553_v50, %v5994_v5  ;;  %1560 = vadd.xlane.f32.xlu0 %v6122_v0  ;;  %1817 = vmatprep.subr.bf16.mxu1 %v4989_v6  ;;  %v5024_v50 = vld [vmem:[#allocation13 + $0xc0] sm:$0xff]  }
 0x80e   : > { %4512 = vmatprep.subr.bf16.mxu0 %v5024_v50  ;;  %v5025_v51 = vld [vmem:[#allocation13] sm:$0xff]  }
 0x80f   : > { %1562 = vadd.xlane.f32.xlu1 %v6125_v52  ;;  %v5042_v6 = vld [vmem:[#allocation13 + $0xa0] sm:$0xff]  }
 0x810   : > { %1818 = vmatpush1.bf16.msra.mxu1 %v4987_v9  ;;  %v5044_v9 = vld [vmem:[#allocation13 + $0xe8] sm:$0xff]  }
 0x811   : > { %1819 = vmatprep.subr.bf16.mxu1 %v4995_v11  ;;  %v5046_v11 = vld [vmem:[#allocation13 + $0xa8] sm:$0xff]  }
 0x814   : > { %1820 = vmatpush1.bf16.msra.mxu1 %v4993_v13  ;;  %v5048_v13 = vld [vmem:[#allocation13 + $0xf0] sm:$0xff]  }
 0x815   : > { %1821 = vmatprep.subr.bf16.mxu1 %v5001_v15  ;;  %v5050_v15 = vld [vmem:[#allocation13 + $0xb0] sm:$0xff]  }
 0x818   : > { %1822 = vmatpush1.bf16.msra.mxu1 %v4999_v17  ;;  %v5052_v17 = vld [vmem:[#allocation13 + $0xf8] sm:$0xff]  }
 0x819   : > { %1823 = vmatprep.subr.bf16.mxu1 %v5007_v19  ;;  %v5054_v19 = vld [vmem:[#allocation13 + $0xb8] sm:$0xff]  }
 0x81c   : > { %1824 = vmatpush1.bf16.msra.mxu1 %v5005_v21  ;;  %v6145_v21 = vshrl.u32 %v1633_v20, 7 }
 0x81d   : > { %1825 = vmatprep.subr.bf16.mxu1 %v5013_v23 }
 0x81e   : > { %v1635_v22 = vsub.s32 0, %v6145_v21  ;;  %v1643_v23 = vsub.s32 2, %v6145_v21  ;;  %v1647_v26 = vsub.s32 3, %v6145_v21 }
 0x820   : > { %1826 = vmatpush1.bf16.msra.mxu1 %v5011_v25  ;;  %v1639_v25 = vsub.s32 1, %v6145_v21  ;;  %v1648_v30 = vrot.slane %v1631_v24, %v1647_v26 }
 0x821   : > { %1827 = vmatprep.subr.bf16.mxu1 %v5019_v27  ;;  %v1636_v27 = vrot.slane %v1631_v24, %v1635_v22 }
 0x822   : > { %v1640_v29 = vrot.slane %v1631_v24, %v1639_v25 }
 0x824   : > { %1828 = vmatpush1.bf16.msra.mxu1 %v5017_v28  ;;  %v1644_v28 = vrot.slane %v1631_v24, %v1643_v23 }
 0x825   : > { %4490 = vmatprep.subr.bf16.mxu1 %v5023_v49 }
 0x89a   : > { %v1561_v5 = vpop.xlane.xlu0 %1560 }
 0x89b   : > { %v1564_v60 = vmul.f32 0.0078125, %v1561_v5  ;;  %v5034_v5 = vld [vmem:[#allocation13 + $0x90] sm:$0xff]  }
 0x89c   : > { %v1563_v61 = vpop.xlane.xlu1 %1562 }
 0x89d   : > { %v6130_v62 = vsub.f32 %v6122_v0, %v1564_v60  ;;  %v1565_v63 = vmul.f32 0.0078125, %v1563_v61  ;;  %v5035_v60 = vld [vmem:[#allocation13 + $0x58] sm:$0xff]  }
 0x89e   : > { %v5036_v61 = vld [vmem:[#allocation13 + $0xd8] sm:$0xff]  }
 0x89f   : > { %v6133_v1 = vsub.f32 %v6125_v52, %v1565_v63  ;;  %v1568_v2 = vmul.f32 %v6130_v62, %v6130_v62  ;;  %v5038_v63 = vld [vmem:[#allocation13 + $0x98] sm:$0xff]  }
 0x8a1   : > { %1570 = vadd.xlane.f32.xlu0 %v1568_v2  ;;  %v1569_v4 = vmul.f32 %v6133_v1, %v6133_v1  ;;  %v5040_v2 = vld [vmem:[#allocation13 + $0xe0] sm:$0xff]  }
 0x8a5   : > { %1572 = vadd.xlane.f32.xlu0 %v1569_v4  ;;  %v5041_v4 = vld [vmem:[#allocation13 + $0x20] sm:$0xff]  }
 0x92e   : > { %v1571_v31 = vpop.xlane.xlu0 %1570 }
 0x92f   : > { %v1574_v32 = vmul.f32 0.0078125, %v1571_v31 }
 0x931   : > { %v1576_v33 = vadd.f32 1e-05, %v1574_v32 }
 0x932   : > { %v1573_v35 = vpop.xlane.xlu0 %1572 }
 0x933   : > { %5211 = vrsqrt.f32 %v1576_v33  ;;  %v1575_v36 = vmul.f32 0.0078125, %v1573_v35 }
 0x935   : > { %v1577_v37 = vadd.f32 1e-05, %v1575_v36 }
 0x937   : > { %5213 = vrsqrt.f32 %v1577_v37 }
 0x93d   : > { %v5212_v38 = vpop.eup %5211 }
 0x93e   : > { %v1580_v39 = vmul.f32 %v5212_v38, %v6130_v62  ;;  %v5037_v62 = vld [vmem:[#allocation13 + $0x18] sm:$0xff]  }
 0x940   : > { %v1588_v43 = vmul.f32 %v4265_v40, %v1580_v39 }
 0x941   : > { %v5214_v41 = vpop.eup %5213 }
 0x942   : > { %v1581_v42 = vmul.f32 %v5214_v41, %v6133_v1  ;;  %v1596_v46 = vadd.f32 %v4266_v44, %v1588_v43  ;;  %v5039_v1 = vld [vmem:[#allocation13 + $0x60] sm:$0xff]  }
 0x944   : > { %v1589_v45 = vmul.f32 %v4265_v40, %v1581_v42 }
 0x946   : > { %v1597_v47 = vadd.f32 %v4266_v44, %v1589_v45 }
 0x948   : > { %v1598_v48 = vpack.c.bf16 %v1597_v47, %v1596_v46 }
 0x94a   : > { %1846 = vmatmul.mubr.bf16.vlgmr.msra.gmra.mrb[28].mxu1 %v1598_v48  ;;  %1889 = vmatmul.mubr.bf16.vlgmr.msra.gmra.mrb[16].mxu0 %v1598_v48 }
 0x94b   : > { %4491 = vmatpush3.bf16.msra.mxu1 %v5025_v51  ;;  %4513 = vmatpush3.bf16.msra.mxu0 %v5026_v53 }
 0x94c   : > { %4492 = vmatprep.subr.bf16.mxu1 %v5027_v54  ;;  %4514 = vmatprep.subr.bf16.mxu0 %v5028_v55 }
 0x94f   : > { %4493 = vmatpush3.bf16.msra.mxu1 %v5029_v56  ;;  %4515 = vmatpush3.bf16.msra.mxu0 %v5030_v57 }
 0x950   : > { %4494 = vmatprep.subr.bf16.mxu1 %v5031_v58  ;;  %4516 = vmatprep.subr.bf16.mxu0 %v5032_v3 }
 0x953   : > { %4495 = vmatpush3.bf16.msra.mxu1 %v5033_v59  ;;  %4517 = vmatpush3.bf16.msra.mxu0 %v5034_v5 }
 0x954   : > { %4496 = vmatprep.subr.bf16.mxu1 %v5035_v60  ;;  %4518 = vmatprep.subr.bf16.mxu0 %v5036_v61 }
 0x957   : > { %4497 = vmatpush3.bf16.msra.mxu1 %v5037_v62  ;;  %4519 = vmatpush3.bf16.msra.mxu0 %v5038_v63 }
 0x958   : > { %4498 = vmatprep.subr.bf16.mxu1 %v5039_v1  ;;  %4520 = vmatprep.subr.bf16.mxu0 %v5040_v2 }
 0x95b   : > { %4499 = vmatpush3.bf16.msra.mxu1 %v5041_v4  ;;  %4521 = vmatpush3.bf16.msra.mxu0 %v5042_v6 }
 0x95c   : > { %4500 = vmatprep.subr.bf16.mxu1 %v5043_v7  ;;  %4522 = vmatprep.subr.bf16.mxu0 %v5044_v9 }
 0x95f   : > { %4501 = vmatpush3.bf16.msra.mxu1 %v5045_v10  ;;  %4523 = vmatpush3.bf16.msra.mxu0 %v5046_v11 }
 0x960   : > { %4502 = vmatprep.subr.bf16.mxu1 %v5047_v12  ;;  %4524 = vmatprep.subr.bf16.mxu0 %v5048_v13 }
 0x963   : > { %4503 = vmatpush3.bf16.msra.mxu1 %v5049_v14  ;;  %4525 = vmatpush3.bf16.msra.mxu0 %v5050_v15 }
 0x964   : > { %4504 = vmatprep.subr.bf16.mxu1 %v5051_v16  ;;  %4526 = vmatprep.subr.bf16.mxu0 %v5052_v17 }
 0x967   : > { %4505 = vmatpush3.bf16.msra.mxu1 %v5053_v18  ;;  %4527 = vmatpush3.bf16.msra.mxu0 %v5054_v19 }
 0x968   : > { %4700 = vmatprep.subr.bf16.mxu0 %v5591_v8 }
 0xa1d   : > { %v1847_v31 = vpop.f32.mrb[28].mxu1  ;;  %v1890_v32 = vpop.f32.mrb[16].mxu0 }
 0xa1e   : > { %v6162_v33 = vadd.f32 %v1847_v31, %v1636_v27  ;;  %v6164_v35 = vadd.f32 %v1890_v32, %v1644_v28  ;;  %v1849_v36 = vpop.f32.mrb[29].mxu1  ;;  %v1892_v37 = vpop.f32.mrb[17].mxu0 }
 0xa1f   : > { %v6166_v38 = vadd.f32 %v1849_v36, %v1640_v29  ;;  %v6168_v39 = vadd.f32 %v1892_v37, %v1648_v30  ;;  %v1851_v40 = vpop.f32.mrb[30].mxu1  ;;  %v1894_v41 = vpop.f32.mrb[18].mxu0 }
 0xa20   : > { %v1907_v42 = vmul.f32 %v6162_v33, %v6162_v33  ;;  %v1909_v43 = vmul.f32 %v6164_v35, %v6164_v35  ;;  %v1853_v44 = vpop.f32.mrb[31].mxu1  ;;  %v1896_v45 = vpop.f32.mrb[19].mxu0  ;;  %v1852_v48 = vadd.f32 %v1851_v40, %v1636_v27  ;;  %v1895_v49 = vadd.f32 %v1894_v41, %v1644_v28 }
 0xa21   : > { %v1908_v46 = vmul.f32 %v6166_v38, %v6166_v38  ;;  %v1910_v47 = vmul.f32 %v6168_v39, %v6168_v39  ;;  %v1854_v53 = vadd.f32 %v1853_v44, %v1640_v29  ;;  %v6180_v54 = vadd.f32 %v1896_v45, %v1648_v30 }
 0xa22   : > { %v1915_v50 = vmul.f32 %v1907_v42, %v6162_v33  ;;  %v1917_v51 = vmul.f32 %v1909_v43, %v6164_v35  ;;  %v1911_v57 = vmul.f32 %v1852_v48, %v1852_v48  ;;  %v1913_v59 = vmul.f32 %v1895_v49, %v1895_v49 }
 0xa23   : > { %v1916_v55 = vmul.f32 %v1908_v46, %v6166_v38  ;;  %v1918_v56 = vmul.f32 %v1910_v47, %v6168_v39  ;;  %v1912_v62 = vmul.f32 %v1854_v53, %v1854_v53  ;;  %v1914_v4 = vmul.f32 %v6180_v54, %v6180_v54 }
 0xa24   : > { %v1923_v58 = vmul.f32 0.044715, %v1915_v50  ;;  %v1925_v3 = vmul.f32 0.044715, %v1917_v51  ;;  %v1919_v61 = vmul.f32 %v1911_v57, %v1852_v48  ;;  %v1921_v2 = vmul.f32 %v1913_v59, %v1895_v49 }
 0xa25   : > { %v1924_v5 = vmul.f32 0.044715, %v1916_v55  ;;  %v1926_v60 = vmul.f32 0.044715, %v1918_v56  ;;  %v1920_v10 = vmul.f32 %v1912_v62, %v1854_v53  ;;  %v1922_v14 = vmul.f32 %v1914_v4, %v6180_v54 }
 0xa26   : > { %v1931_v63 = vadd.f32 %v1923_v58, %v6162_v33  ;;  %v1933_v1 = vadd.f32 %v1925_v3, %v6164_v35  ;;  %v1927_v9 = vmul.f32 0.044715, %v1919_v61  ;;  %v1929_v13 = vmul.f32 0.044715, %v1921_v2 }
 0xa27   : > { %v1932_v6 = vadd.f32 %v1924_v5, %v6166_v38  ;;  %v1934_v7 = vadd.f32 %v1926_v60, %v6168_v39  ;;  %v1928_v18 = vmul.f32 0.044715, %v1920_v10  ;;  %v1930_v20 = vmul.f32 0.044715, %v1922_v14  ;;  %v4299_v10 = vld [vmem:[%s6512_s10] ss:$0 sm:$0xff] }
 0xa28   : > { %v1939_v11 = vmul.f32 0.7978846, %v1931_v63  ;;  %v1941_v12 = vmul.f32 0.7978846, %v1933_v1  ;;  %v1935_v17 = vadd.f32 %v1927_v9, %v1852_v48  ;;  %v1937_v19 = vadd.f32 %v1929_v13, %v1895_v49 }
 0xa29   : > { %v1940_v15 = vmul.f32 0.7978846, %v1932_v6  ;;  %v1942_v16 = vmul.f32 0.7978846, %v1934_v7  ;;  %v1936_v27 = vadd.f32 %v1928_v18, %v1854_v53  ;;  %v1938_v29 = vadd.f32 %v1930_v20, %v6180_v54 }
 0xa2a   : > { %5215 = vtanh.f32 %v1939_v11  ;;  %v1943_v24 = vmul.f32 0.7978846, %v1935_v17  ;;  %v1945_v28 = vmul.f32 0.7978846, %v1937_v19  ;;  %v1899_v43 = vmul.f32 0.5, %v6162_v33 }
 0xa2b   : > { %5217 = vtanh.f32 %v1941_v12  ;;  %v1944_v30 = vmul.f32 0.7978846, %v1936_v27  ;;  %v1946_v31 = vmul.f32 0.7978846, %v1938_v29  ;;  %v1901_v44 = vmul.f32 0.5, %v6164_v35 }
 0xa2c   : > { %5219 = vtanh.f32 %v1940_v15  ;;  %v1903_v47 = vmul.f32 0.5, %v1852_v48  ;;  %v1905_v50 = vmul.f32 0.5, %v1895_v49  ;;  %v1900_v57 = vmul.f32 0.5, %v6166_v38 }
 0xa2d   : > { %5221 = vtanh.f32 %v1942_v16  ;;  %v1904_v58 = vmul.f32 0.5, %v1854_v53  ;;  %v1902_v61 = vmul.f32 0.5, %v6168_v39  ;;  %v1906_v35 = vmul.f32 0.5, %v6180_v54 }
 0xa2e   : > { %5223 = vtanh.f32 %v1943_v24 }
 0xa2f   : > { %5225 = vtanh.f32 %v1945_v28 }
 0xa30   : > { %5227 = vtanh.f32 %v1944_v30 }
 0xa31   : > { %5229 = vtanh.f32 %v1946_v31 }
 0xa34   : > { %v5216_v32 = vpop.eup %5215 }
 0xa35   : > { %v5218_v36 = vpop.eup %5217  ;;  %v1955_v41 = vadd.f32 1.0, %v5216_v32  ;;  %v5289_v32 = vld [vmem:[%s5971_s25] sm:$0xff] }
 0xa36   : > { %v5220_v37 = vpop.eup %5219  ;;  %v1957_v45 = vadd.f32 1.0, %v5218_v36 }
 0xa37   : > { %v5222_v40 = vpop.eup %5221  ;;  %v1956_v51 = vadd.f32 1.0, %v5220_v37  ;;  %v1963_v62 = vmul.f32 %v1955_v41, %v1899_v43  ;;  %v5290_v37 = vld [vmem:[%s5971_s25 + $0x8] sm:$0xff] }
 0xa38   : > { %v5224_v42 = vpop.eup %5223  ;;  %v1958_v3 = vadd.f32 1.0, %v5222_v40  ;;  %v1965_v1 = vmul.f32 %v1957_v45, %v1901_v44  ;;  %v5055_v41 = vld [vmem:[#allocation7 + $0xc0] ss:$12 sps:$4 sm:$0xff]   ;;  %v5058_v43 = vld [vmem:[#allocation7 + $0xc8] ss:$12 sps:$4 sm:$0xff]  }
 0xa39   : > { %v5226_v46 = vpop.eup %5225  ;;  %v1959_v55 = vadd.f32 1.0, %v5224_v42  ;;  %v1964_v49 = vmul.f32 %v1956_v51, %v1900_v57  ;;  %v5057_v42 = vld [vmem:[#allocation7 + $0xc4] ss:$12 sps:$4 sm:$0xff]   ;;  %v5061_v44 = vld [vmem:[#allocation7 + $0xdc] ss:$12 sps:$4 sm:$0xff]  }
 0xa3a   : > { %v5228_v56 = vpop.eup %5227  ;;  %v1961_v59 = vadd.f32 1.0, %v5226_v46  ;;  %v1966_v6 = vmul.f32 %v1958_v3, %v1902_v61  ;;  %2528 = vmatprep.subr.bf16.mxu1 %v5057_v42  ;;  %v5059_v45 = vld [vmem:[#allocation7 + $0xd8] ss:$12 sps:$4 sm:$0xff]   ;;  %v5063_v3 = vld [vmem:[#allocation7 + $0xf0] ss:$12 sps:$4 sm:$0xff]  }
 0xa3b   : > { %v5230_v5 = vpop.eup %5229  ;;  %v1960_v60 = vadd.f32 1.0, %v5228_v56  ;;  %v1967_v33 = vmul.f32 %v1959_v55, %v1903_v47  ;;  %v5070_v61 = vld [vmem:[#allocation7 + $0x110] ss:$12 sps:$4 sm:$0xff]  }
 0xa3c   : > { %v1962_v63 = vadd.f32 1.0, %v5230_v5  ;;  %v1969_v48 = vmul.f32 %v1961_v59, %v1905_v50  ;;  %v5066_v59 = vld [vmem:[#allocation7 + $0xf8] ss:$12 sps:$4 sm:$0xff]  }
 0xa3d   : > { %v1968_v2 = vmul.f32 %v1960_v60, %v1904_v58  ;;  %v1971_v4 = vpack.c.bf16 %v1967_v33, %v1963_v62  ;;  %v5065_v58 = vld [vmem:[#allocation7 + $0xf4] ss:$12 sps:$4 sm:$0xff]   ;;  %v5069_v5 = vld [vmem:[#allocation7 + $0x10c] ss:$12 sps:$4 sm:$0xff]   ;;  %v5073_v62 = vld [vmem:[#allocation7 + $0x124] ss:$12 sps:$4 sm:$0xff]  }
 0xa3e   : > { %v1970_v7 = vmul.f32 %v1962_v63, %v1906_v35  ;;  %v1973_v38 = vpack.c.bf16 %v1969_v48, %v1965_v1  ;;  %v5067_v60 = vld [vmem:[#allocation7 + $0x108] ss:$12 sps:$4 sm:$0xff]   ;;  %v5071_v33 = vld [vmem:[#allocation7 + $0x120] ss:$12 sps:$4 sm:$0xff]   ;;  %v5075_v1 = vld [vmem:[#allocation7 + $0x138] ss:$12 sps:$4 sm:$0xff]  }
 0xa3f   : > { %v1972_v53 = vpack.c.bf16 %v1968_v2, %v1964_v49  ;;  %v5074_v35 = vld [vmem:[#allocation7 + $0x128] ss:$12 sps:$4 sm:$0xff]   ;;  %v5078_v48 = vld [vmem:[#allocation7 + $0x140] ss:$12 sps:$4 sm:$0xff]   ;;  %v5079_v2 = vld [vmem:[#allocation7 + $0x150] ss:$12 sps:$4 sm:$0xff]  }
 0xa40   : > { %v1974_v9 = vpack.c.bf16 %v1970_v7, %v1966_v6  ;;  %v5077_v63 = vld [vmem:[#allocation7 + $0x13c] ss:$12 sps:$4 sm:$0xff]   ;;  %v5081_v49 = vld [vmem:[#allocation7 + $0x154] ss:$12 sps:$4 sm:$0xff]   ;;  %v5085_v6 = vld [vmem:[#allocation7 + $0x16c] ss:$12 sps:$4 sm:$0xff]  }
 0xa41   : > { %2270 = vmatprep.mubr.bf16.mxu1 %v1972_v53  ;;  %v5083_v7 = vld [vmem:[#allocation7 + $0x168] ss:$12 sps:$4 sm:$0xff]  }
 0xa42   : > { %2311 = vmatprep.mubr.bf16.mxu0 %v1974_v9  ;;  %2271 = vmatmul.mubr.bf16.vlgmr.msra.gmra.mrb[32].mxu1 %v1971_v4  ;;  %v5082_v4 = vld [vmem:[#allocation7 + $0x158] ss:$12 sps:$4 sm:$0xff]  }
 0xa43   : > { %2312 = vmatmul.mubr.bf16.vlgmr.msra.gmra.mrb[20].mxu0 %v1973_v38  ;;  %2560 = vmatprep.mubr.bf16.mxu1 %v5592_v34  ;;  %v5086_v38 = vld [vmem:[#allocation7 + $0x170] ss:$12 sps:$4 sm:$0xff]  }
 0xa44   : > { %4716 = vmatprep.mubr.msk.bf16.mxu0 %vm5593_vm0, %v5591_v8  ;;  %4701 = vmatpush3.bf16.msra.mxu0 %v5058_v43 }
 0xa45   : > { %2529 = vmatpush1.bf16.msra.mxu1 %v5055_v41  ;;  %4702 = vmatprep.subr.bf16.mxu0 %v5591_v8 }
 0xa46   : > { %2530 = vmatprep.subr.bf16.mxu1 %v5061_v44 }
 0xa49   : > { %2531 = vmatpush1.bf16.msra.mxu1 %v5059_v45 }
 0xa4a   : > { %2532 = vmatprep.subr.bf16.mxu1 %v5065_v58 }
 0xa4d   : > { %2533 = vmatpush1.bf16.msra.mxu1 %v5063_v3 }
 0xa4e   : > { %2534 = vmatprep.subr.bf16.mxu1 %v5069_v5 }
 0xa51   : > { %2535 = vmatpush1.bf16.msra.mxu1 %v5067_v60 }
 0xa52   : > { %2536 = vmatprep.subr.bf16.mxu1 %v5073_v62 }
 0xa55   : > { %2537 = vmatpush1.bf16.msra.mxu1 %v5071_v33 }
 0xa56   : > { %2538 = vmatprep.subr.bf16.mxu1 %v5077_v63 }
 0xa59   : > { %2539 = vmatpush1.bf16.msra.mxu1 %v5075_v1 }
 0xa5a   : > { %2540 = vmatprep.subr.bf16.mxu1 %v5081_v49 }
 0xa5d   : > { %2541 = vmatpush1.bf16.msra.mxu1 %v5079_v2 }
 0xa5e   : > { %2542 = vmatprep.subr.bf16.mxu1 %v5085_v6 }
 0xa61   : > { %2543 = vmatpush1.bf16.msra.mxu1 %v5083_v7 }
 0xa62   : > { %4720 = vmatprep.subr.bf16.mxu1 %v5591_v8 }
 0xb15   : > { %v4506_v39 = vpop.f32.mrb[32].mxu1 }
 0xb16   : > { %v4528_v54 = vpop.f32.mrb[20].mxu0  ;;  %v4507_v11 = vpop.f32.mrb[33].mxu1 }
 0xb17   : > { %v4508_v12 = vadd.f32 %v4507_v11, %v4506_v39  ;;  %v4529_v13 = vpop.f32.mrb[21].mxu0  ;;  %v4509_v14 = vpop.f32.mrb[34].mxu1 }
 0xb18   : > { %v4530_v15 = vadd.f32 %v4529_v13, %v4528_v54  ;;  %v4531_v16 = vpop.f32.mrb[22].mxu0  ;;  %v4510_v17 = vpop.f32.mrb[35].mxu1  ;;  %v4334_v13 = vld [vmem:[%s6449_s2 + $0x1] ss:$0 sm:$0xff] }
 0xb19   : > { %v2273_v18 = vadd.f32 %v4508_v12, %v4299_v10  ;;  %v4511_v19 = vadd.f32 %v4510_v17, %v4509_v14  ;;  %v4532_v20 = vpop.f32.mrb[23].mxu0 }
 0xb1a   : > { %v4533_v24 = vadd.f32 %v4532_v20, %v4531_v16 }
 0xb1b   : > { %v2314_v27 = vadd.f32 %v4530_v15, %v2273_v18  ;;  %v2276_v28 = vadd.f32 %v4511_v19, %v4299_v10  ;;  %v4335_v18 = vld [vmem:[%s6450_s3 + $0x1] ss:$0 sm:$0xff] }
 0xb1d   : > { %v2320_v29 = vadd.f32 %v2314_v27, %v6122_v0  ;;  %v2317_v30 = vadd.f32 %v4533_v24, %v2276_v28  ;;  %v5062_v0 = vld [vmem:[#allocation7 + $0xe0] ss:$12 sps:$4 sm:$0xff]  }
 0xb1e   : > { %4703 = vmatpush3.bf16.msra.mxu0 %v5062_v0 }
 0xb1f   : > { %v2321_v31 = vadd.f32 %v2317_v30, %v6125_v52  ;;  %v6206_v36 = vadd.f32 %v5289_v32, %v2320_v29  ;;  %4704 = vmatprep.subr.bf16.mxu0 %v5591_v8 }
 0xb21   : > { %2328 = vadd.xlane.f32.xlu0 %v6206_v36  ;;  %v6210_v40 = vadd.f32 %v5290_v37, %v2321_v31 }
 0xb22   : > { %4705 = vmatpush3.bf16.msra.mxu0 %v5066_v59 }
 0xb23   : > { %2330 = vadd.xlane.f32.xlu1 %v6210_v40  ;;  %4706 = vmatprep.subr.bf16.mxu0 %v5591_v8 }
 0xb26   : > { %4707 = vmatpush3.bf16.msra.mxu0 %v5070_v61 }
 0xb27   : > { %4708 = vmatprep.subr.bf16.mxu0 %v5591_v8 }
 0xb2a   : > { %4709 = vmatpush3.bf16.msra.mxu0 %v5074_v35 }
 0xb2b   : > { %4710 = vmatprep.subr.bf16.mxu0 %v5591_v8 }
 0xb2e   : > { %4711 = vmatpush3.bf16.msra.mxu0 %v5078_v48 }
 0xb2f   : > { %4712 = vmatprep.subr.bf16.mxu0 %v5591_v8 }
 0xb32   : > { %4713 = vmatpush3.bf16.msra.mxu0 %v5082_v4 }
 0xb33   : > { %4714 = vmatprep.subr.bf16.mxu0 %v5591_v8 }
 0xb36   : > { %4715 = vmatpush3.bf16.msra.mxu0 %v5086_v38 }
 0xb37   : > { %4744 = vmatprep.subr.bf16.mxu0 %v5591_v8 }
 0xbae   : > { %v2329_v52 = vpop.xlane.xlu0 %2328 }
 0xbaf   : > { %v2332_v46 = vmul.f32 0.0078125, %v2329_v52 }
 0xbb0   : > { %v2331_v47 = vpop.xlane.xlu1 %2330 }
 0xbb1   : > { %v2334_v50 = vsub.f32 %v6206_v36, %v2332_v46  ;;  %v2333_v51 = vmul.f32 0.0078125, %v2331_v47 }
 0xbb3   : > { %v2335_v55 = vsub.f32 %v6210_v40, %v2333_v51  ;;  %v2336_v56 = vmul.f32 %v2334_v50, %v2334_v50 }
 0xbb5   : > { %2338 = vadd.xlane.f32.xlu0 %v2336_v56  ;;  %v2337_v57 = vmul.f32 %v2335_v55, %v2335_v55 }
 0xbb7   : > { %2340 = vadd.xlane.f32.xlu1 %v2337_v57 }
 0xc42   : > { %v2339_v53 = vpop.xlane.xlu0 %2338 }
 0xc43   : > { %v2342_v9 = vmul.f32 0.0078125, %v2339_v53 }
 0xc44   : > { %v2341_v39 = vpop.xlane.xlu1 %2340 }
 0xc45   : > { %v2344_v54 = vadd.f32 1e-05, %v2342_v9  ;;  %v2343_v10 = vmul.f32 0.0078125, %v2341_v39 }
 0xc47   : > { %5231 = vrsqrt.f32 %v2344_v54  ;;  %v2345_v11 = vadd.f32 1e-05, %v2343_v10 }
 0xc49   : > { %5233 = vrsqrt.f32 %v2345_v11 }
 0xc51   : > { %v5232_v12 = vpop.eup %5231 }
 0xc52   : > { %v2348_v14 = vmul.f32 %v5232_v12, %v2334_v50 }
 0xc53   : > { %v5234_v15 = vpop.eup %5233 }
 0xc54   : > { %v2349_v16 = vmul.f32 %v5234_v15, %v2335_v55  ;;  %v2356_v17 = vmul.f32 %v4334_v13, %v2348_v14 }
 0xc56   : > { %v2357_v19 = vmul.f32 %v4334_v13, %v2349_v16  ;;  %v2364_v20 = vadd.f32 %v4335_v18, %v2356_v17 }
 0xc58   : > { %v2365_v24 = vadd.f32 %v4335_v18, %v2357_v19 }
 0xc5a   : > { %v2366_v27 = vpack.c.bf16 %v2365_v24, %v2364_v20 }
 0xc5c   : > { %2561 = vmatmul.mubr.bf16.vlgmr.msra.gmra.mrb[36].mxu1 %v2366_v27  ;;  %4717 = vmatmul.mubr.bf16.vlgmr.msra.gmra.mrb[24].mxu0 %v2366_v27 }
 0xc5d   : > { %4722 = vmatprep.mubr.msk.bf16.mxu1 %vm5593_vm0, %v5591_v8  ;;  %4746 = vmatprep.mubr.msk.bf16.mxu0 %vm5593_vm0, %v5591_v8 }
 0xd2f   : > { %v2562_v28 = vpop.f32.mrb[36].mxu1  ;;  %v2605_v29 = vpop.f32.mrb[24].mxu0 }
 0xd30   : > { %v2564_v30 = vpop.f32.mrb[37].mxu1  ;;  %v4718_v31 = vpop.f32.mrb[25].mxu0 }
 0xd31   : > { %v2566_v32 = vpop.f32.mrb[38].mxu1  ;;  %v2608_v37 = vpop.f32.mrb[26].mxu0 }
 0xd32   : > { %v2612_v41 = vpack.c.bf16 %v2566_v32, %v2562_v28  ;;  %v6234_v42 = vpack.c.bf16 %v2608_v37, %v2605_v29  ;;  %v2568_v43 = vpop.f32.mrb[39].mxu1  ;;  %v4719_v44 = vpop.f32.mrb[27].mxu0 }
 0xd33   : > { %v2613_v0 = vpack.c.bf16 %v2568_v43, %v2564_v30 }
 0xd34   : > { %4745 = vmatpush3.bf16.msra.mxu0 %v6234_v42  ;;  %2616 = vrot.lane.b32.xlu1 %v2612_v41, %s5594_s30 }
 0xd35   : > { %2623 = vrot.lane.b32.xlu0 %v2613_v0, %s5594_s30  ;;  %v2643_v45 = vsel %vm945_vm1, %v2613_v0, 0  ;;  %4756 = vmatprep.subr.bf16.mxu0 %v5591_v8 }
 0xd36   : > { %4721 = vmatpush3.bf16.xpose.msra.mxu1 %v2643_v45 }
 0xd37   : > { %4726 = vmatprep.subr.bf16.mxu1 %v5591_v8 }
 0xd38   : > { %2625 = vrot.lane.b32.xlu1 %v2613_v0, %s5595_s26 }
 0xd39   : > { %2627 = vrot.lane.b32.xlu0 %v2613_v0, %s5596_s29 }
 0xd3c   : > { %2618 = vrot.lane.b32.xlu1 %v2612_v41, %s5595_s26 }
 0xd3d   : > { %4723 = vmatmul.mubr.msk.bf16.vlgmr.msra.gmra.mrb[40].mxu1 %vm945_vm1, %v2612_v41 }
 0xd3e   : > { %4728 = vmatprep.mubr.msk.bf16.mxu1 %vm5593_vm0, %v5591_v8 }
 0xd40   : > { %2620 = vrot.lane.b32.xlu1 %v2612_v41, %s5596_s29 }
 0xda6   : > { %v2617_v52 = vpop.permute.xlu1 %2616 }
 0xda7   : > { %v2624_v46 = vpop.permute.xlu0 %2623 }
 0xda8   : > { %v2690_v47 = vsel %vm945_vm1, %v2624_v46, 0 }
 0xda9   : > { %4727 = vmatpush3.bf16.xpose.msra.mxu1 %v2690_v47 }
 0xdaa   : > { %4732 = vmatprep.subr.bf16.mxu1 %v5591_v8  ;;  %v2626_v50 = vpop.permute.xlu1 %2625 }
 0xdab   : > { %v2737_v51 = vsel %vm945_vm1, %v2626_v50, 0  ;;  %v2628_v55 = vpop.permute.xlu0 %2627 }
 0xdac   : > { %v2784_v57 = vsel %vm945_vm1, %v2628_v55, 0 }
 0xdae   : > { %v2619_v56 = vpop.permute.xlu1 %2618 }
 0xdb0   : > { %4729 = vmatmul.mubr.msk.bf16.vlgmr.msra.gmra.mrb[44].mxu1 %vm945_vm1, %v2617_v52 }
 0xdb1   : > { %4733 = vmatpush3.bf16.xpose.msra.mxu1 %v2737_v51  ;;  %4734 = vmatprep.mubr.msk.bf16.mxu1 %vm5593_vm0, %v5591_v8 }
 0xdb2   : > { %4738 = vmatprep.subr.bf16.mxu1 %v5591_v8  ;;  %v2621_v58 = vpop.permute.xlu1 %2620 }
 0xdb8   : > { %4735 = vmatmul.mubr.msk.bf16.vlgmr.msra.gmra.mrb[48].mxu1 %vm945_vm1, %v2619_v56 }
 0xdb9   : > { %4739 = vmatpush3.bf16.xpose.msra.mxu1 %v2784_v57  ;;  %4740 = vmatprep.mubr.msk.bf16.mxu1 %vm5593_vm0, %v5591_v8 }
 0xdba   : > { %4750 = vmatprep.subr.bf16.mxu1 %v5591_v8 }
 0xdc0   : > { %4741 = vmatmul.mubr.msk.bf16.vlgmr.msra.gmra.mrb[52].mxu1 %vm945_vm1, %v2621_v58 }
 0xdc1   : > { %4752 = vmatprep.mubr.msk.bf16.mxu1 %vm5593_vm0, %v5591_v8 }
 0xe10   : > { %v2679_v3 = vpop.f32.mrb[40].mxu1 }
 0xe11   : > { %v2827_v59 = vmul.f32 0.17677669, %v2679_v3  ;;  %v4724_v5 = vpop.f32.mrb[41].mxu1 }
 0xe12   : > { %v2682_v60 = vpop.f32.mrb[42].mxu1 }
 0xe13   : > { %v2828_v61 = vmul.f32 0.17677669, %v2682_v60  ;;  %v4725_v62 = vpop.f32.mrb[43].mxu1  ;;  %v2835_v33 = vsel %vm1142_vm2, %v2827_v59, -inf }
 0xe14   : > { %2836 = vmax.xlane.f32.xlu0 %v2835_v33 }
 0xe15   : > { %v2838_v35 = vsel %vm1142_vm2, %v2828_v61, -inf }
 0xe16   : > { %2839 = vmax.xlane.f32.xlu1 %v2838_v35 }
 0xe83   : > { %v2726_v63 = vpop.f32.mrb[44].mxu1 }
 0xe84   : > { %v2829_v1 = vmul.f32 0.17677669, %v2726_v63  ;;  %v4730_v48 = vpop.f32.mrb[45].mxu1 }
 0xe85   : > { %v2729_v49 = vpop.f32.mrb[46].mxu1 }
 0xe86   : > { %v2830_v2 = vmul.f32 0.17677669, %v2729_v49  ;;  %v4731_v4 = vpop.f32.mrb[47].mxu1  ;;  %v2841_v6 = vsel %vm1142_vm2, %v2829_v1, -inf }
 0xe87   : > { %2842 = vmax.xlane.f32.xlu0 %v2841_v6 }
 0xe88   : > { %v2844_v7 = vsel %vm1142_vm2, %v2830_v2, -inf }
 0xe8b   : > { %2845 = vmax.xlane.f32.xlu0 %v2844_v7  ;;  %v2773_v38 = vpop.f32.mrb[48].mxu1 }
 0xe8c   : > { %v2831_v53 = vmul.f32 0.17677669, %v2773_v38  ;;  %v4736_v9 = vpop.f32.mrb[49].mxu1 }
 0xe8d   : > { %v2776_v39 = vpop.f32.mrb[50].mxu1 }
 0xe8e   : > { %v2832_v54 = vmul.f32 0.17677669, %v2776_v39  ;;  %v4737_v10 = vpop.f32.mrb[51].mxu1  ;;  %v2847_v11 = vsel %vm1142_vm2, %v2831_v53, -inf }
 0xe8f   : > { %2848 = vmax.xlane.f32.xlu0 %v2847_v11 }
 0xe90   : > { %v2850_v12 = vsel %vm1142_vm2, %v2832_v54, -inf }
 0xe91   : > { %2851 = vmax.xlane.f32.xlu1 %v2850_v12 }
 0xe93   : > { %v2820_v13 = vpop.f32.mrb[52].mxu1 }
 0xe94   : > { %v2833_v14 = vmul.f32 0.17677669, %v2820_v13  ;;  %v4742_v15 = vpop.f32.mrb[53].mxu1 }
 0xe95   : > { %v2823_v16 = vpop.f32.mrb[54].mxu1 }
 0xe96   : > { %v6270_v17 = vmul.f32 0.17677669, %v2823_v16  ;;  %v4743_v18 = vpop.f32.mrb[55].mxu1  ;;  %v2853_v19 = vsel %vm1142_vm2, %v2833_v14, -inf }
 0xe97   : > { %2854 = vmax.xlane.f32.xlu0 %v2853_v19 }
 0xe98   : > { %v2856_v20 = vsel %vm1142_vm2, %v6270_v17, -inf }
 0xe99   : > { %2857 = vmax.xlane.f32.xlu1 %v2856_v20 }
 0xea1   : > { %v2837_v24 = vpop.xlane.xlu0 %2836 }
 0xea2   : > { %v2859_v27 = vsub.f32 %v2827_v59, %v2837_v24 }
 0xea3   : > { %v2840_v28 = vpop.xlane.xlu1 %2839 }
 0xea4   : > { %v2867_v29 = vmul.f32 1.442695, %v2859_v27  ;;  %v2860_v30 = vsub.f32 %v2828_v61, %v2840_v28 }
 0xea6   : > { %5235 = vpow2.f32 %v2867_v29  ;;  %v2869_v31 = vmul.f32 1.442695, %v2860_v30 }
 0xea8   : > { %5237 = vpow2.f32 %v2869_v31 }
 0xeb0   : > { %v5236_v32 = vpop.eup %5235 }
 0xeb1   : > { %v2883_v37 = vsel %vm1142_vm2, %v5236_v32, 0.0 }
 0xeb2   : > { %v5238_v41 = vpop.eup %5237  ;;  %2884 = vadd.xlane.f32.xlu0 %v2883_v37 }
 0xeb3   : > { %v2886_v43 = vsel %vm1142_vm2, %v5238_v41, 0.0 }
 0xeb4   : > { %2887 = vadd.xlane.f32.xlu1 %v2886_v43 }
 0xf14   : > { %v2843_v44 = vpop.xlane.xlu0 %2842 }
 0xf15   : > { %v2861_v0 = vsub.f32 %v2829_v1, %v2843_v44 }
 0xf17   : > { %v2871_v45 = vmul.f32 1.442695, %v2861_v0 }
 0xf18   : > { %v2846_v52 = vpop.xlane.xlu0 %2845 }
 0xf19   : > { %5239 = vpow2.f32 %v2871_v45  ;;  %v2862_v46 = vsub.f32 %v2830_v2, %v2846_v52 }
 0xf1b   : > { %v2873_v47 = vmul.f32 1.442695, %v2862_v46 }
 0xf1c   : > { %v2849_v50 = vpop.xlane.xlu0 %2848 }
 0xf1d   : > { %5241 = vpow2.f32 %v2873_v47  ;;  %v2863_v51 = vsub.f32 %v2831_v53, %v2849_v50 }
 0xf1e   : > { %v2852_v55 = vpop.xlane.xlu1 %2851 }
 0xf1f   : > { %v2875_v56 = vmul.f32 1.442695, %v2863_v51  ;;  %v2864_v57 = vsub.f32 %v2832_v54, %v2852_v55 }
 0xf21   : > { %5243 = vpow2.f32 %v2875_v56  ;;  %v2877_v58 = vmul.f32 1.442695, %v2864_v57  ;;  %v5087_v57 = vld [vmem:[#allocation8 + $0x40] sm:$0xff]  }
 0xf23   : > { %v5240_v3 = vpop.eup %5239  ;;  %5245 = vpow2.f32 %v2877_v58  ;;  %v5088_v58 = vld [vmem:[#allocation8 + $0x48] sm:$0xff]  }
 0xf24   : > { %v2855_v59 = vpop.xlane.xlu0 %2854  ;;  %v2889_v5 = vsel %vm1142_vm2, %v5240_v3, 0.0 }
 0xf25   : > { %v2865_v60 = vsub.f32 %v2833_v14, %v2855_v59  ;;  %2890 = vadd.xlane.f32.xlu0 %v2889_v5 }
 0xf26   : > { %v2858_v4 = vpop.xlane.xlu1 %2857 }
 0xf27   : > { %v5242_v61 = vpop.eup %5241  ;;  %v2879_v62 = vmul.f32 1.442695, %v2865_v60  ;;  %v2866_v54 = vsub.f32 %v6270_v17, %v2858_v4  ;;  %v5092_v4 = vld [vmem:[#allocation8 + $0x68] sm:$0xff]  }
 0xf28   : > { %v2892_v33 = vsel %vm1142_vm2, %v5242_v61, 0.0 }
 0xf29   : > { %5247 = vpow2.f32 %v2879_v62  ;;  %2893 = vadd.xlane.f32.xlu1 %v2892_v33  ;;  %v2881_v11 = vmul.f32 1.442695, %v2866_v54 }
 0xf2b   : > { %v5244_v35 = vpop.eup %5243 }
 0xf2c   : > { %v2895_v63 = vsel %vm1142_vm2, %v5244_v35, 0.0 }
 0xf2d   : > { %v5246_v1 = vpop.eup %5245  ;;  %2896 = vadd.xlane.f32.xlu0 %v2895_v63 }
 0xf2e   : > { %v2898_v48 = vsel %vm1142_vm2, %v5246_v1, 0.0 }
 0xf2f   : > { %2899 = vadd.xlane.f32.xlu1 %v2898_v48 }
 0xf33   : > { %v5248_v49 = vpop.eup %5247 }
 0xf34   : > { %v2901_v2 = vsel %vm1142_vm2, %v5248_v49, 0.0 }
 0xf35   : > { %2902 = vadd.xlane.f32.xlu0 %v2901_v2  ;;  %v5091_v2 = vld [vmem:[#allocation8 + $0x60] sm:$0xff]  }
 0xf3f   : > { %v2885_v6 = vpop.xlane.xlu0 %2884 }
 0xf40   : > { %5249 = vrcp.f32 %v2885_v6  ;;  %2633 = vrot.lane.b32.xlu1 %v6234_v42, %s5595_s26  ;;  %v5093_v6 = vld [vmem:[#allocation8 + $0x70] sm:$0xff]  }
 0xf41   : > { %v2888_v7 = vpop.xlane.xlu1 %2887 }
 0xf42   : > { %5251 = vrcp.f32 %v2888_v7  ;;  %v5094_v7 = vld [vmem:[#allocation8 + $0x78] sm:$0xff]  }
 0xf43   : > { %5253 = vpow2.f32 %v2881_v11 }
 0xf4a   : > { %v5250_v38 = vpop.eup %5249 }
 0xf4b   : > { %2630 = vrot.lane.b32.xlu0 %v6234_v42, %s5594_s30  ;;  %v2915_v9 = vmul.f32 %v5250_v38, %v5236_v32 }
 0xf4c   : > { %v5252_v53 = vpop.eup %5251 }
 0xf4d   : > { %v2916_v39 = vmul.f32 %v5252_v53, %v5238_v41  ;;  %v5254_v12 = vpop.eup %5253 }
 0xf4e   : > { %v2904_v13 = vsel %vm1142_vm2, %v5254_v12, 0.0 }
 0xf4f   : > { %v2923_v10 = vpack.c.bf16 %v2916_v39, %v2915_v9 }
 0xf51   : > { %4747 = vmatmul.mubr.msk.bf16.vlgmr.msra.gmra.mrb[28].mxu0 %vm1142_vm2, %v2923_v10 }
 0xf52   : > { %4758 = vmatprep.mubr.msk.bf16.mxu0 %vm5593_vm0, %v5591_v8 }
 0xf64   : > { %2905 = vadd.xlane.f32.xlu1 %v2904_v13 }
 0xf75   : > { %2636 = vrot.lane.b32.xlu1 %v6234_v42, %s5596_s29 }
 0xfb2   : > { %v2891_v14 = vpop.xlane.xlu0 %2890 }
 0xfb6   : > { %v2894_v15 = vpop.xlane.xlu1 %2893 }
 0xfb7   : > { %5255 = vrcp.f32 %v2894_v15 }
 0xfb8   : > { %5257 = vrcp.f32 %v2891_v14 }
 0xfba   : > { %v2897_v16 = vpop.xlane.xlu0 %2896 }
 0xfbb   : > { %5259 = vrcp.f32 %v2897_v16 }
 0xfbc   : > { %v2900_v17 = vpop.xlane.xlu1 %2899 }
 0xfbd   : > { %5261 = vrcp.f32 %v2900_v17 }
 0xfc0   : > { %v2634_v18 = vpop.permute.xlu1 %2633 }
 0xfc1   : > { %v5256_v19 = vpop.eup %5255  ;;  %4757 = vmatpush3.bf16.msra.mxu0 %v2634_v18 }
 0xfc2   : > { %v2903_v20 = vpop.xlane.xlu0 %2902  ;;  %4768 = vmatprep.subr.bf16.mxu0 %v5591_v8  ;;  %v5258_v24 = vpop.eup %5257  ;;  %v2918_v27 = vmul.f32 %v5256_v19, %v5242_v61  ;;  %v5089_v61 = vld [vmem:[#allocation8 + $0x50] sm:$0xff]  }
 0xfc3   : > { %v2917_v29 = vmul.f32 %v5258_v24, %v5240_v3  ;;  %5263 = vrcp.f32 %v2903_v20 }
 0xfc5   : > { %v5260_v28 = vpop.eup %5259  ;;  %v2924_v37 = vpack.c.bf16 %v2918_v27, %v2917_v29 }
 0xfc6   : > { %v2631_v30 = vpop.permute.xlu0 %2630  ;;  %v2919_v31 = vmul.f32 %v5260_v28, %v5244_v35 }
 0xfc7   : > { %v5262_v42 = vpop.eup %5261  ;;  %4751 = vmatpush3.bf16.msra.mxu1 %v2631_v30  ;;  %v4369_v30 = vld [vmem:[%s6453_s6 + $0x1] ss:$0 sm:$0xff] }
 0xfc8   : > { %v2920_v32 = vmul.f32 %v5262_v42, %v5246_v1  ;;  %4762 = vmatprep.subr.bf16.mxu1 %v5591_v8 }
 0xfca   : > { %4753 = vmatmul.mubr.msk.bf16.vlgmr.msra.gmra.mrb[56].mxu1 %vm1142_vm2, %v2924_v37  ;;  %v2925_v41 = vpack.c.bf16 %v2920_v32, %v2919_v31 }
 0xfcb   : > { %4764 = vmatprep.mubr.msk.bf16.mxu1 %vm5593_vm0, %v5591_v8 }
 0xfcc   : > { %4759 = vmatmul.mubr.msk.bf16.vlgmr.msra.gmra.mrb[32].mxu0 %vm1142_vm2, %v2925_v41 }
 0xfcd   : > { %4784 = vmatprep.mubr.msk.bf16.mxu0 %vm5593_vm0, %v5591_v8  ;;  %v5264_v0 = vpop.eup %5263  ;;  %4769 = vmatpush3.bf16.msra.mxu0 %v5087_v57 }
 0xfce   : > { %v2921_v52 = vmul.f32 %v5264_v0, %v5248_v49  ;;  %4770 = vmatprep.subr.bf16.mxu0 %v5591_v8  ;;  %v5090_v49 = vld [vmem:[#allocation8 + $0x58] sm:$0xff]  }
 0xfd1   : > { %4771 = vmatpush3.bf16.msra.mxu0 %v5088_v58 }
 0xfd2   : > { %4772 = vmatprep.subr.bf16.mxu0 %v5591_v8 }
 0xfd5   : > { %4773 = vmatpush3.bf16.msra.mxu0 %v5089_v61  ;;  %v5112_v61 = vld [vmem:[#allocation11 + $0x14c] ss:$16 sps:$4 sm:$0xff]  }
 0xfd6   : > { %4774 = vmatprep.subr.bf16.mxu0 %v5591_v8 }
 0xfd9   : > { %4775 = vmatpush3.bf16.msra.mxu0 %v5090_v49  ;;  %v5121_v49 = vld [vmem:[#allocation11 + $0x184] ss:$16 sps:$4 sm:$0xff]  }
 0xfda   : > { %4776 = vmatprep.subr.bf16.mxu0 %v5591_v8 }
 0xfdd   : > { %4777 = vmatpush3.bf16.msra.mxu0 %v5091_v2  ;;  %v5124_v2 = vld [vmem:[#allocation11 + $0x18c] ss:$16 sps:$4 sm:$0xff]  }
 0xfde   : > { %4778 = vmatprep.subr.bf16.mxu0 %v5591_v8 }
 0xfe1   : > { %4779 = vmatpush3.bf16.msra.mxu0 %v5092_v4  ;;  %v5119_v4 = vld [vmem:[#allocation11 + $0x180] ss:$16 sps:$4 sm:$0xff]  }
 0xfe2   : > { %4780 = vmatprep.subr.bf16.mxu0 %v5591_v8 }
 0xfe5   : > { %4781 = vmatpush3.bf16.msra.mxu0 %v5093_v6  ;;  %v5122_v6 = vld [vmem:[#allocation11 + $0x188] ss:$16 sps:$4 sm:$0xff]  }
 0xfe6   : > { %4782 = vmatprep.subr.bf16.mxu0 %v5591_v8 }
 0xfe9   : > { %4783 = vmatpush3.bf16.msra.mxu0 %v5094_v7  ;;  %v5127_v7 = vld [vmem:[#allocation11 + $0x1a4] ss:$16 sps:$4 sm:$0xff]  }
 0xff1   : > { %v2906_v43 = vpop.xlane.xlu1 %2905 }
 0xff2   : > { %5265 = vrcp.f32 %v2906_v43 }
 0xff5   : > { %v2637_v44 = vpop.permute.xlu1 %2636 }
 0xff6   : > { %4763 = vmatpush3.bf16.msra.mxu1 %v2637_v44 }
 0xffc   : > { %v5266_v45 = vpop.eup %5265 }
 0xffd   : > { %v2922_v46 = vmul.f32 %v5266_v45, %v5254_v12  ;;  %v5095_v45 = vld [vmem:[#allocation11 + $0x100] ss:$16 sps:$4 sm:$0xff]  }
 0xfff   : > { %v2926_v47 = vpack.c.bf16 %v2922_v46, %v2921_v52  ;;  %v5098_v52 = vld [vmem:[#allocation11 + $0x108] ss:$16 sps:$4 sm:$0xff]   ;;  %v5100_v46 = vld [vmem:[#allocation11 + $0x10c] ss:$16 sps:$4 sm:$0xff]  }
0x1000   : > { %3552 = vmatprep.subr.bf16.mxu0 %v5100_v46  ;;  %v5147_v46 = vld [vmem:[#allocation13 + $0x148] sm:$0xff]  }
0x1001   : > { %4765 = vmatmul.mubr.msk.bf16.vlgmr.msra.gmra.mrb[60].mxu1 %vm1142_vm2, %v2926_v47  ;;  %v5103_v47 = vld [vmem:[#allocation11 + $0x124] ss:$16 sps:$4 sm:$0xff]  }
0x1002   : > { %3541 = vmatprep.mubr.bf16.mxu1 %v5592_v34 }
0x1024   : > { %v2964_v50 = vpop.f32.mrb[28].mxu0 }
0x1025   : > { %v4748_v51 = vpop.f32.mrb[29].mxu0 }
0x1026   : > { %v2967_v55 = vpop.f32.mrb[30].mxu0  ;;  %v5101_v51 = vld [vmem:[#allocation11 + $0x120] ss:$16 sps:$4 sm:$0xff]  }
0x1027   : > { %v4749_v56 = vpop.f32.mrb[31].mxu0 }
0x109d   : > { %v3008_v3 = vpop.f32.mrb[56].mxu1 }
0x109e   : > { %v4754_v59 = vpop.f32.mrb[57].mxu1 }
0x109f   : > { %v3011_v5 = vpop.f32.mrb[58].mxu1  ;;  %v3052_v60 = vpop.f32.mrb[32].mxu0 }
0x10a0   : > { %v4920_v62 = vpack.i.bf16 %v3011_v5, %v3008_v3  ;;  %v4755_v33 = vpop.f32.mrb[59].mxu1  ;;  %v4760_v35 = vpop.f32.mrb[33].mxu0 }
0x10a1   : > { %v3055_v63 = vpop.f32.mrb[34].mxu0  ;;  %v5110_v33 = vld [vmem:[#allocation11 + $0x148] ss:$16 sps:$4 sm:$0xff]   ;;  %v5115_v35 = vld [vmem:[#allocation11 + $0x164] ss:$16 sps:$4 sm:$0xff]  }
0x10a2   : > { %v4925_v1 = vpack.i.bf16 %v3055_v63, %v3052_v60  ;;  %v4761_v48 = vpop.f32.mrb[35].mxu0  ;;  %4921 = vrot.lane.b32.xlu1 %v4920_v62, %s5596_s29  ;;  %v5109_v60 = vld [vmem:[#allocation11 + $0x144] ss:$16 sps:$4 sm:$0xff]   ;;  %v5107_v62 = vld [vmem:[#allocation11 + $0x140] ss:$16 sps:$4 sm:$0xff]   ;;  %s624_s29 = scalar_lea.vmem [#allocation14], %s4221_s9 }
0x10a3   : > { %v5118_v63 = vld [vmem:[#allocation11 + $0x16c] ss:$16 sps:$4 sm:$0xff]   ;;  %v5116_v48 = vld [vmem:[#allocation11 + $0x168] ss:$16 sps:$4 sm:$0xff]   ;;  %s4059_s14 = sshll.u32 %s624_s29, 4  ;;  %s6405_s14 = int_to_ptr.vmem [resolvable:$true] %s4059_s14 }
0x10a4   : > { %4926 = vrot.lane.b32.xlu0 %v4925_v1, %s5595_s26  ;;  %v5113_v1 = vld [vmem:[#allocation11 + $0x160] ss:$16 sps:$4 sm:$0xff]   ;;  %s4451_s26 = sshll.u32 %s5699_s24, 7  ;;  %s5491_s25 = scalar_lea.vmem %s6405_s14, 128 }
0x10a5   : > { %s6403_s16 = scalar_lea.hbm %s6515_s15, %s4451_s26  ;;  %p5492_p6 = scmp.ne.s32.totalorder %s6405_s14, %s5491_s25 }
0x10a6   : > { %s5597_s24 = smov [#allocation14]  }
0x10a7   : > { %p5493_p7 = pnand %p5492_p6, %p6516_p13  ;;  %s5495_s9 = sshll.u32 %s5597_s24, 4  ;;  %s5496_s9 = int_to_ptr.vmem [resolvable:$false] %s5495_s9 }
0x10a8   : > { %p5498_p0 = scmp.lt.s32.totalorder %s6405_s14, %s5496_s9 }
0x10a9   : > { %p5494_p9 = pneg %p5493_p7 }
0x10d4   : > { %v3096_v38 = vpop.f32.mrb[60].mxu1 }
0x10d5   : > { %v4766_v53 = vpop.f32.mrb[61].mxu1 }
0x10d6   : > { %v3099_v9 = vpop.f32.mrb[62].mxu1  ;;  %v5128_v53 = vld [vmem:[#allocation11 + $0x1a8] ss:$16 sps:$4 sm:$0xff]  }
0x10d7   : > { %v4930_v39 = vpack.i.bf16 %v3099_v9, %v3096_v38  ;;  %v4767_v54 = vpop.f32.mrb[63].mxu1  ;;  %v5125_v38 = vld [vmem:[#allocation11 + $0x1a0] ss:$16 sps:$4 sm:$0xff]   ;;  %v5130_v9 = vld [vmem:[#allocation11 + $0x1ac] ss:$16 sps:$4 sm:$0xff]  }
0x10d8   : > { %v5136_v54 = vld [vmem:[#allocation11 + $0x1cc] ss:$16 sps:$4 sm:$0xff]  }
0x10d9   : > { %4931 = vrot.lane.b32.xlu1 %v4930_v39, %s5594_s30  ;;  %v5133_v39 = vld [vmem:[#allocation11 + $0x1c4] ss:$16 sps:$4 sm:$0xff]   ;;  %s6514_s30 = sld [smem:[#allocation31_spill]] }
0x1114   : > { %v4922_v10 = vpop.permute.xlu1 %4921 }
0x1115   : > { %v4924_v11 = vunpack.i.h.bf16 %v4922_v10  ;;  %v4923_v12 = vunpack.i.l.bf16 %v4922_v10  ;;  %v5131_v10 = vld [vmem:[#allocation11 + $0x1c0] ss:$16 sps:$4 sm:$0xff]  }
0x1116   : > { %v4927_v13 = vpop.permute.xlu0 %4926 }
0x1117   : > { %v4929_v14 = vunpack.i.h.bf16 %v4927_v13  ;;  %v4928_v15 = vunpack.i.l.bf16 %v4927_v13  ;;  %v3128_v16 = vsel %vm945_vm1, %v2967_v55, %v4924_v11  ;;  %v3127_v17 = vsel %vm945_vm1, %v2964_v50, %v4923_v12  ;;  %v5106_v50 = vld [vmem:[#allocation11 + $0x12c] ss:$16 sps:$4 sm:$0xff]   ;;  %v5104_v55 = vld [vmem:[#allocation11 + $0x128] ss:$16 sps:$4 sm:$0xff]   ;;  %v5139_v12 = vld [vmem:[#allocation11 + $0x1e4] ss:$16 sps:$4 sm:$0xff]  }
0x1118   : > { %v5134_v11 = vld [vmem:[#allocation11 + $0x1c8] ss:$16 sps:$4 sm:$0xff]   ;;  %v5142_v13 = vld [vmem:[#allocation11 + $0x1ec] ss:$16 sps:$4 sm:$0xff]  }
0x1119   : > { %v3129_v20 = vsel %vm1437_vm3, %v3127_v17, %v4928_v15  ;;  %v3130_v24 = vsel %vm1437_vm3, %v3128_v16, %v4929_v14  ;;  %v5137_v14 = vld [vmem:[#allocation11 + $0x1e0] ss:$16 sps:$4 sm:$0xff]   ;;  %v5140_v15 = vld [vmem:[#allocation11 + $0x1e8] ss:$16 sps:$4 sm:$0xff]  }
0x114b   : > { %v4932_v8 = vpop.permute.xlu1 %4931 }
0x114c   : > { %v4934_v18 = vunpack.i.h.bf16 %v4932_v8  ;;  %v4933_v19 = vunpack.i.l.bf16 %v4932_v8 }
0x114e   : > { %v3132_v27 = vsel %vm1440_vm4, %v3130_v24, %v4934_v18  ;;  %v3131_v28 = vsel %vm1440_vm4, %v3129_v20, %v4933_v19 }
0x114f   : > { %v3133_v29 = vpack.c.bf16 %v3132_v27, %v3131_v28  ;;  %v4379_v28 = vld [vmem:[%s6510_s4 + $0x1] ss:$0 sm:$0xff] }
0x1151   : > { %4785 = vmatmul.mubr.bf16.vlgmr.msra.gmra.mrb[36].mxu0 %v3133_v29 }
0x1152   : > { %3584 = vmatprep.mubr.bf16.mxu0 %v5592_v34  ;;  %v5097_v34 = vld [vmem:[#allocation11 + $0x104] ss:$16 sps:$4 sm:$0xff]   ;;  %3553 = vmatpush1.bf16.msra.mxu0 %v5098_v52 }
0x1153   : > { %3509 = vmatprep.subr.bf16.mxu1 %v5097_v34  ;;  %3554 = vmatprep.subr.bf16.mxu0 %v5106_v50  ;;  %v5145_v34 = vld [vmem:[#allocation13 + $0x100] sm:$0xff]   ;;  %v5149_v50 = vld [vmem:[#allocation13 + $0x108] sm:$0xff]  }
0x1154   : > { %3510 = vmatpush1.bf16.msra.mxu1 %v5095_v45  ;;  %v5144_v45 = vld [vmem:[#allocation13 + $0x1c0] sm:$0xff]  }
0x1155   : > { %3511 = vmatprep.subr.bf16.mxu1 %v5103_v47  ;;  %v5146_v52 = vld [vmem:[#allocation13 + $0x180] sm:$0xff]   ;;  %v5148_v47 = vld [vmem:[#allocation13 + $0x1c8] sm:$0xff]  }
0x1156   : > { %3555 = vmatpush1.bf16.msra.mxu0 %v5104_v55  ;;  %v5151_v55 = vld [vmem:[#allocation13 + $0x150] sm:$0xff]  }
0x1157   : > { %3556 = vmatprep.subr.bf16.mxu0 %v5112_v61  ;;  %v5161_v61 = vld [vmem:[#allocation13 + $0x120] sm:$0xff]  }
0x1158   : > { %3512 = vmatpush1.bf16.msra.mxu1 %v5101_v51  ;;  %v5150_v51 = vld [vmem:[#allocation13 + $0x188] sm:$0xff]  }
0x1159   : > { %3513 = vmatprep.subr.bf16.mxu1 %v5109_v60  ;;  %v5160_v60 = vld [vmem:[#allocation13 + $0x1e0] sm:$0xff]  }
0x115a   : > { %3557 = vmatpush1.bf16.msra.mxu0 %v5110_v33  ;;  %v5163_v33 = vld [vmem:[#allocation13 + $0x168] sm:$0xff]  }
0x115b   : > { %3558 = vmatprep.subr.bf16.mxu0 %v5118_v63  ;;  %v5165_v63 = vld [vmem:[#allocation13 + $0x128] sm:$0xff]  }
0x115c   : > { %3514 = vmatpush1.bf16.msra.mxu1 %v5107_v62  ;;  %v5162_v62 = vld [vmem:[#allocation13 + $0x1a0] sm:$0xff]  }
0x115d   : > { %3515 = vmatprep.subr.bf16.mxu1 %v5115_v35  ;;  %v5164_v35 = vld [vmem:[#allocation13 + $0x1e8] sm:$0xff]  }
0x115e   : > { %3559 = vmatpush1.bf16.msra.mxu0 %v5116_v48  ;;  %v5167_v48 = vld [vmem:[#allocation13 + $0x170] sm:$0xff]  }
0x115f   : > { %3560 = vmatprep.subr.bf16.mxu0 %v5124_v2  ;;  %v5169_v2 = vld [vmem:[#allocation13 + $0x130] sm:$0xff]  }
0x1160   : > { %3516 = vmatpush1.bf16.msra.mxu1 %v5113_v1  ;;  %v5166_v1 = vld [vmem:[#allocation13 + $0x1a8] sm:$0xff]  }
0x1161   : > { %3517 = vmatprep.subr.bf16.mxu1 %v5121_v49  ;;  %v5168_v49 = vld [vmem:[#allocation13 + $0x1f0] sm:$0xff]  }
0x1162   : > { %3561 = vmatpush1.bf16.msra.mxu0 %v5122_v6  ;;  %v5171_v6 = vld [vmem:[#allocation13 + $0x178] sm:$0xff]  }
0x1163   : > { %3562 = vmatprep.subr.bf16.mxu0 %v5130_v9  ;;  %v4381_v9 = vld [vmem:[%s6511_s0 + $0x4] sm:$0xf] }
0x1164   : > { %3518 = vmatpush1.bf16.msra.mxu1 %v5119_v4  ;;  %v5170_v4 = vld [vmem:[#allocation13 + $0x1b0] sm:$0xff]  }
0x1165   : > { %3519 = vmatprep.subr.bf16.mxu1 %v5127_v7  ;;  %v5172_v7 = vld [vmem:[#allocation13 + $0x1f8] sm:$0xff]  }
0x1166   : > { %3563 = vmatpush1.bf16.msra.mxu0 %v5128_v53  ;;  %v5174_v53 = vld [vmem:[#allocation13 + $0x1b8] sm:$0xff]  }
0x1167   : > { %3564 = vmatprep.subr.bf16.mxu0 %v5136_v54  ;;  %v3340_v54 = vrot.slane %v4381_v9, %v1643_v23 }
0x1168   : > { %3520 = vmatpush1.bf16.msra.mxu1 %v5125_v38  ;;  %v5173_v38 = vld [vmem:[#allocation13 + $0x138] sm:$0xff]  }
0x1169   : > { %3521 = vmatprep.subr.bf16.mxu1 %v5133_v39  ;;  %v3332_v39 = vrot.slane %v4381_v9, %v1635_v22 }
0x116a   : > { %3565 = vmatpush1.bf16.msra.mxu0 %v5134_v11  ;;  %v3344_v11 = vrot.slane %v4381_v9, %v1647_v26 }
0x116b   : > { %3566 = vmatprep.subr.bf16.mxu0 %v5142_v13 }
0x116c   : > { %3522 = vmatpush1.bf16.msra.mxu1 %v5131_v10  ;;  %v3336_v10 = vrot.slane %v4381_v9, %v1639_v25 }
0x116d   : > { %3523 = vmatprep.subr.bf16.mxu1 %v5139_v12 }
0x116e   : > { %3567 = vmatpush1.bf16.msra.mxu0 %v5140_v15 }
0x116f   : > { %4590 = vmatprep.subr.bf16.mxu0 %v5144_v45 }
0x1170   : > { %3524 = vmatpush1.bf16.msra.mxu1 %v5137_v14 }
0x1224   : > { %v3241_v42 = vpop.f32.mrb[36].mxu0 }
0x1225   : > { %v3242_v31 = vadd.f32 %v4369_v30, %v3241_v42  ;;  %v4786_v32 = vpop.f32.mrb[37].mxu0 }
0x1226   : > { %v3244_v37 = vpop.f32.mrb[38].mxu0 }
0x1227   : > { %v3245_v41 = vadd.f32 %v4369_v30, %v3244_v37  ;;  %v4787_v43 = vpop.f32.mrb[39].mxu0  ;;  %v3248_v44 = vadd.f32 %v3242_v31, %v6206_v36  ;;  %v4380_v31 = vld [vmem:[#allocation10 + $0x1] ss:$0 sm:$0xff] }
0x1229   : > { %v6325_v0 = vadd.f32 %v3245_v41, %v6210_v40  ;;  %3254 = vadd.xlane.f32.xlu0 %v3248_v44 }
0x122b   : > { %3256 = vadd.xlane.f32.xlu1 %v6325_v0 }
0x12b6   : > { %v3255_v36 = vpop.xlane.xlu0 %3254 }
0x12b7   : > { %v3258_v40 = vmul.f32 0.0078125, %v3255_v36  ;;  %v5152_v36 = vld [vmem:[#allocation13 + $0x1d0] sm:$0xff]  }
0x12b8   : > { %v3257_v56 = vpop.xlane.xlu1 %3256 }
0x12b9   : > { %v6328_v57 = vsub.f32 %v3248_v44, %v3258_v40  ;;  %v3259_v58 = vmul.f32 0.0078125, %v3257_v56  ;;  %v5143_v44 = vld [vmem:[#allocation13 + $0x140] sm:$0xff]   ;;  %v5153_v40 = vld [vmem:[#allocation13 + $0x110] sm:$0xff]  }
0x12ba   : > { %4568 = vmatprep.subr.bf16.mxu1 %v5143_v44  ;;  %v5154_v56 = vld [vmem:[#allocation13 + $0x190] sm:$0xff]  }
0x12bb   : > { %v6331_v3 = vsub.f32 %v6325_v0, %v3259_v58  ;;  %v3262_v59 = vmul.f32 %v6328_v57, %v6328_v57  ;;  %v5156_v58 = vld [vmem:[#allocation13 + $0x1d8] sm:$0xff]  }
0x12bd   : > { %3264 = vadd.xlane.f32.xlu0 %v3262_v59  ;;  %v3263_v5 = vmul.f32 %v6331_v3, %v6331_v3  ;;  %v5158_v59 = vld [vmem:[#allocation13 + $0x198] sm:$0xff]  }
0x12c1   : > { %3266 = vadd.xlane.f32.xlu0 %v3263_v5  ;;  %v5159_v5 = vld [vmem:[#allocation13 + $0x160] sm:$0xff]  }
0x134a   : > { %v3265_v16 = vpop.xlane.xlu0 %3264 }
0x134b   : > { %v3268_v17 = vmul.f32 0.0078125, %v3265_v16 }
0x134d   : > { %v3270_v8 = vadd.f32 1e-05, %v3268_v17 }
0x134e   : > { %v3267_v18 = vpop.xlane.xlu0 %3266 }
0x134f   : > { %5267 = vrsqrt.f32 %v3270_v8  ;;  %v3269_v19 = vmul.f32 0.0078125, %v3267_v18 }
0x1351   : > { %v3271_v20 = vadd.f32 1e-05, %v3269_v19 }
0x1353   : > { %5269 = vrsqrt.f32 %v3271_v20 }
0x1359   : > { %v5268_v24 = vpop.eup %5267 }
0x135a   : > { %v3274_v27 = vmul.f32 %v5268_v24, %v6328_v57  ;;  %v5155_v57 = vld [vmem:[#allocation13 + $0x158] sm:$0xff]  }
0x135c   : > { %v3282_v42 = vmul.f32 %v4379_v28, %v3274_v27 }
0x135d   : > { %v5270_v29 = vpop.eup %5269 }
0x135e   : > { %v3275_v30 = vmul.f32 %v5270_v29, %v6331_v3  ;;  %v3290_v37 = vadd.f32 %v4380_v31, %v3282_v42  ;;  %v5157_v3 = vld [vmem:[#allocation13 + $0x118] sm:$0xff]  }
0x1360   : > { %v3283_v32 = vmul.f32 %v4379_v28, %v3275_v30 }
0x1362   : > { %v3291_v41 = vadd.f32 %v4380_v31, %v3283_v32 }
0x1364   : > { %v3292_v43 = vpack.c.bf16 %v3291_v41, %v3290_v37 }
0x1366   : > { %3542 = vmatmul.mubr.bf16.vlgmr.msra.gmra.mrb[64].mxu1 %v3292_v43  ;;  %3585 = vmatmul.mubr.bf16.vlgmr.msra.gmra.mrb[40].mxu0 %v3292_v43 }
0x1367   : > { %4569 = vmatpush3.bf16.msra.mxu1 %v5145_v34  ;;  %4591 = vmatpush3.bf16.msra.mxu0 %v5146_v52 }
0x1368   : > { %4570 = vmatprep.subr.bf16.mxu1 %v5147_v46  ;;  %4592 = vmatprep.subr.bf16.mxu0 %v5148_v47 }
0x136b   : > { %4571 = vmatpush3.bf16.msra.mxu1 %v5149_v50  ;;  %4593 = vmatpush3.bf16.msra.mxu0 %v5150_v51 }
0x136c   : > { %4572 = vmatprep.subr.bf16.mxu1 %v5151_v55  ;;  %4594 = vmatprep.subr.bf16.mxu0 %v5152_v36 }
0x136f   : > { %4573 = vmatpush3.bf16.msra.mxu1 %v5153_v40  ;;  %4595 = vmatpush3.bf16.msra.mxu0 %v5154_v56 }
0x1370   : > { %4574 = vmatprep.subr.bf16.mxu1 %v5155_v57  ;;  %4596 = vmatprep.subr.bf16.mxu0 %v5156_v58 }
0x1373   : > { %4575 = vmatpush3.bf16.msra.mxu1 %v5157_v3  ;;  %4597 = vmatpush3.bf16.msra.mxu0 %v5158_v59 }
0x1374   : > { %4576 = vmatprep.subr.bf16.mxu1 %v5159_v5  ;;  %4598 = vmatprep.subr.bf16.mxu0 %v5160_v60 }
0x1377   : > { %4577 = vmatpush3.bf16.msra.mxu1 %v5161_v61  ;;  %4599 = vmatpush3.bf16.msra.mxu0 %v5162_v62 }
0x1378   : > { %4578 = vmatprep.subr.bf16.mxu1 %v5163_v33  ;;  %4600 = vmatprep.subr.bf16.mxu0 %v5164_v35 }
0x137b   : > { %4579 = vmatpush3.bf16.msra.mxu1 %v5165_v63  ;;  %4601 = vmatpush3.bf16.msra.mxu0 %v5166_v1 }
0x137c   : > { %4580 = vmatprep.subr.bf16.mxu1 %v5167_v48  ;;  %4602 = vmatprep.subr.bf16.mxu0 %v5168_v49 }
0x137f   : > { %4581 = vmatpush3.bf16.msra.mxu1 %v5169_v2  ;;  %4603 = vmatpush3.bf16.msra.mxu0 %v5170_v4 }
0x1380   : > { %4582 = vmatprep.subr.bf16.mxu1 %v5171_v6  ;;  %4604 = vmatprep.subr.bf16.mxu0 %v5172_v7 }
0x1383   : > { %4583 = vmatpush3.bf16.msra.mxu1 %v5173_v38  ;;  %4605 = vmatpush3.bf16.msra.mxu0 %v5174_v53 }
0x1439   : > { %v3543_v12 = vpop.f32.mrb[64].mxu1  ;;  %v3586_v13 = vpop.f32.mrb[40].mxu0 }
0x143a   : > { %v6353_v14 = vadd.f32 %v3543_v12, %v3332_v39  ;;  %v6355_v15 = vadd.f32 %v3586_v13, %v3340_v54  ;;  %v3545_v16 = vpop.f32.mrb[65].mxu1  ;;  %v3588_v17 = vpop.f32.mrb[41].mxu0 }
0x143b   : > { %v6357_v8 = vadd.f32 %v3545_v16, %v3336_v10  ;;  %v6359_v22 = vadd.f32 %v3588_v17, %v3344_v11  ;;  %v3547_v18 = vpop.f32.mrb[66].mxu1  ;;  %v3590_v23 = vpop.f32.mrb[42].mxu0 }
0x143c   : > { %v3603_v25 = vmul.f32 %v6353_v14, %v6353_v14  ;;  %v3605_v21 = vmul.f32 %v6355_v15, %v6355_v15  ;;  %v3549_v26 = vpop.f32.mrb[67].mxu1  ;;  %v3592_v19 = vpop.f32.mrb[43].mxu0  ;;  %v3548_v27 = vadd.f32 %v3547_v18, %v3332_v39  ;;  %v3591_v28 = vadd.f32 %v3590_v23, %v3340_v54 }
0x143d   : > { %v3604_v20 = vmul.f32 %v6357_v8, %v6357_v8  ;;  %v3606_v24 = vmul.f32 %v6359_v22, %v6359_v22  ;;  %v3550_v42 = vadd.f32 %v3549_v26, %v3336_v10  ;;  %v6371_v31 = vadd.f32 %v3592_v19, %v3344_v11 }
0x143e   : > { %v3611_v29 = vmul.f32 %v3603_v25, %v6353_v14  ;;  %v3613_v30 = vmul.f32 %v3605_v21, %v6355_v15  ;;  %v3607_v41 = vmul.f32 %v3548_v27, %v3548_v27  ;;  %v3609_v45 = vmul.f32 %v3591_v28, %v3591_v28 }
0x143f   : > { %v3612_v32 = vmul.f32 %v3604_v20, %v6357_v8  ;;  %v3614_v37 = vmul.f32 %v3606_v24, %v6359_v22  ;;  %v3608_v47 = vmul.f32 %v3550_v42, %v3550_v42  ;;  %v3610_v36 = vmul.f32 %v6371_v31, %v6371_v31 }
0x1440   : > { %v3619_v43 = vmul.f32 0.044715, %v3611_v29  ;;  %v3621_v44 = vmul.f32 0.044715, %v3613_v30  ;;  %v3615_v46 = vmul.f32 %v3607_v41, %v3548_v27  ;;  %v3617_v55 = vmul.f32 %v3609_v45, %v3591_v28 }
0x1441   : > { %v3620_v34 = vmul.f32 0.044715, %v3612_v32  ;;  %v3622_v52 = vmul.f32 0.044715, %v3614_v37  ;;  %v3616_v58 = vmul.f32 %v3608_v47, %v3550_v42  ;;  %v3618_v60 = vmul.f32 %v3610_v36, %v6371_v31  ;;  %v4415_v36 = vld [vmem:[%s6512_s10 + $0x1] ss:$0 sm:$0xff] }
0x1442   : > { %v3627_v50 = vadd.f32 %v3619_v43, %v6353_v14  ;;  %v3629_v51 = vadd.f32 %v3621_v44, %v6355_v15  ;;  %v3623_v57 = vmul.f32 0.044715, %v3615_v46  ;;  %v3625_v5 = vmul.f32 0.044715, %v3617_v55 }
0x1443   : > { %v3628_v40 = vadd.f32 %v3620_v34, %v6357_v8  ;;  %v3630_v56 = vadd.f32 %v3622_v52, %v6359_v22  ;;  %v3624_v35 = vmul.f32 0.044715, %v3616_v58  ;;  %v3626_v1 = vmul.f32 0.044715, %v3618_v60 }
0x1444   : > { %v3635_v3 = vmul.f32 0.7978846, %v3627_v50  ;;  %v3637_v59 = vmul.f32 0.7978846, %v3629_v51  ;;  %v3631_v33 = vadd.f32 %v3623_v57, %v3548_v27  ;;  %v3633_v63 = vadd.f32 %v3625_v5, %v3591_v28 }
0x1445   : > { %v3636_v61 = vmul.f32 0.7978846, %v3628_v40  ;;  %v3638_v62 = vmul.f32 0.7978846, %v3630_v56  ;;  %v3632_v49 = vadd.f32 %v3624_v35, %v3550_v42  ;;  %v3634_v4 = vadd.f32 %v3626_v1, %v6371_v31 }
0x1446   : > { %5271 = vtanh.f32 %v3635_v3  ;;  %v3639_v48 = vmul.f32 0.7978846, %v3631_v33  ;;  %v3641_v2 = vmul.f32 0.7978846, %v3633_v63  ;;  %v3595_v11 = vmul.f32 0.5, %v6353_v14 }
0x1447   : > { %5273 = vtanh.f32 %v3637_v59  ;;  %v3640_v6 = vmul.f32 0.7978846, %v3632_v49  ;;  %v3642_v7 = vmul.f32 0.7978846, %v3634_v4  ;;  %v3597_v12 = vmul.f32 0.5, %v6355_v15 }
0x1448   : > { %5275 = vtanh.f32 %v3636_v61  ;;  %v3599_v17 = vmul.f32 0.5, %v3548_v27  ;;  %v3601_v18 = vmul.f32 0.5, %v3591_v28  ;;  %v3596_v26 = vmul.f32 0.5, %v6357_v8  ;;  %v4448_v49 = vld [vmem:[%s6513_s13] ss:$0 sm:$0xff]  ;;  %s5497_s13 = scalar_lea.vmem %s5496_s9, 256 }
0x1449   : > { %5277 = vtanh.f32 %v3638_v62  ;;  %v3600_v19 = vmul.f32 0.5, %v3550_v42  ;;  %v3598_v32 = vmul.f32 0.5, %v6359_v22  ;;  %v3602_v15 = vmul.f32 0.5, %v6371_v31  ;;  %p5499_p2 = scmp.lt.s32.totalorder %s5497_s13, %s5491_s25 }
0x144a   : > { %5279 = vtanh.f32 %v3639_v48 }
0x144b   : > { %5281 = vtanh.f32 %v3641_v2  ;;  %v4449_v2 = vld [vmem:[%s6514_s30] ss:$0 sm:$0xff]  ;;  %p5500_p5 = por %p5499_p2, %p5498_p0 }
0x144c   : > { %5283 = vtanh.f32 %v3640_v6 }
0x144d   : > { %5285 = vtanh.f32 %v3642_v7  ;;  %p5501_p8 = pnand %p5500_p5, %p5494_p9 }
0x1450   : > { %v5272_v38 = vpop.eup %5271 }
0x1451   : > { %v5274_v53 = vpop.eup %5273  ;;  %v3651_v54 = vadd.f32 1.0, %v5272_v38 }
0x1452   : > { %v5276_v9 = vpop.eup %5275  ;;  %v3653_v13 = vadd.f32 1.0, %v5274_v53 }
0x1453   : > { %v5278_v39 = vpop.eup %5277  ;;  %v3652_v23 = vadd.f32 1.0, %v5276_v9  ;;  %v3659_v37 = vmul.f32 %v3651_v54, %v3595_v11 }
0x1454   : > { %v5280_v10 = vpop.eup %5279  ;;  %v3654_v20 = vadd.f32 1.0, %v5278_v39  ;;  %v3661_v43 = vmul.f32 %v3653_v13, %v3597_v12 }
0x1455   : > { %v5282_v16 = vpop.eup %5281  ;;  %v3655_v25 = vadd.f32 1.0, %v5280_v10  ;;  %v3660_v28 = vmul.f32 %v3652_v23, %v3596_v26 }
0x1456   : > { %v5284_v21 = vpop.eup %5283  ;;  %v3657_v24 = vadd.f32 1.0, %v5282_v16  ;;  %v3662_v34 = vmul.f32 %v3654_v20, %v3598_v32 }
0x1457   : > { %v5286_v29 = vpop.eup %5285  ;;  %v3656_v30 = vadd.f32 1.0, %v5284_v21  ;;  %v3663_v14 = vmul.f32 %v3655_v25, %v3599_v17 }
0x1458   : > { %v3658_v41 = vadd.f32 1.0, %v5286_v29  ;;  %v3665_v27 = vmul.f32 %v3657_v24, %v3601_v18 }
0x1459   : > { %v3664_v44 = vmul.f32 %v3656_v30, %v3600_v19  ;;  %v3667_v45 = vpack.c.bf16 %v3663_v14, %v3659_v37 }
0x145a   : > { %v3666_v52 = vmul.f32 %v3658_v41, %v3602_v15  ;;  %v3669_v8 = vpack.c.bf16 %v3665_v27, %v3661_v43 }
0x145b   : > { %v3668_v42 = vpack.c.bf16 %v3664_v44, %v3660_v28 }
0x145c   : > { %v3670_v46 = vpack.c.bf16 %v3666_v52, %v3662_v34 }
0x145d   : > { %3968 = vmatprep.mubr.bf16.mxu1 %v3668_v42 }
0x145e   : > { %4008 = vmatprep.mubr.bf16.mxu0 %v3670_v46  ;;  %3969 = vmatmul.mubr.bf16.vlgmr.msra.gmra.mrb[68].mxu1 %v3667_v45 }
0x145f   : > { %4009 = vmatmul.mubr.bf16.vlgmr.msra.gmra.mrb[44].mxu0 %v3669_v8 }
0x1531   : > { %v4584_v22 = vpop.f32.mrb[68].mxu1 }
0x1532   : > { %v4606_v47 = vpop.f32.mrb[44].mxu0  ;;  %v4585_v50 = vpop.f32.mrb[69].mxu1 }
0x1533   : > { %v4607_v51 = vpop.f32.mrb[45].mxu0  ;;  %v4587_v31 = vpop.f32.mrb[70].mxu1 }
0x1534   : > { %v4609_v55 = vpop.f32.mrb[46].mxu0  ;;  %v4588_v40 = vpop.f32.mrb[71].mxu1 }
0x1535   : > { %v4589_v56 = vadd.f32 %v4588_v40, %v4587_v31  ;;  %v4610_v57 = vpop.f32.mrb[47].mxu0 }
0x1536   : > { %v4611_v58 = vadd.f32 %v4610_v57, %v4609_v55 }
0x1537   : > { %v3973_v3 = vadd.f32 %v4589_v56, %v4415_v36 }
0x1539   : > { %v4013_v59 = vadd.f32 %v4611_v58, %v3973_v3 }
0x153b   : > { %v4016_v5 = vadd.f32 %v4013_v59, %v6325_v0 }
0x153d   : > { %4019 = vadd.xlane.f32.xlu0 %v4016_v5 }
0x15ca   : > { %v4020_v60 = vpop.xlane.xlu0 %4019 }
0x15cb   : > { %v4021_v61 = vmul.f32 0.0078125, %v4020_v60 }
0x15cd   : > { %v4022_v62 = vsub.f32 %v4016_v5, %v4021_v61 }
0x15cf   : > { %v4023_v33 = vmul.f32 %v4022_v62, %v4022_v62 }
0x15d1   : > { %4024 = vadd.xlane.f32.xlu1 %v4023_v33 }
0x165e   : > { %v4025_v35 = vpop.xlane.xlu1 %4024 }
0x165f   : > { %v4026_v63 = vmul.f32 0.0078125, %v4025_v35 }
0x1661   : > { %v4027_v1 = vadd.f32 1e-05, %v4026_v63 }
0x1663   : > { %5287 = vrsqrt.f32 %v4027_v1 }
0x166d   : > { %v5288_v48 = vpop.eup %5287 }
0x166e   : > { %v4029_v0 = vmul.f32 %v5288_v48, %v4022_v62 }
0x1670   : > { %v4036_v4 = vmul.f32 %v4448_v49, %v4029_v0 }
0x1672   : > { %v4043_v6 = vadd.f32 %v4449_v2, %v4036_v4 }
0x1674   : > { %4044 = vst [vmem:[%s624_s29] sm:$0xff] %v4043_v6 }
0x1675   : > { %5504 = shalt.err (!%p5501_p8)
}
0x1676   : > { %s5505_s11 = scalar_lea.hbm %s6403_s16, 128  ;;  %s5509_s30 = scalar_lea.hbm %s6515_s15, 256 }
0x1677   : > { %p5506_p4 = scmp.ne.s32.totalorder %s6403_s16, %s5505_s11  ;;  %p5510_p1 = scmp.lt.u32.totalorder %s6403_s16, %s6515_s15 }
0x1678   : > { %p5511_p11 = scmp.lt.u32.totalorder %s5509_s30, %s5505_s11  ;;  %p5513_p6 = scmp.lt.u32.totalorder %s5505_s11, %s6403_s16 }
0x1679   : > { %p5507_p3 = pnand %p5506_p4, %p6516_p13 }
0x167a   : > { %p5512_p12 = por %p5511_p11, %p5510_p1 }
0x167b   : > { %p5508_p10 = pneg %p5507_p3 }
0x167c   : > { %p5514_p7 = por %p5513_p6, %p5512_p12 }
0x167e   : > { %p5515_p9 = pnand %p5514_p7, %p5508_p10 }
0x1680   : > { %5518 = shalt.err (!%p5515_p9)
}
0x1681   : > { %4812 = dma.vmem_to_hbm [thread:$0]  (%p6516_p13), %s6405_s14, 128, %s6403_s16, %s4046_s7  }
0x1682 PF: > { %s4071_s12 = sand.u32 1, %s5561_s18   ;;  %p6517_p0 = scmp.ne.s32.totalorder %s6499_s27, 0 }
0x1683   : > { %p6518_p2 = scmp.ge.s32.totalorder %s5573_s21, 2  ;;  %s4072_s5 = scalar_lea.sflag [#allocation4], %s4071_s12 }
0x1685   : > { %p4838_p5 = pnand %p6518_p2, %p6517_p0 }
0x1687   : > { %5556 = dma.done.wait (!%p4838_p5), %s4072_s5, 128  }
0x1688   : > { %5558 = vsyncadd (!%p4838_p5), %s4072_s5, 4294967168  ;;  %p33_p8 = scmp.ge.s32.totalorder %s5835_s28, 4   ;;  %s6519_s18 = smov %s5565_s19 }
0x1689   : > { %s6520_s19 = smov %s5569_s20  ;;  %s6521_s20 = smov %s5846_s22 }
0x168a   : > { %s6522_s21 = smov %s5835_s28  ;;  %35 = sbr.rel (!%p33_p8) target bundleno = 22 (0x16), region = 169 }
0x1691   :  { %4077 = vsyncpa [#allocation3], 1 }
0x1692   :  { %4079 = vsyncpa [#allocation3 + $0x1], 1 }
0x1693   :  { %4080 = vsyncpa [#allocation6], 1 }
0x1694   :  { %4082 = vsyncpa [#allocation6 + $0x1], 1 }
0x1695   :  { %4083 = vsyncpa [#allocation9], 1 }
0x1696   :  { %4084 = vsyncpa [#allocation12], 1 }
0x1697   :  { %4085 = vsyncpa [#allocation4], 1 }
0x1698   :  { %4087 = vsyncpa [#allocation4 + $0x1], 1 }

</bundles_post_ra>
